<compile_context>
chip_gen: v6e
topology: v6e:2x2x1
jax: 0.10.0
libtpu: 0.0.40
codegen_flags: <defaults>
</compile_context>

<pallas_src>
import math

import jax
import jax.numpy as jnp
from jax.experimental import pallas as pl
from jax.experimental.pallas import tpu as pltpu

# ----------------------------- hyper-parameters ------------------------------
VOCAB = 100
TYPE_VOCAB = 2
MAX_POS = 16
B = 2            # batch
S = 8            # sequence length
H = 32           # hidden size
N_LAYERS = 2     # num_hidden_layers
N_HEADS = 4      # num_attention_heads
D_HEAD = H // N_HEADS
INTER = 64       # FFN intermediate size
NUM_LABELS = 3   # task.num_labels after setup()
LOGITS_PAD = 128  # pad the head output to a full 128-lane (unmasked) store
NG = N_HEADS * B  # fused (head, batch) attention batch axis, g = head*B + batch
LN_EPS = 1e-12
NEG_INF = -1e9   # additive attention-mask value
LANES = 128

# ------------------------------- kernel helpers -------------------------------


def _layernorm(x, g, b):
    mu = jnp.mean(x, axis=-1, keepdims=True)
    var = jnp.mean(jnp.square(x - mu), axis=-1, keepdims=True)
    return (x - mu) * jax.lax.rsqrt(var + LN_EPS) * g + b


def _gelu_tanh(x):
    # TODO(synk): HF BERT default act is exact (erf) GELU; tanh approximation used here.
    c = math.sqrt(2.0 / math.pi)
    return 0.5 * x * (1.0 + jnp.tanh(c * (x + 0.044715 * x * x * x)))


# ------------------------------ fused Pallas kernel ----------------------------


def fused_model_kernel(emb_ref, amask_ref, hmask_ref, gvec_ref, lvec_ref,
                       wqkv_ref, wo_ref, w1_ref, w2_ref, headw_ref,
                       h_out_ref, attn_ref, pooled_ref, logits_ref):
    """Whole forward pass in a single (grid-free) invocation; layers unrolled."""
    gv = gvec_ref[...]                                     # [4, 128] packed globals

    # Embedding LayerNorm seeds the hidden state.
    h = _layernorm(emb_ref[...].reshape(B * S, H), gv[0:1, :H], gv[1:2, :H])

    amask_b = amask_ref[...][:, None, :]                   # [NG, 1, S] additive mask
    inv_sqrt_d = 1.0 / math.sqrt(D_HEAD)

    def split_heads(x2):
        # [B*S, H] -> [NG, S, D_HEAD]  with g = head * B + batch
        xh = jnp.stack(
            [x2[:, hh * D_HEAD:(hh + 1) * D_HEAD] for hh in range(N_HEADS)], axis=0)
        return xh.reshape(NG, S, D_HEAD)

    for l in range(N_LAYERS):                              # static unroll (N_LAYERS = 2)
        lv = lvec_ref[l]                                   # [8, 128] packed per-layer vectors
        bqkv = lv[0:1, :3 * H]
        bo = lv[1:2, :H]
        ln1g = lv[2:3, :H]
        ln1b = lv[3:4, :H]
        b1 = lv[4:5, :INTER]
        b2 = lv[5:6, :H]
        ln2g = lv[6:7, :H]
        ln2b = lv[7:8, :H]

        # ---- fused QKV projection: one [B*S,H] x [H,3H] matmul ----
        qkv = jnp.dot(h, wqkv_ref[l], preferred_element_type=jnp.float32) + bqkv
        q = split_heads(qkv[:, 0:H])
        k = split_heads(qkv[:, H:2 * H])
        v = split_heads(qkv[:, 2 * H:3 * H])

        # ---- scaled dot-product attention over the fused (head, batch) axis ----
        s = jnp.einsum('gqd,gkd->gqk', q, k, preferred_element_type=jnp.float32)
        s = s * inv_sqrt_d + amask_b
        s = s - jnp.max(s, axis=-1, keepdims=True)
        e = jnp.exp(s)
        p = e * pl.reciprocal(jnp.sum(e, axis=-1, keepdims=True), approx=True)
        p = p * hmask_ref[l][:, :, None]                   # HF: head_mask multiplies probs

        # lane-dense store of the attention probabilities: [NG, S*S]
        attn_ref[l] = jnp.concatenate([p[:, qq, :] for qq in range(S)], axis=-1)

        ctx = jnp.einsum('gqk,gkd->gqd', p, v, preferred_element_type=jnp.float32)

        # ---- fused output projection: regroup heads to lanes, one [B*S,H]x[H,H] dot ----
        ctx_h = ctx.reshape(N_HEADS, B * S, D_HEAD)
        ctx_flat = jnp.concatenate([ctx_h[hh] for hh in range(N_HEADS)], axis=-1)
        attn_out = jnp.dot(ctx_flat, wo_ref[l], preferred_element_type=jnp.float32) + bo
        h1 = _layernorm(attn_out + h, ln1g, ln1b)

        # ---- FFN + residual + LayerNorm ----
        inter = _gelu_tanh(jnp.dot(h1, w1_ref[l], preferred_element_type=jnp.float32) + b1)
        ffn = jnp.dot(inter, w2_ref[l], preferred_element_type=jnp.float32) + b2
        h = _layernorm(ffn + h1, ln2g, ln2b)

    h3 = h.reshape(B, S, H)
    h_out_ref[...] = h3

    # ---- pooler tanh + (128-lane padded) classification head ----
    hw = headw_ref[...]                                    # [2, H, 128]
    cls = h3[:, 0, :]                                      # [B, H] (CLS token)
    pooled = jnp.tanh(jnp.dot(cls, hw[0, :, :H],
                              preferred_element_type=jnp.float32) + gv[2:3, :H])
    pooled_ref[...] = pooled
    logits_ref[...] = jnp.dot(pooled, hw[1],
                              preferred_element_type=jnp.float32) + gv[3:4, :]


# ------------------------------ wrapper (forward) ------------------------------


def forward(params, input_ids, attention_mask, token_type_ids, head_mask):
    # Embedding gathers are XLA glue; everything else is one fused Pallas call.
    emb = (params['word_emb'][input_ids]
           + params['pos_emb'][None, :S, :]
           + params['type_emb'][token_type_ids])

    # Additive mask / head mask tiled to the fused (head, batch) axis g = h*B + b.
    amask = (1.0 - attention_mask.astype(jnp.float32)) * NEG_INF              # [B, S]
    amask_g = jnp.tile(amask, (N_HEADS, 1))                                   # [NG, S]
    hmask_g = jnp.repeat(head_mask.astype(jnp.float32), B, axis=1)[..., None]  # [L, NG, 1]

    # Global small vectors packed into one [4, 128] slab.
    gvec = jnp.zeros((4, LANES), jnp.float32)
    gvec = gvec.at[0, :H].set(params['emb_ln_g'][0])
    gvec = gvec.at[1, :H].set(params['emb_ln_b'][0])
    gvec = gvec.at[2, :H].set(params['b_pool'][0])
    gvec = gvec.at[3, :NUM_LABELS].set(params['b_head'][0])

    # Per-layer small vectors packed into one [L, 8, 128] slab.
    lvec = jnp.zeros((N_LAYERS, 8, LANES), jnp.float32)
    lvec = lvec.at[:, 0, :3 * H].set(params['bqkv'][:, 0, :])
    lvec = lvec.at[:, 1, :H].set(params['bo'][:, 0, :])
    lvec = lvec.at[:, 2, :H].set(params['ln1_g'][:, 0, :])
    lvec = lvec.at[:, 3, :H].set(params['ln1_b'][:, 0, :])
    lvec = lvec.at[:, 4, :INTER].set(params['b1'][:, 0, :])
    lvec = lvec.at[:, 5, :H].set(params['b2'][:, 0, :])
    lvec = lvec.at[:, 6, :H].set(params['ln2_g'][:, 0, :])
    lvec = lvec.at[:, 7, :H].set(params['ln2_b'][:, 0, :])

    # Pooler weight + (128-lane padded) head weight stacked into one [2, H, 128] slab.
    headw = jnp.zeros((2, H, LANES), jnp.float32)
    headw = headw.at[0, :, :H].set(params['w_pool'])
    headw = headw.at[1, :, :NUM_LABELS].set(params['w_head'])

    last_hidden, attn_flat, pooled, logits_pad = pl.pallas_call(
        fused_model_kernel,
        out_shape=(jax.ShapeDtypeStruct((B, S, H), jnp.float32),
                   jax.ShapeDtypeStruct((N_LAYERS, NG, S * S), jnp.float32),
                   jax.ShapeDtypeStruct((B, H), jnp.float32),
                   jax.ShapeDtypeStruct((B, LOGITS_PAD), jnp.float32)),
        compiler_params=pltpu.CompilerParams(vmem_limit_bytes=16 * 1024 * 1024),
    )(emb, amask_g, hmask_g, gvec, lvec,
      params['wqkv'], params['wo'], params['w1'], params['w2'], headw)

    # [L, NG, S*S], g = head*B + batch  ->  HF convention [L, B, nH, S, S]
    attentions = (attn_flat.reshape(N_LAYERS, N_HEADS, B, S, S)
                  .transpose(0, 2, 1, 3, 4))

    return {
        'last_hidden_state': last_hidden,
        'pooler_output': pooled,
        'attentions': attentions,
        'task_logits': logits_pad[:, :NUM_LABELS],
    }


# --------------------------- pure-JAX reference --------------------------------


def forward_reference(params, input_ids, attention_mask, token_type_ids, head_mask):
    def ln(x, g, b):
        mu = x.mean(-1, keepdims=True)
        var = ((x - mu) ** 2).mean(-1, keepdims=True)
        return (x - mu) / jnp.sqrt(var + LN_EPS) * g + b

    emb = (params['word_emb'][input_ids]
           + params['pos_emb'][None, :S, :]
           + params['type_emb'][token_type_ids])
    h = ln(emb, params['emb_ln_g'][0], params['emb_ln_b'][0])
    amask = (1.0 - attention_mask.astype(jnp.float32)) * NEG_INF
    attns = []
    for l in range(N_LAYERS):
        qkv = h @ params['wqkv'][l] + params['bqkv'][l, 0]
        q, k, v = jnp.split(qkv, 3, axis=-1)
        q = q.reshape(B, S, N_HEADS, D_HEAD).transpose(0, 2, 1, 3)
        k = k.reshape(B, S, N_HEADS, D_HEAD).transpose(0, 2, 1, 3)
        v = v.reshape(B, S, N_HEADS, D_HEAD).transpose(0, 2, 1, 3)
        s = q @ k.transpose(0, 1, 3, 2) / math.sqrt(D_HEAD)
        s = s + amask[:, None, None, :]
        p = jax.nn.softmax(s, axis=-1)
        p = p * head_mask[l][None, :, None, None]
        attns.append(p)
        ctx = (p @ v).transpose(0, 2, 1, 3).reshape(B, S, H)
        ao = ctx @ params['wo'][l] + params['bo'][l, 0]
        h1 = ln(ao + h, params['ln1_g'][l, 0], params['ln1_b'][l, 0])
        inter = _gelu_tanh(h1 @ params['w1'][l] + params['b1'][l, 0])
        ffn = inter @ params['w2'][l] + params['b2'][l, 0]
        h = ln(ffn + h1, params['ln2_g'][l, 0], params['ln2_b'][l, 0])
    pooled = jnp.tanh(h[:, 0, :] @ params['w_pool'] + params['b_pool'][0])
    logits = pooled @ params['w_head'] + params['b_head'][0]
    return {
        'last_hidden_state': h,
        'pooler_output': pooled,
        'attentions': jnp.stack(attns, axis=0),
        'task_logits': logits,
    }


# ------------------------------ parameter init ---------------------------------


def init_params(key):
    ks = jax.random.split(key, 16)

    def nrm(k, shape):
        return (0.02 * jax.random.normal(k, shape)).astype(jnp.float32)

    return {
        'word_emb': nrm(ks[0], (VOCAB, H)),
        'pos_emb': nrm(ks[1], (MAX_POS, H)),
        'type_emb': nrm(ks[2], (TYPE_VOCAB, H)),
        'emb_ln_g': jnp.ones((1, H), jnp.float32),
        'emb_ln_b': jnp.zeros((1, H), jnp.float32),
        'wqkv': nrm(ks[3], (N_LAYERS, H, 3 * H)),
        'bqkv': nrm(ks[4], (N_LAYERS, 1, 3 * H)),
        'wo': nrm(ks[5], (N_LAYERS, H, H)),
        'bo': nrm(ks[6], (N_LAYERS, 1, H)),
        'ln1_g': jnp.ones((N_LAYERS, 1, H), jnp.float32),
        'ln1_b': jnp.zeros((N_LAYERS, 1, H), jnp.float32),
        'w1': nrm(ks[7], (N_LAYERS, H, INTER)),
        'b1': nrm(ks[8], (N_LAYERS, 1, INTER)),
        'w2': nrm(ks[9], (N_LAYERS, INTER, H)),
        'b2': nrm(ks[10], (N_LAYERS, 1, H)),
        'ln2_g': jnp.ones((N_LAYERS, 1, H), jnp.float32),
        'ln2_b': jnp.zeros((N_LAYERS, 1, H), jnp.float32),
        'w_pool': nrm(ks[11], (H, H)),
        'b_pool': nrm(ks[12], (1, H)),
        'w_head': nrm(ks[13], (H, NUM_LABELS)),
        'b_head': nrm(ks[14], (1, NUM_LABELS)),
    }


# ------------------------------------ main --------------------------------------

if __name__ == "__main__":
    key = jax.random.PRNGKey(0)
    pkey, ikey = jax.random.split(key)
    params = init_params(pkey)

    input_ids = jax.random.randint(ikey, (B, S), 0, VOCAB, dtype=jnp.int32)
    token_type_ids = jnp.zeros((B, S), dtype=jnp.int32)
    # attention_mask with a couple of padded positions in the second sequence
    attention_mask = jnp.ones((B, S), dtype=jnp.int32).at[1, S - 2:].set(0)
    # head_mask like self.masks[task.id] (ones), but zero out one head to exercise it
    head_mask = jnp.ones((N_LAYERS, N_HEADS), dtype=jnp.float32).at[1, 2].set(0.0)

    out = jax.jit(forward)(params, input_ids, attention_mask, token_type_ids, head_mask)
    out = jax.tree_util.tree_map(jax.block_until_ready, out)

    ref = forward_reference(params, input_ids, attention_mask, token_type_ids, head_mask)
    for name in ('last_hidden_state', 'pooler_output', 'attentions', 'task_logits'):
        assert out[name].shape == ref[name].shape, name
        assert jnp.allclose(out[name], ref[name], atol=2e-3, rtol=2e-3), name

    print("KERNEL_OK")
</pallas_src>

<mosaic_0001>
module attributes {stable_mosaic.version = 11 : i64} {
  func.func @fused_model_kernel(%arg0: memref<2x8x32xf32, #tpu.memory_space<vmem>>, %arg1: memref<8x8xf32, #tpu.memory_space<vmem>>, %arg2: memref<2x8x1xf32, #tpu.memory_space<vmem>>, %arg3: memref<4x128xf32, #tpu.memory_space<vmem>>, %arg4: memref<2x8x128xf32, #tpu.memory_space<vmem>>, %arg5: memref<2x32x96xf32, #tpu.memory_space<vmem>>, %arg6: memref<2x32x32xf32, #tpu.memory_space<vmem>>, %arg7: memref<2x32x64xf32, #tpu.memory_space<vmem>>, %arg8: memref<2x64x32xf32, #tpu.memory_space<vmem>>, %arg9: memref<2x32x128xf32, #tpu.memory_space<vmem>>, %arg10: memref<2x8x32xf32, #tpu.memory_space<vmem>>, %arg11: memref<2x8x64xf32, #tpu.memory_space<vmem>>, %arg12: memref<2x32xf32, #tpu.memory_space<vmem>>, %arg13: memref<2x128xf32, #tpu.memory_space<vmem>>) attributes {dimension_semantics = [], scalar_prefetch = 0 : i64, scratch_operands = 0 : i64, tpu.core_type = #tpu.core_type<tc>} {
    %c0 = arith.constant 0 : index
    %c0_0 = arith.constant 0 : index
    %0 = vector.load %arg3[%c0, %c0_0] : memref<4x128xf32, #tpu.memory_space<vmem>>, vector<4x128xf32>
    %c0_1 = arith.constant 0 : index
    %c0_2 = arith.constant 0 : index
    %c0_3 = arith.constant 0 : index
    %1 = vector.load %arg0[%c0_1, %c0_2, %c0_3] : memref<2x8x32xf32, #tpu.memory_space<vmem>>, vector<2x8x32xf32>
    %2 = vector.shape_cast %1 : vector<2x8x32xf32> to vector<16x32xf32>
    %3 = vector.extract_strided_slice %0 {offsets = [0, 0], sizes = [1, 32], strides = [1, 1]} : vector<4x128xf32> to vector<1x32xf32>
    %4 = vector.extract_strided_slice %0 {offsets = [1, 0], sizes = [1, 32], strides = [1, 1]} : vector<4x128xf32> to vector<1x32xf32>
    %cst = arith.constant dense<0.000000e+00> : vector<16xf32>
    %5 = vector.multi_reduction <add>, %2, %cst [1] : vector<16x32xf32> to vector<16xf32>
    %6 = vector.shape_cast %5 : vector<16xf32> to vector<16x1xf32>
    %cst_4 = arith.constant 3.200000e+01 : f32
    %7 = vector.broadcast %cst_4 : f32 to vector<16x1xf32>
    %8 = arith.divf %6, %7 : vector<16x1xf32>
    %9 = vector.broadcast %8 : vector<16x1xf32> to vector<16x32xf32>
    %10 = arith.subf %2, %9 : vector<16x32xf32>
    %11 = arith.mulf %10, %10 : vector<16x32xf32>
    %cst_5 = arith.constant dense<0.000000e+00> : vector<16xf32>
    %12 = vector.multi_reduction <add>, %11, %cst_5 [1] : vector<16x32xf32> to vector<16xf32>
    %13 = vector.shape_cast %12 : vector<16xf32> to vector<16x1xf32>
    %cst_6 = arith.constant 3.200000e+01 : f32
    %14 = vector.broadcast %cst_6 : f32 to vector<16x1xf32>
    %15 = arith.divf %13, %14 : vector<16x1xf32>
    %16 = vector.broadcast %8 : vector<16x1xf32> to vector<16x32xf32>
    %17 = arith.subf %2, %16 : vector<16x32xf32>
    %cst_7 = arith.constant 9.99999996E-13 : f32
    %18 = vector.broadcast %cst_7 : f32 to vector<16x1xf32>
    %19 = arith.addf %15, %18 : vector<16x1xf32>
    %20 = math.rsqrt %19 : vector<16x1xf32>
    %21 = vector.broadcast %20 : vector<16x1xf32> to vector<16x32xf32>
    %22 = arith.mulf %17, %21 : vector<16x32xf32>
    %23 = vector.broadcast %3 : vector<1x32xf32> to vector<16x32xf32>
    %24 = arith.mulf %22, %23 : vector<16x32xf32>
    %25 = vector.broadcast %4 : vector<1x32xf32> to vector<16x32xf32>
    %26 = arith.addf %24, %25 : vector<16x32xf32>
    %c0_8 = arith.constant 0 : index
    %c0_9 = arith.constant 0 : index
    %27 = vector.load %arg1[%c0_8, %c0_9] : memref<8x8xf32, #tpu.memory_space<vmem>>, vector<8x8xf32>
    %28 = vector.shape_cast %27 : vector<8x8xf32> to vector<8x1x8xf32>
    %c0_10 = arith.constant 0 : index
    %c0_11 = arith.constant 0 : index
    %c0_12 = arith.constant 0 : index
    %29 = vector.load %arg4[%c0_10, %c0_11, %c0_12] : memref<2x8x128xf32, #tpu.memory_space<vmem>>, vector<1x8x128xf32>
    %30 = vector.shape_cast %29 : vector<1x8x128xf32> to vector<8x128xf32>
    %31 = vector.extract_strided_slice %30 {offsets = [0, 0], sizes = [1, 96], strides = [1, 1]} : vector<8x128xf32> to vector<1x96xf32>
    %32 = vector.extract_strided_slice %30 {offsets = [1, 0], sizes = [1, 32], strides = [1, 1]} : vector<8x128xf32> to vector<1x32xf32>
    %33 = vector.extract_strided_slice %30 {offsets = [2, 0], sizes = [1, 32], strides = [1, 1]} : vector<8x128xf32> to vector<1x32xf32>
    %34 = vector.extract_strided_slice %30 {offsets = [3, 0], sizes = [1, 32], strides = [1, 1]} : vector<8x128xf32> to vector<1x32xf32>
    %35 = vector.extract_strided_slice %30 {offsets = [4, 0], sizes = [1, 64], strides = [1, 1]} : vector<8x128xf32> to vector<1x64xf32>
    %36 = vector.extract_strided_slice %30 {offsets = [5, 0], sizes = [1, 32], strides = [1, 1]} : vector<8x128xf32> to vector<1x32xf32>
    %37 = vector.extract_strided_slice %30 {offsets = [6, 0], sizes = [1, 32], strides = [1, 1]} : vector<8x128xf32> to vector<1x32xf32>
    %38 = vector.extract_strided_slice %30 {offsets = [7, 0], sizes = [1, 32], strides = [1, 1]} : vector<8x128xf32> to vector<1x32xf32>
    %c0_13 = arith.constant 0 : index
    %c0_14 = arith.constant 0 : index
    %c0_15 = arith.constant 0 : index
    %39 = vector.load %arg5[%c0_13, %c0_14, %c0_15] : memref<2x32x96xf32, #tpu.memory_space<vmem>>, vector<1x32x96xf32>
    %40 = vector.shape_cast %39 : vector<1x32x96xf32> to vector<32x96xf32>
    %cst_16 = arith.constant dense<0.000000e+00> : vector<16x96xf32>
    %41 = tpu.matmul %26, %40, %cst_16 {dimension_numbers = #tpu.dot_dimension_numbers<[1], [0], [0], [1], [0, 0, 1, 1], [], []>} : vector<16x32xf32>, vector<32x96xf32>, vector<16x96xf32> -> vector<16x96xf32>
    %42 = vector.broadcast %31 : vector<1x96xf32> to vector<16x96xf32>
    %43 = arith.addf %41, %42 : vector<16x96xf32>
    %44 = vector.extract_strided_slice %43 {offsets = [0, 0], sizes = [16, 32], strides = [1, 1]} : vector<16x96xf32> to vector<16x32xf32>
    %45 = vector.extract_strided_slice %44 {offsets = [0, 0], sizes = [16, 8], strides = [1, 1]} : vector<16x32xf32> to vector<16x8xf32>
    %46 = vector.extract_strided_slice %44 {offsets = [0, 8], sizes = [16, 8], strides = [1, 1]} : vector<16x32xf32> to vector<16x8xf32>
    %47 = vector.extract_strided_slice %44 {offsets = [0, 16], sizes = [16, 8], strides = [1, 1]} : vector<16x32xf32> to vector<16x8xf32>
    %48 = vector.extract_strided_slice %44 {offsets = [0, 24], sizes = [16, 8], strides = [1, 1]} : vector<16x32xf32> to vector<16x8xf32>
    %49 = vector.shape_cast %45 : vector<16x8xf32> to vector<1x16x8xf32>
    %50 = vector.shape_cast %46 : vector<16x8xf32> to vector<1x16x8xf32>
    %51 = vector.shape_cast %47 : vector<16x8xf32> to vector<1x16x8xf32>
    %52 = vector.shape_cast %48 : vector<16x8xf32> to vector<1x16x8xf32>
    %53 = tpu.concatenate %49, %50, %51, %52 in 0 : vector<1x16x8xf32>, vector<1x16x8xf32>, vector<1x16x8xf32>, vector<1x16x8xf32> -> vector<4x16x8xf32>
    %54 = vector.shape_cast %53 : vector<4x16x8xf32> to vector<8x8x8xf32>
    %55 = vector.extract_strided_slice %43 {offsets = [0, 32], sizes = [16, 32], strides = [1, 1]} : vector<16x96xf32> to vector<16x32xf32>
    %56 = vector.extract_strided_slice %55 {offsets = [0, 0], sizes = [16, 8], strides = [1, 1]} : vector<16x32xf32> to vector<16x8xf32>
    %57 = vector.extract_strided_slice %55 {offsets = [0, 8], sizes = [16, 8], strides = [1, 1]} : vector<16x32xf32> to vector<16x8xf32>
    %58 = vector.extract_strided_slice %55 {offsets = [0, 16], sizes = [16, 8], strides = [1, 1]} : vector<16x32xf32> to vector<16x8xf32>
    %59 = vector.extract_strided_slice %55 {offsets = [0, 24], sizes = [16, 8], strides = [1, 1]} : vector<16x32xf32> to vector<16x8xf32>
    %60 = vector.shape_cast %56 : vector<16x8xf32> to vector<1x16x8xf32>
    %61 = vector.shape_cast %57 : vector<16x8xf32> to vector<1x16x8xf32>
    %62 = vector.shape_cast %58 : vector<16x8xf32> to vector<1x16x8xf32>
    %63 = vector.shape_cast %59 : vector<16x8xf32> to vector<1x16x8xf32>
    %64 = tpu.concatenate %60, %61, %62, %63 in 0 : vector<1x16x8xf32>, vector<1x16x8xf32>, vector<1x16x8xf32>, vector<1x16x8xf32> -> vector<4x16x8xf32>
    %65 = vector.shape_cast %64 : vector<4x16x8xf32> to vector<8x8x8xf32>
    %66 = vector.extract_strided_slice %43 {offsets = [0, 64], sizes = [16, 32], strides = [1, 1]} : vector<16x96xf32> to vector<16x32xf32>
    %67 = vector.extract_strided_slice %66 {offsets = [0, 0], sizes = [16, 8], strides = [1, 1]} : vector<16x32xf32> to vector<16x8xf32>
    %68 = vector.extract_strided_slice %66 {offsets = [0, 8], sizes = [16, 8], strides = [1, 1]} : vector<16x32xf32> to vector<16x8xf32>
    %69 = vector.extract_strided_slice %66 {offsets = [0, 16], sizes = [16, 8], strides = [1, 1]} : vector<16x32xf32> to vector<16x8xf32>
    %70 = vector.extract_strided_slice %66 {offsets = [0, 24], sizes = [16, 8], strides = [1, 1]} : vector<16x32xf32> to vector<16x8xf32>
    %71 = vector.shape_cast %67 : vector<16x8xf32> to vector<1x16x8xf32>
    %72 = vector.shape_cast %68 : vector<16x8xf32> to vector<1x16x8xf32>
    %73 = vector.shape_cast %69 : vector<16x8xf32> to vector<1x16x8xf32>
    %74 = vector.shape_cast %70 : vector<16x8xf32> to vector<1x16x8xf32>
    %75 = tpu.concatenate %71, %72, %73, %74 in 0 : vector<1x16x8xf32>, vector<1x16x8xf32>, vector<1x16x8xf32>, vector<1x16x8xf32> -> vector<4x16x8xf32>
    %76 = vector.shape_cast %75 : vector<4x16x8xf32> to vector<8x8x8xf32>
    "tpu.trace_start"() <{level = 10 : i32, message = "gqd,gkd->gqk"}> : () -> ()
    %cst_17 = arith.constant dense<0.000000e+00> : vector<8x8x8xf32>
    %77 = tpu.matmul %54, %65, %cst_17 {dimension_numbers = #tpu.dot_dimension_numbers<[2], [2], [1], [1], [0, 0, 0, 1, 1, 1], [0], [0]>} : vector<8x8x8xf32>, vector<8x8x8xf32>, vector<8x8x8xf32> -> vector<8x8x8xf32>
    "tpu.trace_stop"() : () -> ()
    %cst_18 = arith.constant 0.353553385 : f32
    %78 = vector.broadcast %cst_18 : f32 to vector<8x8x8xf32>
    %79 = arith.mulf %77, %78 : vector<8x8x8xf32>
    %80 = vector.broadcast %28 : vector<8x1x8xf32> to vector<8x8x8xf32>
    %81 = arith.addf %79, %80 : vector<8x8x8xf32>
    %cst_19 = arith.constant dense<0xFF800000> : vector<8x8xf32>
    %82 = vector.multi_reduction <maximumf>, %81, %cst_19 [2] : vector<8x8x8xf32> to vector<8x8xf32>
    %83 = vector.shape_cast %82 : vector<8x8xf32> to vector<8x8x1xf32>
    %84 = vector.broadcast %83 : vector<8x8x1xf32> to vector<8x8x8xf32>
    %85 = arith.subf %81, %84 : vector<8x8x8xf32>
    %86 = math.exp %85 : vector<8x8x8xf32>
    %cst_20 = arith.constant dense<0.000000e+00> : vector<8x8xf32>
    %87 = vector.multi_reduction <add>, %86, %cst_20 [2] : vector<8x8x8xf32> to vector<8x8xf32>
    %88 = vector.shape_cast %87 : vector<8x8xf32> to vector<8x8x1xf32>
    %89 = tpu.reciprocal %88 {approx = true} : vector<8x8x1xf32> -> vector<8x8x1xf32>
    %90 = vector.broadcast %89 : vector<8x8x1xf32> to vector<8x8x8xf32>
    %91 = arith.mulf %86, %90 : vector<8x8x8xf32>
    %c0_21 = arith.constant 0 : index
    %c0_22 = arith.constant 0 : index
    %c0_23 = arith.constant 0 : index
    %92 = vector.load %arg2[%c0_21, %c0_22, %c0_23] : memref<2x8x1xf32, #tpu.memory_space<vmem>>, vector<1x8x1xf32>
    %93 = vector.shape_cast %92 : vector<1x8x1xf32> to vector<8x1xf32>
    %94 = vector.shape_cast %93 : vector<8x1xf32> to vector<8x1x1xf32>
    %95 = vector.broadcast %94 : vector<8x1x1xf32> to vector<8x8x8xf32>
    %96 = arith.mulf %91, %95 : vector<8x8x8xf32>
    %97 = vector.extract_strided_slice %96 {offsets = [0, 0, 0], sizes = [8, 1, 8], strides = [1, 1, 1]} : vector<8x8x8xf32> to vector<8x1x8xf32>
    %98 = vector.shape_cast %97 : vector<8x1x8xf32> to vector<8x8xf32>
    %99 = vector.extract_strided_slice %96 {offsets = [0, 1, 0], sizes = [8, 1, 8], strides = [1, 1, 1]} : vector<8x8x8xf32> to vector<8x1x8xf32>
    %100 = vector.shape_cast %99 : vector<8x1x8xf32> to vector<8x8xf32>
    %101 = vector.extract_strided_slice %96 {offsets = [0, 2, 0], sizes = [8, 1, 8], strides = [1, 1, 1]} : vector<8x8x8xf32> to vector<8x1x8xf32>
    %102 = vector.shape_cast %101 : vector<8x1x8xf32> to vector<8x8xf32>
    %103 = vector.extract_strided_slice %96 {offsets = [0, 3, 0], sizes = [8, 1, 8], strides = [1, 1, 1]} : vector<8x8x8xf32> to vector<8x1x8xf32>
    %104 = vector.shape_cast %103 : vector<8x1x8xf32> to vector<8x8xf32>
    %105 = vector.extract_strided_slice %96 {offsets = [0, 4, 0], sizes = [8, 1, 8], strides = [1, 1, 1]} : vector<8x8x8xf32> to vector<8x1x8xf32>
    %106 = vector.shape_cast %105 : vector<8x1x8xf32> to vector<8x8xf32>
    %107 = vector.extract_strided_slice %96 {offsets = [0, 5, 0], sizes = [8, 1, 8], strides = [1, 1, 1]} : vector<8x8x8xf32> to vector<8x1x8xf32>
    %108 = vector.shape_cast %107 : vector<8x1x8xf32> to vector<8x8xf32>
    %109 = vector.extract_strided_slice %96 {offsets = [0, 6, 0], sizes = [8, 1, 8], strides = [1, 1, 1]} : vector<8x8x8xf32> to vector<8x1x8xf32>
    %110 = vector.shape_cast %109 : vector<8x1x8xf32> to vector<8x8xf32>
    %111 = vector.extract_strided_slice %96 {offsets = [0, 7, 0], sizes = [8, 1, 8], strides = [1, 1, 1]} : vector<8x8x8xf32> to vector<8x1x8xf32>
    %112 = vector.shape_cast %111 : vector<8x1x8xf32> to vector<8x8xf32>
    %113 = tpu.concatenate %98, %100, %102, %104, %106, %108, %110, %112 in 1 : vector<8x8xf32>, vector<8x8xf32>, vector<8x8xf32>, vector<8x8xf32>, vector<8x8xf32>, vector<8x8xf32>, vector<8x8xf32>, vector<8x8xf32> -> vector<8x64xf32>
    %c0_24 = arith.constant 0 : index
    %c0_25 = arith.constant 0 : index
    %c0_26 = arith.constant 0 : index
    %114 = vector.load %arg11[%c0_24, %c0_25, %c0_26] : memref<2x8x64xf32, #tpu.memory_space<vmem>>, vector<1x8x64xf32>
    %115 = vector.shape_cast %114 : vector<1x8x64xf32> to vector<8x64xf32>
    %116 = vector.shape_cast %113 : vector<8x64xf32> to vector<1x8x64xf32>
    tpu.vector_store %arg11[%c0_24, %c0_25, %c0_26], %116 {strides = array<i32>} : memref<2x8x64xf32, #tpu.memory_space<vmem>>, vector<1x8x64xf32>,
    "tpu.trace_start"() <{level = 10 : i32, message = "gqk,gkd->gqd"}> : () -> ()
    %cst_27 = arith.constant dense<0.000000e+00> : vector<8x8x8xf32>
    %117 = tpu.matmul %96, %76, %cst_27 {dimension_numbers = #tpu.dot_dimension_numbers<[2], [1], [1], [2], [0, 0, 0, 1, 1, 2], [0], [0]>} : vector<8x8x8xf32>, vector<8x8x8xf32>, vector<8x8x8xf32> -> vector<8x8x8xf32>
    "tpu.trace_stop"() : () -> ()
    %118 = vector.shape_cast %117 : vector<8x8x8xf32> to vector<4x16x8xf32>
    %119 = vector.extract_strided_slice %118 {offsets = [0, 0, 0], sizes = [1, 16, 8], strides = [1, 1, 1]} : vector<4x16x8xf32> to vector<1x16x8xf32>
    %120 = vector.shape_cast %119 : vector<1x16x8xf32> to vector<16x8xf32>
    %121 = vector.extract_strided_slice %118 {offsets = [1, 0, 0], sizes = [1, 16, 8], strides = [1, 1, 1]} : vector<4x16x8xf32> to vector<1x16x8xf32>
    %122 = vector.shape_cast %121 : vector<1x16x8xf32> to vector<16x8xf32>
    %123 = vector.extract_strided_slice %118 {offsets = [2, 0, 0], sizes = [1, 16, 8], strides = [1, 1, 1]} : vector<4x16x8xf32> to vector<1x16x8xf32>
    %124 = vector.shape_cast %123 : vector<1x16x8xf32> to vector<16x8xf32>
    %125 = vector.extract_strided_slice %118 {offsets = [3, 0, 0], sizes = [1, 16, 8], strides = [1, 1, 1]} : vector<4x16x8xf32> to vector<1x16x8xf32>
    %126 = vector.shape_cast %125 : vector<1x16x8xf32> to vector<16x8xf32>
    %127 = tpu.concatenate %120, %122, %124, %126 in 1 : vector<16x8xf32>, vector<16x8xf32>, vector<16x8xf32>, vector<16x8xf32> -> vector<16x32xf32>
    %c0_28 = arith.constant 0 : index
    %c0_29 = arith.constant 0 : index
    %c0_30 = arith.constant 0 : index
    %128 = vector.load %arg6[%c0_28, %c0_29, %c0_30] : memref<2x32x32xf32, #tpu.memory_space<vmem>>, vector<1x32x32xf32>
    %129 = vector.shape_cast %128 : vector<1x32x32xf32> to vector<32x32xf32>
    %cst_31 = arith.constant dense<0.000000e+00> : vector<16x32xf32>
    %130 = tpu.matmul %127, %129, %cst_31 {dimension_numbers = #tpu.dot_dimension_numbers<[1], [0], [0], [1], [0, 0, 1, 1], [], []>} : vector<16x32xf32>, vector<32x32xf32>, vector<16x32xf32> -> vector<16x32xf32>
    %131 = vector.broadcast %32 : vector<1x32xf32> to vector<16x32xf32>
    %132 = arith.addf %130, %131 : vector<16x32xf32>
    %133 = arith.addf %132, %26 : vector<16x32xf32>
    %cst_32 = arith.constant dense<0.000000e+00> : vector<16xf32>
    %134 = vector.multi_reduction <add>, %133, %cst_32 [1] : vector<16x32xf32> to vector<16xf32>
    %135 = vector.shape_cast %134 : vector<16xf32> to vector<16x1xf32>
    %cst_33 = arith.constant 3.200000e+01 : f32
    %136 = vector.broadcast %cst_33 : f32 to vector<16x1xf32>
    %137 = arith.divf %135, %136 : vector<16x1xf32>
    %138 = vector.broadcast %137 : vector<16x1xf32> to vector<16x32xf32>
    %139 = arith.subf %133, %138 : vector<16x32xf32>
    %140 = arith.mulf %139, %139 : vector<16x32xf32>
    %cst_34 = arith.constant dense<0.000000e+00> : vector<16xf32>
    %141 = vector.multi_reduction <add>, %140, %cst_34 [1] : vector<16x32xf32> to vector<16xf32>
    %142 = vector.shape_cast %141 : vector<16xf32> to vector<16x1xf32>
    %cst_35 = arith.constant 3.200000e+01 : f32
    %143 = vector.broadcast %cst_35 : f32 to vector<16x1xf32>
    %144 = arith.divf %142, %143 : vector<16x1xf32>
    %145 = vector.broadcast %137 : vector<16x1xf32> to vector<16x32xf32>
    %146 = arith.subf %133, %145 : vector<16x32xf32>
    %cst_36 = arith.constant 9.99999996E-13 : f32
    %147 = vector.broadcast %cst_36 : f32 to vector<16x1xf32>
    %148 = arith.addf %144, %147 : vector<16x1xf32>
    %149 = math.rsqrt %148 : vector<16x1xf32>
    %150 = vector.broadcast %149 : vector<16x1xf32> to vector<16x32xf32>
    %151 = arith.mulf %146, %150 : vector<16x32xf32>
    %152 = vector.broadcast %33 : vector<1x32xf32> to vector<16x32xf32>
    %153 = arith.mulf %151, %152 : vector<16x32xf32>
    %154 = vector.broadcast %34 : vector<1x32xf32> to vector<16x32xf32>
    %155 = arith.addf %153, %154 : vector<16x32xf32>
    %c0_37 = arith.constant 0 : index
    %c0_38 = arith.constant 0 : index
    %c0_39 = arith.constant 0 : index
    %156 = vector.load %arg7[%c0_37, %c0_38, %c0_39] : memref<2x32x64xf32, #tpu.memory_space<vmem>>, vector<1x32x64xf32>
    %157 = vector.shape_cast %156 : vector<1x32x64xf32> to vector<32x64xf32>
    %cst_40 = arith.constant dense<0.000000e+00> : vector<16x64xf32>
    %158 = tpu.matmul %155, %157, %cst_40 {dimension_numbers = #tpu.dot_dimension_numbers<[1], [0], [0], [1], [0, 0, 1, 1], [], []>} : vector<16x32xf32>, vector<32x64xf32>, vector<16x64xf32> -> vector<16x64xf32>
    %159 = vector.broadcast %35 : vector<1x64xf32> to vector<16x64xf32>
    %160 = arith.addf %158, %159 : vector<16x64xf32>
    %cst_41 = arith.constant 5.000000e-01 : f32
    %161 = vector.broadcast %cst_41 : f32 to vector<16x64xf32>
    %162 = arith.mulf %161, %160 : vector<16x64xf32>
    %cst_42 = arith.constant 4.471500e-02 : f32
    %163 = vector.broadcast %cst_42 : f32 to vector<16x64xf32>
    %164 = arith.mulf %163, %160 : vector<16x64xf32>
    %165 = arith.mulf %164, %160 : vector<16x64xf32>
    %166 = arith.mulf %165, %160 : vector<16x64xf32>
    %167 = arith.addf %160, %166 : vector<16x64xf32>
    %cst_43 = arith.constant 0.797884583 : f32
    %168 = vector.broadcast %cst_43 : f32 to vector<16x64xf32>
    %169 = arith.mulf %168, %167 : vector<16x64xf32>
    %170 = math.tanh %169 : vector<16x64xf32>
    %cst_44 = arith.constant 1.000000e+00 : f32
    %171 = vector.broadcast %cst_44 : f32 to vector<16x64xf32>
    %172 = arith.addf %171, %170 : vector<16x64xf32>
    %173 = arith.mulf %162, %172 : vector<16x64xf32>
    %c0_45 = arith.constant 0 : index
    %c0_46 = arith.constant 0 : index
    %c0_47 = arith.constant 0 : index
    %174 = vector.load %arg8[%c0_45, %c0_46, %c0_47] : memref<2x64x32xf32, #tpu.memory_space<vmem>>, vector<1x64x32xf32>
    %175 = vector.shape_cast %174 : vector<1x64x32xf32> to vector<64x32xf32>
    %cst_48 = arith.constant dense<0.000000e+00> : vector<16x32xf32>
    %176 = tpu.matmul %173, %175, %cst_48 {dimension_numbers = #tpu.dot_dimension_numbers<[1], [0], [0], [1], [0, 0, 1, 1], [], []>} : vector<16x64xf32>, vector<64x32xf32>, vector<16x32xf32> -> vector<16x32xf32>
    %177 = vector.broadcast %36 : vector<1x32xf32> to vector<16x32xf32>
    %178 = arith.addf %176, %177 : vector<16x32xf32>
    %179 = arith.addf %178, %155 : vector<16x32xf32>
    %cst_49 = arith.constant dense<0.000000e+00> : vector<16xf32>
    %180 = vector.multi_reduction <add>, %179, %cst_49 [1] : vector<16x32xf32> to vector<16xf32>
    %181 = vector.shape_cast %180 : vector<16xf32> to vector<16x1xf32>
    %cst_50 = arith.constant 3.200000e+01 : f32
    %182 = vector.broadcast %cst_50 : f32 to vector<16x1xf32>
    %183 = arith.divf %181, %182 : vector<16x1xf32>
    %184 = vector.broadcast %183 : vector<16x1xf32> to vector<16x32xf32>
    %185 = arith.subf %179, %184 : vector<16x32xf32>
    %186 = arith.mulf %185, %185 : vector<16x32xf32>
    %cst_51 = arith.constant dense<0.000000e+00> : vector<16xf32>
    %187 = vector.multi_reduction <add>, %186, %cst_51 [1] : vector<16x32xf32> to vector<16xf32>
    %188 = vector.shape_cast %187 : vector<16xf32> to vector<16x1xf32>
    %cst_52 = arith.constant 3.200000e+01 : f32
    %189 = vector.broadcast %cst_52 : f32 to vector<16x1xf32>
    %190 = arith.divf %188, %189 : vector<16x1xf32>
    %191 = vector.broadcast %183 : vector<16x1xf32> to vector<16x32xf32>
    %192 = arith.subf %179, %191 : vector<16x32xf32>
    %cst_53 = arith.constant 9.99999996E-13 : f32
    %193 = vector.broadcast %cst_53 : f32 to vector<16x1xf32>
    %194 = arith.addf %190, %193 : vector<16x1xf32>
    %195 = math.rsqrt %194 : vector<16x1xf32>
    %196 = vector.broadcast %195 : vector<16x1xf32> to vector<16x32xf32>
    %197 = arith.mulf %192, %196 : vector<16x32xf32>
    %198 = vector.broadcast %37 : vector<1x32xf32> to vector<16x32xf32>
    %199 = arith.mulf %197, %198 : vector<16x32xf32>
    %200 = vector.broadcast %38 : vector<1x32xf32> to vector<16x32xf32>
    %201 = arith.addf %199, %200 : vector<16x32xf32>
    %c1 = arith.constant 1 : index
    %c0_54 = arith.constant 0 : index
    %c0_55 = arith.constant 0 : index
    %202 = vector.load %arg4[%c1, %c0_54, %c0_55] : memref<2x8x128xf32, #tpu.memory_space<vmem>>, vector<1x8x128xf32>
    %203 = vector.shape_cast %202 : vector<1x8x128xf32> to vector<8x128xf32>
    %204 = vector.extract_strided_slice %203 {offsets = [0, 0], sizes = [1, 96], strides = [1, 1]} : vector<8x128xf32> to vector<1x96xf32>
    %205 = vector.extract_strided_slice %203 {offsets = [1, 0], sizes = [1, 32], strides = [1, 1]} : vector<8x128xf32> to vector<1x32xf32>
    %206 = vector.extract_strided_slice %203 {offsets = [2, 0], sizes = [1, 32], strides = [1, 1]} : vector<8x128xf32> to vector<1x32xf32>
    %207 = vector.extract_strided_slice %203 {offsets = [3, 0], sizes = [1, 32], strides = [1, 1]} : vector<8x128xf32> to vector<1x32xf32>
    %208 = vector.extract_strided_slice %203 {offsets = [4, 0], sizes = [1, 64], strides = [1, 1]} : vector<8x128xf32> to vector<1x64xf32>
    %209 = vector.extract_strided_slice %203 {offsets = [5, 0], sizes = [1, 32], strides = [1, 1]} : vector<8x128xf32> to vector<1x32xf32>
    %210 = vector.extract_strided_slice %203 {offsets = [6, 0], sizes = [1, 32], strides = [1, 1]} : vector<8x128xf32> to vector<1x32xf32>
    %211 = vector.extract_strided_slice %203 {offsets = [7, 0], sizes = [1, 32], strides = [1, 1]} : vector<8x128xf32> to vector<1x32xf32>
    %c1_56 = arith.constant 1 : index
    %c0_57 = arith.constant 0 : index
    %c0_58 = arith.constant 0 : index
    %212 = vector.load %arg5[%c1_56, %c0_57, %c0_58] : memref<2x32x96xf32, #tpu.memory_space<vmem>>, vector<1x32x96xf32>
    %213 = vector.shape_cast %212 : vector<1x32x96xf32> to vector<32x96xf32>
    %cst_59 = arith.constant dense<0.000000e+00> : vector<16x96xf32>
    %214 = tpu.matmul %201, %213, %cst_59 {dimension_numbers = #tpu.dot_dimension_numbers<[1], [0], [0], [1], [0, 0, 1, 1], [], []>} : vector<16x32xf32>, vector<32x96xf32>, vector<16x96xf32> -> vector<16x96xf32>
    %215 = vector.broadcast %204 : vector<1x96xf32> to vector<16x96xf32>
    %216 = arith.addf %214, %215 : vector<16x96xf32>
    %217 = vector.extract_strided_slice %216 {offsets = [0, 0], sizes = [16, 32], strides = [1, 1]} : vector<16x96xf32> to vector<16x32xf32>
    %218 = vector.extract_strided_slice %217 {offsets = [0, 0], sizes = [16, 8], strides = [1, 1]} : vector<16x32xf32> to vector<16x8xf32>
    %219 = vector.extract_strided_slice %217 {offsets = [0, 8], sizes = [16, 8], strides = [1, 1]} : vector<16x32xf32> to vector<16x8xf32>
    %220 = vector.extract_strided_slice %217 {offsets = [0, 16], sizes = [16, 8], strides = [1, 1]} : vector<16x32xf32> to vector<16x8xf32>
    %221 = vector.extract_strided_slice %217 {offsets = [0, 24], sizes = [16, 8], strides = [1, 1]} : vector<16x32xf32> to vector<16x8xf32>
    %222 = vector.shape_cast %218 : vector<16x8xf32> to vector<1x16x8xf32>
    %223 = vector.shape_cast %219 : vector<16x8xf32> to vector<1x16x8xf32>
    %224 = vector.shape_cast %220 : vector<16x8xf32> to vector<1x16x8xf32>
    %225 = vector.shape_cast %221 : vector<16x8xf32> to vector<1x16x8xf32>
    %226 = tpu.concatenate %222, %223, %224, %225 in 0 : vector<1x16x8xf32>, vector<1x16x8xf32>, vector<1x16x8xf32>, vector<1x16x8xf32> -> vector<4x16x8xf32>
    %227 = vector.shape_cast %226 : vector<4x16x8xf32> to vector<8x8x8xf32>
    %228 = vector.extract_strided_slice %216 {offsets = [0, 32], sizes = [16, 32], strides = [1, 1]} : vector<16x96xf32> to vector<16x32xf32>
    %229 = vector.extract_strided_slice %228 {offsets = [0, 0], sizes = [16, 8], strides = [1, 1]} : vector<16x32xf32> to vector<16x8xf32>
    %230 = vector.extract_strided_slice %228 {offsets = [0, 8], sizes = [16, 8], strides = [1, 1]} : vector<16x32xf32> to vector<16x8xf32>
    %231 = vector.extract_strided_slice %228 {offsets = [0, 16], sizes = [16, 8], strides = [1, 1]} : vector<16x32xf32> to vector<16x8xf32>
    %232 = vector.extract_strided_slice %228 {offsets = [0, 24], sizes = [16, 8], strides = [1, 1]} : vector<16x32xf32> to vector<16x8xf32>
    %233 = vector.shape_cast %229 : vector<16x8xf32> to vector<1x16x8xf32>
    %234 = vector.shape_cast %230 : vector<16x8xf32> to vector<1x16x8xf32>
    %235 = vector.shape_cast %231 : vector<16x8xf32> to vector<1x16x8xf32>
    %236 = vector.shape_cast %232 : vector<16x8xf32> to vector<1x16x8xf32>
    %237 = tpu.concatenate %233, %234, %235, %236 in 0 : vector<1x16x8xf32>, vector<1x16x8xf32>, vector<1x16x8xf32>, vector<1x16x8xf32> -> vector<4x16x8xf32>
    %238 = vector.shape_cast %237 : vector<4x16x8xf32> to vector<8x8x8xf32>
    %239 = vector.extract_strided_slice %216 {offsets = [0, 64], sizes = [16, 32], strides = [1, 1]} : vector<16x96xf32> to vector<16x32xf32>
    %240 = vector.extract_strided_slice %239 {offsets = [0, 0], sizes = [16, 8], strides = [1, 1]} : vector<16x32xf32> to vector<16x8xf32>
    %241 = vector.extract_strided_slice %239 {offsets = [0, 8], sizes = [16, 8], strides = [1, 1]} : vector<16x32xf32> to vector<16x8xf32>
    %242 = vector.extract_strided_slice %239 {offsets = [0, 16], sizes = [16, 8], strides = [1, 1]} : vector<16x32xf32> to vector<16x8xf32>
    %243 = vector.extract_strided_slice %239 {offsets = [0, 24], sizes = [16, 8], strides = [1, 1]} : vector<16x32xf32> to vector<16x8xf32>
    %244 = vector.shape_cast %240 : vector<16x8xf32> to vector<1x16x8xf32>
    %245 = vector.shape_cast %241 : vector<16x8xf32> to vector<1x16x8xf32>
    %246 = vector.shape_cast %242 : vector<16x8xf32> to vector<1x16x8xf32>
    %247 = vector.shape_cast %243 : vector<16x8xf32> to vector<1x16x8xf32>
    %248 = tpu.concatenate %244, %245, %246, %247 in 0 : vector<1x16x8xf32>, vector<1x16x8xf32>, vector<1x16x8xf32>, vector<1x16x8xf32> -> vector<4x16x8xf32>
    %249 = vector.shape_cast %248 : vector<4x16x8xf32> to vector<8x8x8xf32>
    "tpu.trace_start"() <{level = 10 : i32, message = "gqd,gkd->gqk"}> : () -> ()
    %cst_60 = arith.constant dense<0.000000e+00> : vector<8x8x8xf32>
    %250 = tpu.matmul %227, %238, %cst_60 {dimension_numbers = #tpu.dot_dimension_numbers<[2], [2], [1], [1], [0, 0, 0, 1, 1, 1], [0], [0]>} : vector<8x8x8xf32>, vector<8x8x8xf32>, vector<8x8x8xf32> -> vector<8x8x8xf32>
    "tpu.trace_stop"() : () -> ()
    %cst_61 = arith.constant 0.353553385 : f32
    %251 = vector.broadcast %cst_61 : f32 to vector<8x8x8xf32>
    %252 = arith.mulf %250, %251 : vector<8x8x8xf32>
    %253 = vector.broadcast %28 : vector<8x1x8xf32> to vector<8x8x8xf32>
    %254 = arith.addf %252, %253 : vector<8x8x8xf32>
    %cst_62 = arith.constant dense<0xFF800000> : vector<8x8xf32>
    %255 = vector.multi_reduction <maximumf>, %254, %cst_62 [2] : vector<8x8x8xf32> to vector<8x8xf32>
    %256 = vector.shape_cast %255 : vector<8x8xf32> to vector<8x8x1xf32>
    %257 = vector.broadcast %256 : vector<8x8x1xf32> to vector<8x8x8xf32>
    %258 = arith.subf %254, %257 : vector<8x8x8xf32>
    %259 = math.exp %258 : vector<8x8x8xf32>
    %cst_63 = arith.constant dense<0.000000e+00> : vector<8x8xf32>
    %260 = vector.multi_reduction <add>, %259, %cst_63 [2] : vector<8x8x8xf32> to vector<8x8xf32>
    %261 = vector.shape_cast %260 : vector<8x8xf32> to vector<8x8x1xf32>
    %262 = tpu.reciprocal %261 {approx = true} : vector<8x8x1xf32> -> vector<8x8x1xf32>
    %263 = vector.broadcast %262 : vector<8x8x1xf32> to vector<8x8x8xf32>
    %264 = arith.mulf %259, %263 : vector<8x8x8xf32>
    %c1_64 = arith.constant 1 : index
    %c0_65 = arith.constant 0 : index
    %c0_66 = arith.constant 0 : index
    %265 = vector.load %arg2[%c1_64, %c0_65, %c0_66] : memref<2x8x1xf32, #tpu.memory_space<vmem>>, vector<1x8x1xf32>
    %266 = vector.shape_cast %265 : vector<1x8x1xf32> to vector<8x1xf32>
    %267 = vector.shape_cast %266 : vector<8x1xf32> to vector<8x1x1xf32>
    %268 = vector.broadcast %267 : vector<8x1x1xf32> to vector<8x8x8xf32>
    %269 = arith.mulf %264, %268 : vector<8x8x8xf32>
    %270 = vector.extract_strided_slice %269 {offsets = [0, 0, 0], sizes = [8, 1, 8], strides = [1, 1, 1]} : vector<8x8x8xf32> to vector<8x1x8xf32>
    %271 = vector.shape_cast %270 : vector<8x1x8xf32> to vector<8x8xf32>
    %272 = vector.extract_strided_slice %269 {offsets = [0, 1, 0], sizes = [8, 1, 8], strides = [1, 1, 1]} : vector<8x8x8xf32> to vector<8x1x8xf32>
    %273 = vector.shape_cast %272 : vector<8x1x8xf32> to vector<8x8xf32>
    %274 = vector.extract_strided_slice %269 {offsets = [0, 2, 0], sizes = [8, 1, 8], strides = [1, 1, 1]} : vector<8x8x8xf32> to vector<8x1x8xf32>
    %275 = vector.shape_cast %274 : vector<8x1x8xf32> to vector<8x8xf32>
    %276 = vector.extract_strided_slice %269 {offsets = [0, 3, 0], sizes = [8, 1, 8], strides = [1, 1, 1]} : vector<8x8x8xf32> to vector<8x1x8xf32>
    %277 = vector.shape_cast %276 : vector<8x1x8xf32> to vector<8x8xf32>
    %278 = vector.extract_strided_slice %269 {offsets = [0, 4, 0], sizes = [8, 1, 8], strides = [1, 1, 1]} : vector<8x8x8xf32> to vector<8x1x8xf32>
    %279 = vector.shape_cast %278 : vector<8x1x8xf32> to vector<8x8xf32>
    %280 = vector.extract_strided_slice %269 {offsets = [0, 5, 0], sizes = [8, 1, 8], strides = [1, 1, 1]} : vector<8x8x8xf32> to vector<8x1x8xf32>
    %281 = vector.shape_cast %280 : vector<8x1x8xf32> to vector<8x8xf32>
    %282 = vector.extract_strided_slice %269 {offsets = [0, 6, 0], sizes = [8, 1, 8], strides = [1, 1, 1]} : vector<8x8x8xf32> to vector<8x1x8xf32>
    %283 = vector.shape_cast %282 : vector<8x1x8xf32> to vector<8x8xf32>
    %284 = vector.extract_strided_slice %269 {offsets = [0, 7, 0], sizes = [8, 1, 8], strides = [1, 1, 1]} : vector<8x8x8xf32> to vector<8x1x8xf32>
    %285 = vector.shape_cast %284 : vector<8x1x8xf32> to vector<8x8xf32>
    %286 = tpu.concatenate %271, %273, %275, %277, %279, %281, %283, %285 in 1 : vector<8x8xf32>, vector<8x8xf32>, vector<8x8xf32>, vector<8x8xf32>, vector<8x8xf32>, vector<8x8xf32>, vector<8x8xf32>, vector<8x8xf32> -> vector<8x64xf32>
    %c1_67 = arith.constant 1 : index
    %c0_68 = arith.constant 0 : index
    %c0_69 = arith.constant 0 : index
    %287 = vector.load %arg11[%c1_67, %c0_68, %c0_69] : memref<2x8x64xf32, #tpu.memory_space<vmem>>, vector<1x8x64xf32>
    %288 = vector.shape_cast %287 : vector<1x8x64xf32> to vector<8x64xf32>
    %289 = vector.shape_cast %286 : vector<8x64xf32> to vector<1x8x64xf32>
    tpu.vector_store %arg11[%c1_67, %c0_68, %c0_69], %289 {strides = array<i32>} : memref<2x8x64xf32, #tpu.memory_space<vmem>>, vector<1x8x64xf32>,
    "tpu.trace_start"() <{level = 10 : i32, message = "gqk,gkd->gqd"}> : () -> ()
    %cst_70 = arith.constant dense<0.000000e+00> : vector<8x8x8xf32>
    %290 = tpu.matmul %269, %249, %cst_70 {dimension_numbers = #tpu.dot_dimension_numbers<[2], [1], [1], [2], [0, 0, 0, 1, 1, 2], [0], [0]>} : vector<8x8x8xf32>, vector<8x8x8xf32>, vector<8x8x8xf32> -> vector<8x8x8xf32>
    "tpu.trace_stop"() : () -> ()
    %291 = vector.shape_cast %290 : vector<8x8x8xf32> to vector<4x16x8xf32>
    %292 = vector.extract_strided_slice %291 {offsets = [0, 0, 0], sizes = [1, 16, 8], strides = [1, 1, 1]} : vector<4x16x8xf32> to vector<1x16x8xf32>
    %293 = vector.shape_cast %292 : vector<1x16x8xf32> to vector<16x8xf32>
    %294 = vector.extract_strided_slice %291 {offsets = [1, 0, 0], sizes = [1, 16, 8], strides = [1, 1, 1]} : vector<4x16x8xf32> to vector<1x16x8xf32>
    %295 = vector.shape_cast %294 : vector<1x16x8xf32> to vector<16x8xf32>
    %296 = vector.extract_strided_slice %291 {offsets = [2, 0, 0], sizes = [1, 16, 8], strides = [1, 1, 1]} : vector<4x16x8xf32> to vector<1x16x8xf32>
    %297 = vector.shape_cast %296 : vector<1x16x8xf32> to vector<16x8xf32>
    %298 = vector.extract_strided_slice %291 {offsets = [3, 0, 0], sizes = [1, 16, 8], strides = [1, 1, 1]} : vector<4x16x8xf32> to vector<1x16x8xf32>
    %299 = vector.shape_cast %298 : vector<1x16x8xf32> to vector<16x8xf32>
    %300 = tpu.concatenate %293, %295, %297, %299 in 1 : vector<16x8xf32>, vector<16x8xf32>, vector<16x8xf32>, vector<16x8xf32> -> vector<16x32xf32>
    %c1_71 = arith.constant 1 : index
    %c0_72 = arith.constant 0 : index
    %c0_73 = arith.constant 0 : index
    %301 = vector.load %arg6[%c1_71, %c0_72, %c0_73] : memref<2x32x32xf32, #tpu.memory_space<vmem>>, vector<1x32x32xf32>
    %302 = vector.shape_cast %301 : vector<1x32x32xf32> to vector<32x32xf32>
    %cst_74 = arith.constant dense<0.000000e+00> : vector<16x32xf32>
    %303 = tpu.matmul %300, %302, %cst_74 {dimension_numbers = #tpu.dot_dimension_numbers<[1], [0], [0], [1], [0, 0, 1, 1], [], []>} : vector<16x32xf32>, vector<32x32xf32>, vector<16x32xf32> -> vector<16x32xf32>
    %304 = vector.broadcast %205 : vector<1x32xf32> to vector<16x32xf32>
    %305 = arith.addf %303, %304 : vector<16x32xf32>
    %306 = arith.addf %305, %201 : vector<16x32xf32>
    %cst_75 = arith.constant dense<0.000000e+00> : vector<16xf32>
    %307 = vector.multi_reduction <add>, %306, %cst_75 [1] : vector<16x32xf32> to vector<16xf32>
    %308 = vector.shape_cast %307 : vector<16xf32> to vector<16x1xf32>
    %cst_76 = arith.constant 3.200000e+01 : f32
    %309 = vector.broadcast %cst_76 : f32 to vector<16x1xf32>
    %310 = arith.divf %308, %309 : vector<16x1xf32>
    %311 = vector.broadcast %310 : vector<16x1xf32> to vector<16x32xf32>
    %312 = arith.subf %306, %311 : vector<16x32xf32>
    %313 = arith.mulf %312, %312 : vector<16x32xf32>
    %cst_77 = arith.constant dense<0.000000e+00> : vector<16xf32>
    %314 = vector.multi_reduction <add>, %313, %cst_77 [1] : vector<16x32xf32> to vector<16xf32>
    %315 = vector.shape_cast %314 : vector<16xf32> to vector<16x1xf32>
    %cst_78 = arith.constant 3.200000e+01 : f32
    %316 = vector.broadcast %cst_78 : f32 to vector<16x1xf32>
    %317 = arith.divf %315, %316 : vector<16x1xf32>
    %318 = vector.broadcast %310 : vector<16x1xf32> to vector<16x32xf32>
    %319 = arith.subf %306, %318 : vector<16x32xf32>
    %cst_79 = arith.constant 9.99999996E-13 : f32
    %320 = vector.broadcast %cst_79 : f32 to vector<16x1xf32>
    %321 = arith.addf %317, %320 : vector<16x1xf32>
    %322 = math.rsqrt %321 : vector<16x1xf32>
    %323 = vector.broadcast %322 : vector<16x1xf32> to vector<16x32xf32>
    %324 = arith.mulf %319, %323 : vector<16x32xf32>
    %325 = vector.broadcast %206 : vector<1x32xf32> to vector<16x32xf32>
    %326 = arith.mulf %324, %325 : vector<16x32xf32>
    %327 = vector.broadcast %207 : vector<1x32xf32> to vector<16x32xf32>
    %328 = arith.addf %326, %327 : vector<16x32xf32>
    %c1_80 = arith.constant 1 : index
    %c0_81 = arith.constant 0 : index
    %c0_82 = arith.constant 0 : index
    %329 = vector.load %arg7[%c1_80, %c0_81, %c0_82] : memref<2x32x64xf32, #tpu.memory_space<vmem>>, vector<1x32x64xf32>
    %330 = vector.shape_cast %329 : vector<1x32x64xf32> to vector<32x64xf32>
    %cst_83 = arith.constant dense<0.000000e+00> : vector<16x64xf32>
    %331 = tpu.matmul %328, %330, %cst_83 {dimension_numbers = #tpu.dot_dimension_numbers<[1], [0], [0], [1], [0, 0, 1, 1], [], []>} : vector<16x32xf32>, vector<32x64xf32>, vector<16x64xf32> -> vector<16x64xf32>
    %332 = vector.broadcast %208 : vector<1x64xf32> to vector<16x64xf32>
    %333 = arith.addf %331, %332 : vector<16x64xf32>
    %cst_84 = arith.constant 5.000000e-01 : f32
    %334 = vector.broadcast %cst_84 : f32 to vector<16x64xf32>
    %335 = arith.mulf %334, %333 : vector<16x64xf32>
    %cst_85 = arith.constant 4.471500e-02 : f32
    %336 = vector.broadcast %cst_85 : f32 to vector<16x64xf32>
    %337 = arith.mulf %336, %333 : vector<16x64xf32>
    %338 = arith.mulf %337, %333 : vector<16x64xf32>
    %339 = arith.mulf %338, %333 : vector<16x64xf32>
    %340 = arith.addf %333, %339 : vector<16x64xf32>
    %cst_86 = arith.constant 0.797884583 : f32
    %341 = vector.broadcast %cst_86 : f32 to vector<16x64xf32>
    %342 = arith.mulf %341, %340 : vector<16x64xf32>
    %343 = math.tanh %342 : vector<16x64xf32>
    %cst_87 = arith.constant 1.000000e+00 : f32
    %344 = vector.broadcast %cst_87 : f32 to vector<16x64xf32>
    %345 = arith.addf %344, %343 : vector<16x64xf32>
    %346 = arith.mulf %335, %345 : vector<16x64xf32>
    %c1_88 = arith.constant 1 : index
    %c0_89 = arith.constant 0 : index
    %c0_90 = arith.constant 0 : index
    %347 = vector.load %arg8[%c1_88, %c0_89, %c0_90] : memref<2x64x32xf32, #tpu.memory_space<vmem>>, vector<1x64x32xf32>
    %348 = vector.shape_cast %347 : vector<1x64x32xf32> to vector<64x32xf32>
    %cst_91 = arith.constant dense<0.000000e+00> : vector<16x32xf32>
    %349 = tpu.matmul %346, %348, %cst_91 {dimension_numbers = #tpu.dot_dimension_numbers<[1], [0], [0], [1], [0, 0, 1, 1], [], []>} : vector<16x64xf32>, vector<64x32xf32>, vector<16x32xf32> -> vector<16x32xf32>
    %350 = vector.broadcast %209 : vector<1x32xf32> to vector<16x32xf32>
    %351 = arith.addf %349, %350 : vector<16x32xf32>
    %352 = arith.addf %351, %328 : vector<16x32xf32>
    %cst_92 = arith.constant dense<0.000000e+00> : vector<16xf32>
    %353 = vector.multi_reduction <add>, %352, %cst_92 [1] : vector<16x32xf32> to vector<16xf32>
    %354 = vector.shape_cast %353 : vector<16xf32> to vector<16x1xf32>
    %cst_93 = arith.constant 3.200000e+01 : f32
    %355 = vector.broadcast %cst_93 : f32 to vector<16x1xf32>
    %356 = arith.divf %354, %355 : vector<16x1xf32>
    %357 = vector.broadcast %356 : vector<16x1xf32> to vector<16x32xf32>
    %358 = arith.subf %352, %357 : vector<16x32xf32>
    %359 = arith.mulf %358, %358 : vector<16x32xf32>
    %cst_94 = arith.constant dense<0.000000e+00> : vector<16xf32>
    %360 = vector.multi_reduction <add>, %359, %cst_94 [1] : vector<16x32xf32> to vector<16xf32>
    %361 = vector.shape_cast %360 : vector<16xf32> to vector<16x1xf32>
    %cst_95 = arith.constant 3.200000e+01 : f32
    %362 = vector.broadcast %cst_95 : f32 to vector<16x1xf32>
    %363 = arith.divf %361, %362 : vector<16x1xf32>
    %364 = vector.broadcast %356 : vector<16x1xf32> to vector<16x32xf32>
    %365 = arith.subf %352, %364 : vector<16x32xf32>
    %cst_96 = arith.constant 9.99999996E-13 : f32
    %366 = vector.broadcast %cst_96 : f32 to vector<16x1xf32>
    %367 = arith.addf %363, %366 : vector<16x1xf32>
    %368 = math.rsqrt %367 : vector<16x1xf32>
    %369 = vector.broadcast %368 : vector<16x1xf32> to vector<16x32xf32>
    %370 = arith.mulf %365, %369 : vector<16x32xf32>
    %371 = vector.broadcast %210 : vector<1x32xf32> to vector<16x32xf32>
    %372 = arith.mulf %370, %371 : vector<16x32xf32>
    %373 = vector.broadcast %211 : vector<1x32xf32> to vector<16x32xf32>
    %374 = arith.addf %372, %373 : vector<16x32xf32>
    %375 = vector.shape_cast %374 : vector<16x32xf32> to vector<2x8x32xf32>
    %c0_97 = arith.constant 0 : index
    %c0_98 = arith.constant 0 : index
    %c0_99 = arith.constant 0 : index
    %376 = vector.load %arg10[%c0_97, %c0_98, %c0_99] : memref<2x8x32xf32, #tpu.memory_space<vmem>>, vector<2x8x32xf32>
    tpu.vector_store %arg10[%c0_97, %c0_98, %c0_99], %375 {strides = array<i32>} : memref<2x8x32xf32, #tpu.memory_space<vmem>>, vector<2x8x32xf32>,
    %c0_100 = arith.constant 0 : index
    %c0_101 = arith.constant 0 : index
    %c0_102 = arith.constant 0 : index
    %377 = vector.load %arg9[%c0_100, %c0_101, %c0_102] : memref<2x32x128xf32, #tpu.memory_space<vmem>>, vector<2x32x128xf32>
    %378 = vector.extract_strided_slice %375 {offsets = [0, 0, 0], sizes = [2, 1, 32], strides = [1, 1, 1]} : vector<2x8x32xf32> to vector<2x1x32xf32>
    %379 = vector.shape_cast %378 : vector<2x1x32xf32> to vector<2x32xf32>
    %380 = vector.extract_strided_slice %377 {offsets = [0, 0, 0], sizes = [1, 32, 32], strides = [1, 1, 1]} : vector<2x32x128xf32> to vector<1x32x32xf32>
    %381 = vector.shape_cast %380 : vector<1x32x32xf32> to vector<32x32xf32>
    %cst_103 = arith.constant dense<0.000000e+00> : vector<2x32xf32>
    %382 = tpu.matmul %379, %381, %cst_103 {dimension_numbers = #tpu.dot_dimension_numbers<[1], [0], [0], [1], [0, 0, 1, 1], [], []>} : vector<2x32xf32>, vector<32x32xf32>, vector<2x32xf32> -> vector<2x32xf32>
    %383 = vector.extract_strided_slice %0 {offsets = [2, 0], sizes = [1, 32], strides = [1, 1]} : vector<4x128xf32> to vector<1x32xf32>
    %384 = vector.broadcast %383 : vector<1x32xf32> to vector<2x32xf32>
    %385 = arith.addf %382, %384 : vector<2x32xf32>
    %386 = math.tanh %385 : vector<2x32xf32>
    %c0_104 = arith.constant 0 : index
    %c0_105 = arith.constant 0 : index
    %387 = vector.load %arg12[%c0_104, %c0_105] : memref<2x32xf32, #tpu.memory_space<vmem>>, vector<2x32xf32>
    tpu.vector_store %arg12[%c0_104, %c0_105], %386 {strides = array<i32>} : memref<2x32xf32, #tpu.memory_space<vmem>>, vector<2x32xf32>,
    %388 = vector.extract_strided_slice %377 {offsets = [1, 0, 0], sizes = [1, 32, 128], strides = [1, 1, 1]} : vector<2x32x128xf32> to vector<1x32x128xf32>
    %389 = vector.shape_cast %388 : vector<1x32x128xf32> to vector<32x128xf32>
    %cst_106 = arith.constant dense<0.000000e+00> : vector<2x128xf32>
    %390 = tpu.matmul %386, %389, %cst_106 {dimension_numbers = #tpu.dot_dimension_numbers<[1], [0], [0], [1], [0, 0, 1, 1], [], []>} : vector<2x32xf32>, vector<32x128xf32>, vector<2x128xf32> -> vector<2x128xf32>
    %391 = vector.extract_strided_slice %0 {offsets = [3, 0], sizes = [1, 128], strides = [1, 1]} : vector<4x128xf32> to vector<1x128xf32>
    %392 = vector.broadcast %391 : vector<1x128xf32> to vector<2x128xf32>
    %393 = arith.addf %390, %392 : vector<2x128xf32>
    %c0_107 = arith.constant 0 : index
    %c0_108 = arith.constant 0 : index
    %394 = vector.load %arg13[%c0_107, %c0_108] : memref<2x128xf32, #tpu.memory_space<vmem>>, vector<2x128xf32>
    tpu.vector_store %arg13[%c0_107, %c0_108], %393 {strides = array<i32>} : memref<2x128xf32, #tpu.memory_space<vmem>>, vector<2x128xf32>,
    return
  }
}

</mosaic_0001>

<bundles_post_ra>
// kernel: forward.1
= control target key start
LH: loop header
LB: loop body
LE: loop exit
PB: predicated region body
PF: predicated region fallthrough
CT: control target
= control target key end

     0   :  { %19 = vsyncpa [#allocation3], 0  ;;  %vm44_vm0 = vcmask 261120   ;;  %s6683_s0 = inlined_call_operand.vmem [shape: f32[2,8,32], index: 0, kind: input, shape index: {}]   ;;  %s6684_s1 = inlined_call_operand.vmem [shape: f32[8,8], index: 1, kind: input, shape index: {}]   ;;  %s6685_s2 = inlined_call_operand.vmem [shape: f32[2,8,1], index: 2, kind: input, shape index: {}]   ;;  %s6686_s3 = inlined_call_operand.vmem [shape: f32[4,128], index: 3, kind: input, shape index: {}]   ;;  %s6687_s4 = inlined_call_operand.vmem [shape: f32[2,8,128], index: 4, kind: input, shape index: {}]   ;;  %s6688_s5 = inlined_call_operand.vmem [shape: f32[2,32,96], index: 5, kind: input, shape index: {}]   ;;  %s6689_s6 = inlined_call_operand.vmem [shape: f32[2,32,32], index: 6, kind: input, shape index: {}]   ;;  %s6690_s7 = inlined_call_operand.vmem [shape: f32[2,32,64], index: 7, kind: input, shape index: {}]   ;;  %s6691_s8 = inlined_call_operand.vmem [shape: f32[2,64,32], index: 8, kind: input, shape index: {}]   ;;  %s6692_s9 = inlined_call_operand.vmem [shape: f32[2,32,128], index: 9, kind: input, shape index: {}]   ;;  %s6693_s10 = inlined_call_operand.hbm [shape: f32[2,8,32], index: 10, kind: output, shape index: {0}]   ;;  %s6694_s11 = inlined_call_operand.vmem [shape: f32[2,8,64], index: 11, kind: output, shape index: {1}]   ;;  %s6695_s12 = inlined_call_operand.hbm [shape: f32[2,32], index: 12, kind: output, shape index: {2}]   ;;  %s6696_s13 = inlined_call_operand.hbm [shape: f32[2,128], index: 13, kind: output, shape index: {3}]  }
   0x1   :  { %v42_v0 = vld [vmem:[%s6683_s0] sm:$0xff]  ;;  %v43_v1 = vld [vmem:[%s6683_s0 + $0x8] sm:$0xff] }
   0x2   :  { %20 = vsyncpa [#allocation5], 0  ;;  %v45_v2 = vsel %vm44_vm0, %v42_v0, 0.0  ;;  %v48_v3 = vsel %vm44_vm0, %v43_v1, 0.0  ;;  %v139_v14 = vld [vmem:[%s6688_s5 + $0x18] sm:$0xff]  ;;  %v138_v15 = vld [vmem:[%s6688_s5 + $0x10] sm:$0xff]  ;;  %v72_v23 = vlaneseq }
   0x3   :  { %46 = vadd.xlane.f32.xlu0 %v45_v2  ;;  %4809 = vmatprep.subr.mxu0 %v139_v14  ;;  %v137_v16 = vld [vmem:[%s6688_s5 + $0x8] sm:$0xff]  ;;  %v136_v17 = vld [vmem:[%s6688_s5] sm:$0xff]  ;;  %v5281_v41 = vmov 0.0   ;;  %vm5282_vm1 = vmmov 0   ;;  %s5283_s23 = smov 120   ;;  %s5284_s24 = smov 112  }
   0x4   :  { %4810 = vmatpush3.msra.mxu0 %v139_v14  ;;  %v5393_v25 = vshrl.u32 %v72_v23, 7  ;;  %v41_v27 = vld [vmem:[%s6686_s3] sm:$0xf]  ;;  %4820 = vmatprep.subr.mxu1 %v5281_v41  ;;  %s5285_s25 = smov 104   ;;  %s5286_s26 = smov 96   ;;  %vm241_vm2 = vcmask 64512  }
   0x5   :  { %4811 = vmatprep.subr.mxu0 %v138_v15  ;;  %v5417_v39 = vld [vmem:[%s6687_s4] sm:$0xff]  ;;  %4822 = vmatprep.mubr.msk.f32.mxu1 %vm5282_vm1, %v5281_v41  ;;  %v5287_v60 = vmov 1966171168   ;;  %s5289_s29 = smov 64   ;;  %vm1124_vm3 = vcmask 1041409   ;;  %vm1127_vm4 = vcmask 1042434  }
   0x6   :  { %4812 = vmatpush3.msra.mxu0 %v138_v15  ;;  %v5396_v26 = vsub.s32 0, %v5393_v25  ;;  %v5402_v28 = vsub.s32 1, %v5393_v25  ;;  %v88_v61 = vunpack.c.l.s4 %v5287_v60  ;;  %vm1130_vm5 = vcmask 1043459   ;;  %s5290_s19 = smov 8   ;;  %s5291_s22 = smov 16  }
   0x7   :  { %49 = vadd.xlane.f32.xlu0 %v48_v3  ;;  %4813 = vmatprep.subr.mxu0 %v137_v16  ;;  %v5288_v3 = vmov 0   ;;  %vm1136_vm6 = vcmask 1045509   ;;  %vm1133_vm7 = vcmask 1044484   ;;  %vm1142_vm8 = vcmask 1047559   ;;  %s5292_s27 = smov 24   ;;  %s5293_s28 = smov 32  }
   0x8   :  { %4814 = vmatpush3.msra.mxu0 %v137_v16  ;;  %v75_v29 = vrot.slane %v41_v27, %v5396_v26  ;;  %v81_v32 = vrot.slane %v41_v27, %v5402_v28  ;;  %v143_v40 = vrot.slane %v5417_v39, %v5396_v26  ;;  %v89_v62 = vunpack.c.0.s8 %v88_v61  ;;  %5116 = vset.pattern.permute.xlu1 %v5288_v3 }
   0x9   :  { %4815 = vmatprep.subr.mxu0 %v136_v17  ;;  %5115 = vset.pattern.permute.xlu0 %v5288_v3  ;;  %vm1139_vm9 = vcmask 1046534   ;;  %vm1265_vm10 = vcmask 130048   ;;  %vm1267_vm11 = vcmask 195584   ;;  %vm1276_vm12 = vcmask 523264  }
   0xa   :  { %4816 = vmatpush3.msra.mxu0 %v136_v17  ;;  %v5520_v63 = vsub.s32 %v89_v62, %v5393_v25  ;;  %vm1270_vm13 = vcmask 326656   ;;  %vm1272_vm14 = vcmask 392192   ;;  %vm1274_vm15 = vcmask 457728  }
   0xb   :  { %4830 = vmatprep.subr.mxu0 %v5281_v41 }
  0x8c   :  { %v47_v4 = vpop.xlane.xlu0 %46 }
  0x8d   :  { %v52_v5 = vmul.f32 0.03125, %v47_v4 }
  0x8f   :  { %v54_v6 = vsub.f32 %v42_v0, %v52_v5  ;;  %v84_v0 = vld [vmem:[%s6684_s1] sm:$0xff]  ;;  %s5294_s1 = smov 40  }
  0x90   :  { %v50_v7 = vpop.xlane.xlu0 %49 }
  0x91   :  { %v53_v8 = vmul.f32 0.03125, %v50_v7  ;;  %v56_v9 = vmul.f32 %v54_v6, %v54_v6 }
  0x93   :  { %v55_v10 = vsub.f32 %v43_v1, %v53_v8  ;;  %v58_v11 = vsel %vm44_vm0, %v56_v9, 0.0  ;;  %v93_v1 = vrot.slane %v84_v0, %v5520_v63 }
  0x94   :  { %59 = vadd.xlane.f32.xlu1 %v58_v11 }
  0x95   :  { %v57_v12 = vmul.f32 %v55_v10, %v55_v10  ;;  %v109_v2 = vrot.slane %v93_v1, %v5520_v63  ;;  %v101_v4 = vcombine.high %v93_v1, %v93_v1 }
  0x97   :  { %v61_v13 = vsel %vm44_vm0, %v57_v12, 0.0  ;;  %v5528_v5 = vrot.slane %v109_v2, %v5396_v26  ;;  %v123_v8 = vrot.slane %v101_v4, %v5520_v63 }
  0x98   :  { %62 = vadd.xlane.f32.xlu1 %v61_v13 }
  0x99   :  { %v5537_v12 = vrot.slane %v123_v8, %v5396_v26 }
 0x11d   :  { %v60_v18 = vpop.xlane.xlu1 %59 }
 0x11e   :  { %v64_v19 = vmul.f32 0.03125, %v60_v18  ;;  %v86_v18 = vcombine.high %v84_v0, %v84_v0 }
 0x120   :  { %v66_v20 = vadd.f32 1e-12, %v64_v19  ;;  %v133_v19 = vcombine.high %v123_v8, %v123_v8 }
 0x121   :  { %v63_v21 = vpop.xlane.xlu1 %62 }
 0x122   :  { %5120 = vrsqrt.f32 %v66_v20  ;;  %v65_v22 = vmul.f32 0.03125, %v63_v21  ;;  %v100_v20 = vrot.slane %v86_v18, %v5520_v63  ;;  %v131_v21 = vcombine.high %v109_v2, %v109_v2 }
 0x124   :  { %v67_v24 = vadd.f32 1e-12, %v65_v22  ;;  %v5546_v22 = vrot.slane %v133_v19, %v5396_v26  ;;  %v102_v23 = vcombine.high %v100_v20, %v100_v20 }
 0x126   :  { %5122 = vrsqrt.f32 %v67_v24 }
 0x12f   :  { %v5121_v30 = vpop.eup %5120 }
 0x130   :  { %v70_v31 = vmul.f32 %v5121_v30, %v54_v6  ;;  %v116_v30 = vrot.slane %v100_v20, %v5520_v63 }
 0x132   :  { %v76_v33 = vmul.f32 %v75_v29, %v70_v31 }
 0x133   :  { %v5123_v34 = vpop.eup %5122 }
 0x134   :  { %v71_v35 = vmul.f32 %v5123_v34, %v55_v10  ;;  %v5406_v36 = vadd.f32 %v81_v32, %v76_v33 }
 0x136   :  { %v77_v37 = vmul.f32 %v75_v29, %v71_v35  ;;  %4817 = vmatprep.mubr.msk.f32.mxu0 %vm44_vm0, %v5406_v36  ;;  %v5549_v29 = vrot.slane %v131_v21, %v5396_v26  ;;  %v130_v35 = vrot.slane %v102_v23, %v5520_v63 }
 0x138   :  { %v5410_v38 = vadd.f32 %v81_v32, %v77_v37 }
 0x13a   :  { %4818 = vmatmul.mubr.msk.f32.vlgmr.msra.gmra.mxu0 %vm44_vm0, %v5410_v38 }
 0x13b   :  { %4832 = vmatprep.mubr.msk.f32.mxu0 %vm5282_vm1, %v5281_v41 }
 0x1fa   :  { %v4819_v42 = vpop.f32.mrf.mxu0 }
 0x1fb   :  { %v5423_v43 = vadd.f32 %v4819_v42, %v143_v40 }
 0x1fc   :  { %v216_v44 = vpop.f32.mrf.mxu0 }
 0x1fd   :  { %v5429_v45 = vadd.f32 %v216_v44, %v143_v40  ;;  %229 = vrot.lane.b32.xlu1 %v5423_v43, %s5283_s23  ;;  %v5562_v44 = vrot.slane %v116_v30, %v5396_v26 }
 0x1ff   :  { %227 = vrot.lane.b32.xlu0 %v5429_v45, %s5283_s23 }
 0x201   :  { %231 = vrot.lane.b32.xlu1 %v5429_v45, %s5284_s24 }
 0x203   :  { %235 = vrot.lane.b32.xlu0 %v5429_v45, %s5285_s25 }
 0x205   :  { %233 = vrot.lane.b32.xlu1 %v5423_v43, %s5284_s24 }
 0x207   :  { %239 = vrot.lane.b32.xlu0 %v5429_v45, %s5286_s26 }
 0x209   :  { %237 = vrot.lane.b32.xlu1 %v5423_v43, %s5285_s25 }
 0x20d   :  { %316 = vrot.lane.b32.xlu1 %v5423_v43, %s5286_s26 }
 0x26f   :  { %v5447_v46 = vpop.permute.xlu1 %229 }
 0x270   :  { %468 = vrot.lane.b32.xlu1 %v5447_v46, %s5286_s26 }
 0x271   :  { %v5451_v47 = vpop.permute.xlu0 %227 }
 0x272   :  { %392 = vrot.lane.b32.xlu0 %v5451_v47, %s5286_s26 }
 0x273   :  { %v5455_v48 = vpop.permute.xlu1 %231 }
 0x275   :  { %v5457_v49 = vpop.permute.xlu0 %235 }
 0x276   :  { %544 = vrot.lane.b32.xlu0 %v5455_v48, %s5286_s26 }
 0x277   :  { %v5461_v50 = vpop.permute.xlu1 %233 }
 0x278   :  { %620 = vrot.lane.b32.xlu1 %v5461_v50, %s5286_s26 }
 0x279   :  { %v240_v51 = vpop.permute.xlu0 %239 }
 0x27a   :  { %696 = vrot.lane.b32.xlu0 %v5457_v49, %s5286_s26  ;;  %4821 = vmatpush3.xpose.msk.msra.mxu1 %vm241_vm2, %v240_v51  ;;  %v132_v51 = vcombine.high %v116_v30, %v116_v30 }
 0x27b   :  { %v5468_v52 = vpop.permute.xlu1 %237  ;;  %4825 = vmatprep.subr.mxu1 %v5281_v41 }
 0x27c   :  { %772 = vrot.lane.b32.xlu1 %v5468_v52, %s5286_s26  ;;  %v5573_v62 = vrot.slane %v132_v51, %v5396_v26 }
 0x27d   :  { %4823 = vmatmul.mubr.msk.f32.vlgmr.msra.gmra.mxu1 %vm241_vm2, %v5429_v45 }
 0x27e   :  { %4827 = vmatprep.mubr.msk.f32.mxu1 %vm5282_vm1, %v5281_v41 }
 0x27f   :  { %v317_v53 = vpop.permute.xlu1 %316 }
 0x280   :  { %4826 = vmatpush3.xpose.msk.msra.mxu1 %vm241_vm2, %v317_v53 }
 0x281   :  { %4835 = vmatprep.subr.mxu1 %v5281_v41 }
 0x283   :  { %4828 = vmatmul.mubr.msk.f32.vlgmr.msra.gmra.mxu1 %vm241_vm2, %v5423_v43 }
 0x284   :  { %4837 = vmatprep.mubr.msk.f32.mxu1 %vm5282_vm1, %v5281_v41 }
 0x2e2   :  { %v469_v54 = vpop.permute.xlu1 %468 }
 0x2e3   :  { %4836 = vmatpush3.xpose.msk.msra.mxu1 %vm241_vm2, %v469_v54 }
 0x2e4   :  { %v393_v55 = vpop.permute.xlu0 %392  ;;  %4845 = vmatprep.subr.mxu1 %v5281_v41 }
 0x2e5   :  { %4831 = vmatpush3.xpose.msk.msra.mxu0 %vm241_vm2, %v393_v55  ;;  %v5565_v55 = vrot.slane %v130_v35, %v5396_v26 }
 0x2e6   :  { %4838 = vmatmul.mubr.msk.f32.vlgmr.msra.gmra.mxu1 %vm241_vm2, %v5447_v46  ;;  %4840 = vmatprep.subr.mxu0 %v5281_v41 }
 0x2e7   :  { %4847 = vmatprep.mubr.msk.f32.mxu1 %vm5282_vm1, %v5281_v41 }
 0x2e8   :  { %4833 = vmatmul.mubr.msk.f32.vlgmr.msra.gmra.mxu0 %vm241_vm2, %v5451_v47  ;;  %v545_v56 = vpop.permute.xlu0 %544 }
 0x2e9   :  { %4841 = vmatpush3.xpose.msk.msra.mxu0 %vm241_vm2, %v545_v56  ;;  %4842 = vmatprep.mubr.msk.f32.mxu0 %vm5282_vm1, %v5281_v41  ;;  %v134_v56 = vcombine.high %v130_v35, %v130_v35 }
 0x2ea   :  { %v621_v57 = vpop.permute.xlu1 %620  ;;  %4850 = vmatprep.subr.mxu0 %v5281_v41 }
 0x2eb   :  { %4846 = vmatpush3.xpose.msk.msra.mxu1 %vm241_vm2, %v621_v57  ;;  %v5579_v4 = vrot.slane %v134_v56, %v5396_v26 }
 0x2ec   :  { %4843 = vmatmul.mubr.msk.f32.vlgmr.msra.gmra.mxu0 %vm241_vm2, %v5455_v48  ;;  %v697_v58 = vpop.permute.xlu0 %696  ;;  %4855 = vmatprep.subr.mxu1 %v5281_v41 }
 0x2ed   :  { %4851 = vmatpush3.xpose.msk.msra.mxu0 %vm241_vm2, %v697_v58  ;;  %4852 = vmatprep.mubr.msk.f32.mxu0 %vm5282_vm1, %v5281_v41 }
 0x2ee   :  { %v773_v59 = vpop.permute.xlu1 %772  ;;  %4848 = vmatmul.mubr.msk.f32.vlgmr.msra.gmra.mxu1 %vm241_vm2, %v5461_v50  ;;  %4860 = vmatprep.subr.mxu0 %v5281_v41 }
 0x2ef   :  { %4856 = vmatpush3.xpose.msk.msra.mxu1 %vm241_vm2, %v773_v59  ;;  %4857 = vmatprep.mubr.msk.f32.mxu1 %vm5282_vm1, %v5281_v41 }
 0x2f0   :  { %4853 = vmatmul.mubr.msk.f32.vlgmr.msra.gmra.mxu0 %vm241_vm2, %v5457_v49  ;;  %4865 = vmatprep.subr.mxu1 %v5281_v41 }
 0x2f1   :  { %4862 = vmatprep.mubr.msk.f32.mxu0 %vm5282_vm1, %v5281_v41 }
 0x2f2   :  { %4858 = vmatmul.mubr.msk.f32.vlgmr.msra.gmra.mxu1 %vm241_vm2, %v5468_v52 }
 0x2f3   :  { %4867 = vmatprep.mubr.msk.f32.mxu1 %vm5282_vm1, %v5281_v41 }
 0x33d   :  { %v312_v6 = vpop.f32.mrf.mxu1 }
 0x33e   :  { %v848_v7 = vmul.f32 0.35355338, %v312_v6 }
 0x33f   :  { %v4824_v9 = vpop.f32.mrf.mxu1 }
 0x340   :  { %v5532_v10 = vadd.f32 %v5528_v5, %v848_v7 }
 0x342   :  { %v904_v11 = vsel %vm241_vm2, %v5532_v10, -inf }
 0x343   :  { %905 = vmax.xlane.f32.xlu0 %v904_v11  ;;  %v388_v13 = vpop.f32.mrf.mxu1 }
 0x344   :  { %v849_v14 = vmul.f32 0.35355338, %v388_v13 }
 0x345   :  { %v4829_v15 = vpop.f32.mrf.mxu1 }
 0x346   :  { %v5540_v16 = vadd.f32 %v5537_v12, %v849_v14 }
 0x348   :  { %v907_v17 = vsel %vm241_vm2, %v5540_v16, -inf }
 0x349   :  { %908 = vmax.xlane.f32.xlu1 %v907_v17  ;;  %v992_v17 = vld [vmem:[%s6685_s2] sm:$0xff] }
 0x34a   :  { %v1001_v20 = vrot.slane %v992_v17, %v5520_v63  ;;  %v994_v23 = vcombine.high %v992_v17, %v992_v17 }
 0x34c   :  { %v1009_v21 = vcombine.high %v1001_v20, %v1001_v20  ;;  %v1008_v30 = vrot.slane %v994_v23, %v5520_v63 }
 0x3a6   :  { %v540_v24 = vpop.f32.mrf.mxu1 }
 0x3a7   :  { %v851_v27 = vmul.f32 0.35355338, %v540_v24  ;;  %v1031_v24 = vrot.slane %v1009_v21, %v5520_v63 }
 0x3a8   :  { %v464_v31 = vpop.f32.mrf.mxu0  ;;  %v4839_v32 = vpop.f32.mrf.mxu1 }
 0x3a9   :  { %v850_v33 = vmul.f32 0.35355338, %v464_v31  ;;  %v5553_v34 = vadd.f32 %v5546_v22, %v851_v27  ;;  %v1017_v27 = vrot.slane %v1001_v20, %v5520_v63  ;;  %v1050_v31 = vrot.slane %v1031_v24, %v5396_v26 }
 0x3aa   :  { %v4834_v37 = vpop.f32.mrf.mxu0 }
 0x3ab   :  { %v913_v40 = vsel %vm241_vm2, %v5553_v34, -inf  ;;  %v5559_v42 = vadd.f32 %v5549_v29, %v850_v33  ;;  %v1039_v32 = vcombine.high %v1017_v27, %v1017_v27  ;;  %v1010_v33 = vcombine.high %v1008_v30, %v1008_v30 }
 0x3ac   :  { %914 = vmax.xlane.f32.xlu0 %v913_v40  ;;  %v616_v53 = vpop.f32.mrf.mxu0  ;;  %v1041_v37 = vcombine.high %v1031_v24, %v1031_v24  ;;  %v1046_v40 = vrot.slane %v1017_v27, %v5396_v26 }
 0x3ad   :  { %v852_v54 = vmul.f32 0.35355338, %v616_v53  ;;  %v910_v60 = vsel %vm241_vm2, %v5559_v42, -inf  ;;  %v1054_v35 = vrot.slane %v1039_v32, %v5396_v26  ;;  %v1038_v51 = vrot.slane %v1010_v33, %v5520_v63 }
 0x3ae   :  { %v4844_v57 = vpop.f32.mrf.mxu0  ;;  %v692_v58 = vpop.f32.mrf.mxu1  ;;  %v1058_v53 = vrot.slane %v1041_v37, %v5396_v26 }
 0x3af   :  { %v853_v59 = vmul.f32 0.35355338, %v692_v58  ;;  %v5570_v61 = vadd.f32 %v5562_v44, %v852_v54  ;;  %v1042_v54 = vcombine.high %v1038_v51, %v1038_v51  ;;  %v1024_v57 = vrot.slane %v1008_v30, %v5520_v63 }
 0x3b0   :  { %v4849_v0 = vpop.f32.mrf.mxu1  ;;  %911 = vmax.xlane.f32.xlu0 %v910_v60  ;;  %v768_v1 = vpop.f32.mrf.mxu0 }
 0x3b1   :  { %v854_v2 = vmul.f32 0.35355338, %v768_v1  ;;  %v5576_v3 = vadd.f32 %v5565_v55, %v853_v59  ;;  %v916_v11 = vsel %vm241_vm2, %v5570_v61, -inf  ;;  %v1074_v56 = vrot.slane %v1042_v54, %v5396_v26 }
 0x3b2   :  { %v4854_v6 = vpop.f32.mrf.mxu0  ;;  %v844_v7 = vpop.f32.mrf.mxu1  ;;  %v1062_v58 = vrot.slane %v1024_v57, %v5396_v26  ;;  %v1040_v0 = vcombine.high %v1024_v57, %v1024_v57 }
 0x3b3   :  { %v855_v8 = vmul.f32 0.35355338, %v844_v7  ;;  %v919_v9 = vsel %vm241_vm2, %v5576_v3, -inf  ;;  %v5586_v13 = vadd.f32 %v5573_v62, %v854_v2 }
 0x3b4   :  { %920 = vmax.xlane.f32.xlu1 %v919_v9  ;;  %v4859_v14 = vpop.f32.mrf.mxu1  ;;  %917 = vmax.xlane.f32.xlu0 %v916_v11  ;;  %v1070_v1 = vrot.slane %v1040_v0, %v5396_v26 }
 0x3b5   :  { %v5589_v15 = vadd.f32 %v5579_v4, %v855_v8  ;;  %v922_v19 = vsel %vm241_vm2, %v5586_v13, -inf }
 0x3b7   :  { %v925_v18 = vsel %vm241_vm2, %v5589_v15, -inf }
 0x3b8   :  { %926 = vmax.xlane.f32.xlu1 %v925_v18  ;;  %923 = vmax.xlane.f32.xlu0 %v922_v19 }
 0x3c9   :  { %1080 = vperm.xlu1 %5116, %v1050_v31  }
 0x3cc   :  { %v906_v59 = vpop.xlane.xlu0 %905 }
 0x3cd   :  { %1084 = vperm.xlu1 %5116, %v1054_v35   ;;  %v928_v60 = vsub.f32 %v5532_v10, %v906_v59 }
 0x3ce   :  { %1076 = vperm.xlu0 %5115, %v1046_v40  }
 0x3d1   :  { %1088 = vperm.xlu1 %5116, %v1058_v53  }
 0x3d2   :  { %1503 = vrot.lane.b32.xlu0 %v5447_v46, %s5289_s29  ;;  %v1066_v46 = vrot.slane %v1038_v51, %v5396_v26 }
 0x3d5   :  { %1278 = vrot.lane.b32.xlu1 %v5429_v45, %s5289_s29  ;;  %v936_v45 = vmul.f32 1.442695, %v928_v60 }
 0x3d6   :  { %1104 = vperm.xlu0 %5115, %v1074_v56  }
 0x3d7   :  { %5124 = vpow2.f32 %v936_v45 }
 0x3d9   :  { %1353 = vrot.lane.b32.xlu1 %v5423_v43, %s5289_s29 }
 0x3da   :  { %1653 = vrot.lane.b32.xlu0 %v5461_v50, %s5289_s29  ;;  %v909_v50 = vpop.xlane.xlu1 %908 }
 0x3db   :  { %v929_v2 = vsub.f32 %v5540_v16, %v909_v50 }
 0x3dd   :  { %1092 = vperm.xlu1 %5116, %v1062_v58   ;;  %v938_v6 = vmul.f32 1.442695, %v929_v2 }
 0x3df   :  { %5126 = vpow2.f32 %v938_v6 }
 0x3e1   :  { %1096 = vperm.xlu1 %5116, %v1066_v46  }
 0x3e4   :  { %v5625_v43 = vpop.eup %5124 }
 0x3e5   :  { %1428 = vrot.lane.b32.xlu1 %v5451_v47, %s5289_s29  ;;  %v952_v10 = vsel %vm241_vm2, %v5625_v43, 0.0 }
 0x3e9   :  { %1100 = vperm.xlu1 %5116, %v1070_v1  }
 0x3ec   :  { %v5630_v7 = vpop.eup %5126 }
 0x3ed   :  { %1578 = vrot.lane.b32.xlu1 %v5455_v48, %s5289_s29  ;;  %v955_v47 = vsel %vm241_vm2, %v5630_v7, 0.0 }
 0x3f9   :  { %953 = vadd.xlane.f32.xlu0 %v952_v10 }
 0x411   :  { %956 = vadd.xlane.f32.xlu1 %v955_v47 }
 0x435   :  { %v915_v8 = vpop.xlane.xlu0 %914 }
 0x436   :  { %v931_v48 = vsub.f32 %v5553_v34, %v915_v8 }
 0x438   :  { %v942_v9 = vmul.f32 1.442695, %v931_v48 }
 0x439   :  { %v912_v11 = vpop.xlane.xlu0 %911 }
 0x43a   :  { %5128 = vpow2.f32 %v942_v9  ;;  %v930_v16 = vsub.f32 %v5559_v42, %v912_v11 }
 0x43c   :  { %v940_v14 = vmul.f32 1.442695, %v930_v16 }
 0x43d   :  { %v921_v17 = vpop.xlane.xlu1 %920  ;;  %v918_v18 = vpop.xlane.xlu0 %917 }
 0x43e   :  { %5130 = vpow2.f32 %v940_v14  ;;  %v933_v19 = vsub.f32 %v5576_v3, %v921_v17  ;;  %v932_v20 = vsub.f32 %v5570_v61, %v918_v18 }
 0x440   :  { %v946_v21 = vmul.f32 1.442695, %v933_v19  ;;  %v944_v23 = vmul.f32 1.442695, %v932_v20 }
 0x441   :  { %v927_v24 = vpop.xlane.xlu1 %926  ;;  %v924_v27 = vpop.xlane.xlu0 %923 }
 0x442   :  { %5132 = vpow2.f32 %v946_v21  ;;  %v935_v34 = vsub.f32 %v5589_v15, %v927_v24  ;;  %v934_v30 = vsub.f32 %v5586_v13, %v924_v27 }
 0x443   :  { %5134 = vpow2.f32 %v944_v23 }
 0x444   :  { %v950_v31 = vmul.f32 1.442695, %v935_v34  ;;  %v948_v42 = vmul.f32 1.442695, %v934_v30 }
 0x445   :  { %v1081_v32 = vpop.permute.xlu1 %1080 }
 0x446   :  { %5136 = vpow2.f32 %v950_v31 }
 0x447   :  { %v5640_v33 = vpop.eup %5128  ;;  %5138 = vpow2.f32 %v948_v42 }
 0x448   :  { %v961_v61 = vsel %vm241_vm2, %v5640_v33, 0.0 }
 0x449   :  { %v5644_v3 = vpop.permute.xlu1 %1084  ;;  %962 = vadd.xlane.f32.xlu1 %v961_v61  ;;  %v1077_v60 = vpop.permute.xlu0 %1076 }
 0x44b   :  { %v5646_v35 = vpop.eup %5130 }
 0x44c   :  { %v958_v15 = vsel %vm241_vm2, %v5646_v35, 0.0 }
 0x44d   :  { %v5650_v13 = vpop.permute.xlu1 %1088  ;;  %959 = vadd.xlane.f32.xlu0 %v958_v15  ;;  %v1504_v0 = vpop.permute.xlu0 %1503 }
 0x44f   :  { %v5652_v37 = vpop.eup %5132 }
 0x450   :  { %v5654_v40 = vpop.eup %5134  ;;  %v967_v51 = vsel %vm241_vm2, %v5652_v37, 0.0 }
 0x451   :  { %v1279_v53 = vpop.permute.xlu1 %1278  ;;  %968 = vadd.xlane.f32.xlu1 %v967_v51  ;;  %v964_v54 = vsel %vm241_vm2, %v5654_v40, 0.0  ;;  %v5674_v45 = vpop.permute.xlu0 %1104 }
 0x452   :  { %965 = vadd.xlane.f32.xlu0 %v964_v54  ;;  %4861 = vmatpush3.msra.mxu0 %v1279_v53 }
 0x453   :  { %v5660_v56 = vpop.eup %5136  ;;  %4870 = vmatprep.subr.mxu0 %v5281_v41 }
 0x454   :  { %v5663_v57 = vpop.eup %5138  ;;  %v973_v58 = vsel %vm241_vm2, %v5660_v56, 0.0 }
 0x455   :  { %v1354_v59 = vpop.permute.xlu1 %1353  ;;  %974 = vadd.xlane.f32.xlu1 %v973_v58  ;;  %v970_v46 = vsel %vm241_vm2, %v5663_v57, 0.0  ;;  %v5676_v1 = vpop.permute.xlu0 %1653 }
 0x456   :  { %971 = vadd.xlane.f32.xlu0 %v970_v46  ;;  %4866 = vmatpush3.msra.mxu1 %v1354_v59 }
 0x457   :  { %4875 = vmatprep.subr.mxu1 %v5281_v41 }
 0x459   :  { %v5678_v50 = vpop.permute.xlu1 %1092 }
 0x45d   :  { %v5680_v10 = vpop.permute.xlu1 %1096 }
 0x461   :  { %v1429_v6 = vpop.permute.xlu1 %1428 }
 0x465   :  { %v5682_v8 = vpop.permute.xlu1 %1100 }
 0x466   :  { %1728 = vrot.lane.b32.xlu1 %v5457_v49, %s5289_s29 }
 0x46c   :  { %1803 = vrot.lane.b32.xlu0 %v5468_v52, %s5289_s29  ;;  %v5686_v52 = vpop.permute.xlu1 %1578 }
 0x482   :  { %v954_v2 = vpop.xlane.xlu0 %953 }
 0x483   :  { %5140 = vrcp.f32 %v954_v2 }
 0x490   :  { %v5141_v47 = vpop.eup %5140 }
 0x491   :  { %v984_v49 = vmul.f32 %v5141_v47, %v5625_v43 }
 0x493   :  { %v1107_v48 = vmul.f32 %v1077_v60, %v984_v49 }
 0x495   :  { %4863 = vmatmul.mubr.msk.f32.vlgmr.msra.gmra.mxu0 %vm241_vm2, %v1107_v48  ;;  %v1145_v17 = vrot.slane %v1107_v48, 1  ;;  %v1162_v43 = vrot.slane %v1107_v48, 2  ;;  %v1179_v18 = vrot.slane %v1107_v48, 3  ;;  %v1196_v19 = vrot.slane %v1107_v48, 4 }
 0x496   :  { %4871 = vmatpush3.msra.mxu0 %v1429_v6  ;;  %4872 = vmatprep.mubr.msk.f32.mxu0 %vm5282_vm1, %v5281_v41  ;;  %v1213_v20 = vrot.slane %v1107_v48, 5  ;;  %v1230_v21 = vrot.slane %v1107_v48, 6  ;;  %v1247_v23 = vrot.slane %v1107_v48, 7 }
 0x497   :  { %4880 = vmatprep.subr.mxu0 %v5281_v41 }
 0x49a   :  { %v957_v9 = vpop.xlane.xlu1 %956 }
 0x49b   :  { %5142 = vrcp.f32 %v957_v9 }
 0x4a8   :  { %v5143_v11 = vpop.eup %5142 }
 0x4a9   :  { %v985_v16 = vmul.f32 %v5143_v11, %v5630_v7 }
 0x4ab   :  { %v1108_v14 = vmul.f32 %v1081_v32, %v985_v16 }
 0x4ad   :  { %4868 = vmatmul.mubr.msk.f32.vlgmr.msra.gmra.mxu1 %vm241_vm2, %v1108_v14  ;;  %v5694_v24 = vsel %vm1124_vm3, %v1108_v14, %v1145_v17  ;;  %v1163_v27 = vrot.slane %v1108_v14, 1  ;;  %v1180_v34 = vrot.slane %v1108_v14, 2  ;;  %v1197_v30 = vrot.slane %v1108_v14, 3 }
 0x4ae   :  { %4876 = vmatpush3.msra.mxu1 %v1504_v0  ;;  %4877 = vmatprep.mubr.msk.f32.mxu1 %vm5282_vm1, %v5281_v41  ;;  %v1214_v7 = vrot.slane %v1108_v14, 4  ;;  %v1231_v31 = vrot.slane %v1108_v14, 5  ;;  %v1248_v42 = vrot.slane %v1108_v14, 6  ;;  %v1123_v32 = vrot.slane %v1108_v14, 7 }
 0x4af   :  { %4885 = vmatprep.subr.mxu1 %v5281_v41  ;;  %v1164_v61 = vsel %vm1124_vm3, %v1163_v27, %v1162_v43  ;;  %v1181_v15 = vsel %vm1124_vm3, %v1180_v34, %v1179_v18  ;;  %v5702_v51 = vsel %vm1124_vm3, %v1197_v30, %v1196_v19 }
 0x4b0   :  { %v5705_v53 = vsel %vm1124_vm3, %v1214_v7, %v1213_v20  ;;  %v5708_v54 = vsel %vm1124_vm3, %v1231_v31, %v1230_v21  ;;  %v5711_v58 = vsel %vm1124_vm3, %v1248_v42, %v1247_v23  ;;  %v5714_v59 = vsel %vm1124_vm3, %v1123_v32, %v1107_v48 }
 0x4d2   :  { %v963_v46 = vpop.xlane.xlu1 %962 }
 0x4d3   :  { %5144 = vrcp.f32 %v963_v46 }
 0x4d6   :  { %v960_v60 = vpop.xlane.xlu0 %959 }
 0x4d7   :  { %5146 = vrcp.f32 %v960_v60 }
 0x4da   :  { %v969_v0 = vpop.xlane.xlu1 %968 }
 0x4db   :  { %5148 = vrcp.f32 %v969_v0  ;;  %v966_v2 = vpop.xlane.xlu0 %965 }
 0x4dc   :  { %5150 = vrcp.f32 %v966_v2 }
 0x4de   :  { %v975_v6 = vpop.xlane.xlu1 %974 }
 0x4df   :  { %5152 = vrcp.f32 %v975_v6  ;;  %v972_v47 = vpop.xlane.xlu0 %971 }
 0x4e0   :  { %v5145_v49 = vpop.eup %5144  ;;  %5154 = vrcp.f32 %v972_v47 }
 0x4e1   :  { %v987_v9 = vmul.f32 %v5145_v49, %v5640_v33 }
 0x4e2   :  { %v1729_v49 = vpop.permute.xlu1 %1728 }
 0x4e3   :  { %v5718_v11 = vmul.f32 %v5650_v13, %v987_v9 }
 0x4e4   :  { %v5147_v48 = vpop.eup %5146 }
 0x4e5   :  { %v986_v16 = vmul.f32 %v5147_v48, %v5646_v35  ;;  %4878 = vmatmul.mubr.msk.f32.vlgmr.msra.gmra.mxu1 %vm241_vm2, %v5718_v11  ;;  %v1149_v33 = vrot.slane %v5718_v11, 6  ;;  %v1166_v35 = vrot.slane %v5718_v11, 7  ;;  %v1201_v13 = vrot.slane %v5718_v11, 1 }
 0x4e6   :  { %4886 = vmatpush3.msra.mxu1 %v5676_v1  ;;  %4887 = vmatprep.mubr.msk.f32.mxu1 %vm5282_vm1, %v5281_v41  ;;  %v1218_v1 = vrot.slane %v5718_v11, 2  ;;  %v1235_v43 = vrot.slane %v5718_v11, 3  ;;  %v1252_v18 = vrot.slane %v5718_v11, 4  ;;  %v1129_v19 = vrot.slane %v5718_v11, 5 }
 0x4e7   :  { %v5727_v14 = vmul.f32 %v5644_v3, %v986_v16  ;;  %4895 = vmatprep.subr.mxu1 %v5281_v41 }
 0x4e8   :  { %v5149_v17 = vpop.eup %5148 }
 0x4e9   :  { %v5151_v3 = vpop.eup %5150  ;;  %v989_v20 = vmul.f32 %v5149_v17, %v5652_v37  ;;  %4873 = vmatmul.mubr.msk.f32.vlgmr.msra.gmra.mxu0 %vm241_vm2, %v5727_v14  ;;  %v1147_v21 = vrot.slane %v5727_v14, 7  ;;  %v1165_v23 = vsel %vm1127_vm4, %v5727_v14, %v1164_v61  ;;  %v1182_v27 = vrot.slane %v5727_v14, 1 }
 0x4ea   :  { %v988_v34 = vmul.f32 %v5151_v3, %v5654_v40  ;;  %4881 = vmatpush3.msra.mxu0 %v5686_v52  ;;  %4882 = vmatprep.mubr.msk.f32.mxu0 %vm5282_vm1, %v5281_v41  ;;  %v1167_v37 = vsel %vm1130_vm5, %v1166_v35, %v1165_v23  ;;  %v1199_v30 = vrot.slane %v5727_v14, 2  ;;  %v1216_v7 = vrot.slane %v5727_v14, 3 }
 0x4eb   :  { %v5752_v31 = vmul.f32 %v5680_v10, %v989_v20  ;;  %4890 = vmatprep.subr.mxu0 %v5281_v41  ;;  %v1148_v40 = vsel %vm1127_vm4, %v1147_v21, %v5694_v24  ;;  %v1183_v52 = vsel %vm1127_vm4, %v1182_v27, %v1181_v15  ;;  %v1233_v42 = vrot.slane %v5727_v14, 4  ;;  %v1804_v24 = vpop.permute.xlu0 %1803 }
 0x4ec   :  { %v5153_v32 = vpop.eup %5152  ;;  %v5760_v61 = vmul.f32 %v5678_v50, %v988_v34  ;;  %v1150_v46 = vsel %vm1130_vm5, %v1149_v33, %v1148_v40  ;;  %v1184_v10 = vsel %vm1130_vm5, %v5718_v11, %v1183_v52  ;;  %v1200_v60 = vsel %vm1127_vm4, %v1199_v30, %v5702_v51 }
 0x4ed   :  { %v5155_v0 = vpop.eup %5154  ;;  %v991_v2 = vmul.f32 %v5153_v32, %v5660_v56  ;;  %4888 = vmatmul.mubr.msk.f32.vlgmr.msra.gmra.mxu1 %vm241_vm2, %v5752_v31  ;;  %v1153_v15 = vrot.slane %v5752_v31, 4  ;;  %v1170_v50 = vrot.slane %v5752_v31, 5  ;;  %v1187_v6 = vrot.slane %v5752_v31, 6 }
 0x4ee   :  { %v990_v47 = vmul.f32 %v5155_v0, %v5663_v57  ;;  %4883 = vmatmul.mubr.msk.f32.vlgmr.msra.gmra.mxu0 %vm241_vm2, %v5760_v61  ;;  %4896 = vmatpush3.msra.mxu1 %v1804_v24  ;;  %v1151_v51 = vrot.slane %v5760_v61, 5  ;;  %v1168_v56 = vrot.slane %v5760_v61, 6  ;;  %v1185_v9 = vrot.slane %v5760_v61, 7 }
 0x4ef   :  { %v5780_v48 = vmul.f32 %v5674_v45, %v991_v2  ;;  %4891 = vmatpush3.msra.mxu0 %v1729_v49  ;;  %4892 = vmatprep.mubr.msk.f32.mxu0 %vm5282_vm1, %v5281_v41  ;;  %v1202_v57 = vsel %vm1130_vm5, %v1201_v13, %v1200_v60  ;;  %v1204_v16 = vrot.slane %v5752_v31, 7  ;;  %v1217_v33 = vsel %vm1127_vm4, %v1216_v7, %v5705_v53 }
 0x4f0   :  { %v5789_v35 = vmul.f32 %v5682_v8, %v990_v47  ;;  %4897 = vmatprep.mubr.msk.f32.mxu1 %vm5282_vm1, %v5281_v41  ;;  %v1152_v45 = vsel %vm1133_vm7, %v1151_v51, %v1150_v46  ;;  %v1169_v17 = vsel %vm1133_vm7, %v1168_v56, %v1167_v37  ;;  %v1186_v3 = vsel %vm1133_vm7, %v1185_v9, %v1184_v10 }
 0x4f1   :  { %4898 = vmatmul.mubr.msk.f32.vlgmr.msra.gmra.mxu1 %vm241_vm2, %v5780_v48  ;;  %v1154_v13 = vsel %vm1136_vm6, %v1153_v15, %v1152_v45  ;;  %v1157_v20 = vrot.slane %v5780_v48, 2  ;;  %v1171_v53 = vsel %vm1136_vm6, %v1170_v50, %v1169_v17  ;;  %v1174_v8 = vrot.slane %v5780_v48, 3 }
 0x4f2   :  { %4893 = vmatmul.mubr.msk.f32.vlgmr.msra.gmra.mxu0 %vm241_vm2, %v5789_v35  ;;  %v1155_v21 = vrot.slane %v5789_v35, 3  ;;  %v1172_v23 = vrot.slane %v5789_v35, 4  ;;  %v1188_v27 = vsel %vm1136_vm6, %v1187_v6, %v1186_v3  ;;  %v1189_v34 = vrot.slane %v5789_v35, 5 }
 0x4f3   :  { %v1191_v37 = vrot.slane %v5780_v48, 4  ;;  %v1203_v30 = vsel %vm1133_vm7, %v5760_v61, %v1202_v57  ;;  %v1206_v7 = vrot.slane %v5789_v35, 6  ;;  %v1208_v40 = vrot.slane %v5780_v48, 5 }
 0x4f4   :  { %v1156_v52 = vsel %vm1139_vm9, %v1155_v21, %v1154_v13  ;;  %v1173_v32 = vsel %vm1139_vm9, %v1172_v23, %v1171_v53  ;;  %v1190_v46 = vsel %vm1139_vm9, %v1189_v34, %v1188_v27  ;;  %v1205_v10 = vsel %vm1136_vm6, %v1204_v16, %v1203_v30 }
 0x4f5   :  { %v5818_v60 = vsel %vm1142_vm8, %v1157_v20, %v1156_v52  ;;  %v5821_v0 = vsel %vm1142_vm8, %v1174_v8, %v1173_v32  ;;  %v5824_v2 = vsel %vm1142_vm8, %v1191_v37, %v1190_v46  ;;  %v1207_v24 = vsel %vm1139_vm9, %v1206_v7, %v1205_v10 }
 0x4f6   :  { %v5828_v15 = vsel %vm1142_vm8, %v1208_v40, %v1207_v24  ;;  %v1219_v50 = vsel %vm1130_vm5, %v1218_v1, %v1217_v33  ;;  %v1220_v6 = vrot.slane %v5760_v61, 1  ;;  %v1223_v47 = vrot.slane %v5789_v35, 7 }
 0x4f7   :  { %v1225_v49 = vrot.slane %v5780_v48, 6  ;;  %v1234_v51 = vsel %vm1127_vm4, %v1233_v42, %v5708_v54  ;;  %v1237_v56 = vrot.slane %v5760_v61, 2  ;;  %v1239_v9 = vrot.slane %v5752_v31, 1 }
 0x4f8   :  { %v1221_v57 = vsel %vm1133_vm7, %v1220_v6, %v1219_v50  ;;  %v1236_v16 = vsel %vm1130_vm5, %v1235_v43, %v1234_v51  ;;  %v1242_v1 = vrot.slane %v5780_v48, 7  ;;  %v1250_v33 = vrot.slane %v5727_v14, 5  ;;  %v1909_v50 = vld [vmem:[%s6689_s6 + $0x8] sm:$0xff] }
 0x4f9   :  { %v1222_v45 = vsel %vm1136_vm6, %v5752_v31, %v1221_v57  ;;  %v1238_v17 = vsel %vm1133_vm7, %v1237_v56, %v1236_v16  ;;  %v1254_v54 = vrot.slane %v5760_v61, 3  ;;  %v1256_v42 = vrot.slane %v5752_v31, 2 }
 0x4fa   :  { %v1224_v3 = vsel %vm1139_vm9, %v1223_v47, %v1222_v45  ;;  %v1240_v13 = vsel %vm1136_vm6, %v1239_v9, %v1238_v17  ;;  %v1251_v43 = vsel %vm1127_vm4, %v1250_v33, %v5711_v58  ;;  %v1258_v20 = vrot.slane %v5789_v35, 1  ;;  %v1908_v47 = vld [vmem:[%s6689_s6] sm:$0xff] }
 0x4fb   :  { %v5857_v53 = vsel %vm1142_vm8, %v1225_v49, %v1224_v3  ;;  %v1241_v8 = vsel %vm1139_vm9, %v5789_v35, %v1240_v13  ;;  %v1253_v21 = vsel %vm1130_vm5, %v1252_v18, %v1251_v43  ;;  %v1126_v23 = vrot.slane %v5727_v14, 6 }
 0x4fc   :  { %v5866_v27 = vsel %vm1142_vm8, %v1242_v1, %v1241_v8  ;;  %v1255_v34 = vsel %vm1133_vm7, %v1254_v54, %v1253_v21  ;;  %v1132_v58 = vrot.slane %v5760_v61, 4  ;;  %v1135_v37 = vrot.slane %v5752_v31, 3 }
 0x4fd   :  { %v1257_v30 = vsel %vm1136_vm6, %v1256_v42, %v1255_v34  ;;  %v1128_v7 = vsel %vm1127_vm4, %v1126_v23, %v5714_v59  ;;  %v1138_v40 = vrot.slane %v5789_v35, 2  ;;  %v1141_v52 = vrot.slane %v5780_v48, 1 }
 0x4fe   :  { %v1259_v18 = vsel %vm1139_vm9, %v1258_v20, %v1257_v30  ;;  %v1131_v14 = vsel %vm1130_vm5, %v1129_v19, %v1128_v7  ;;  %v1911_v19 = vld [vmem:[%s6689_s6 + $0x18] sm:$0xff]  ;;  %v1915_v7 = vrot.slane %v5417_v39, %v5402_v28 }
 0x4ff   :  { %v5882_v61 = vsel %vm1142_vm8, %v5780_v48, %v1259_v18  ;;  %v1134_v31 = vsel %vm1133_vm7, %v1132_v58, %v1131_v14  ;;  %4900 = vmatprep.subr.mxu0 %v1911_v19  ;;  %v1910_v48 = vld [vmem:[%s6689_s6 + $0x10] sm:$0xff] }
 0x500   :  { %v1137_v32 = vsel %vm1136_vm6, %v1135_v37, %v1134_v31  ;;  %4901 = vmatpush3.msra.mxu0 %v1911_v19 }
 0x501   :  { %v1140_v59 = vsel %vm1139_vm9, %v1138_v40, %v1137_v32  ;;  %4902 = vmatprep.subr.mxu0 %v1910_v48 }
 0x502   :  { %v5888_v35 = vsel %vm1142_vm8, %v1141_v52, %v1140_v59  ;;  %4903 = vmatpush3.msra.mxu0 %v1910_v48 }
 0x503   :  { %4904 = vmatprep.subr.mxu0 %v1909_v50 }
 0x504   :  { %4905 = vmatpush3.msra.mxu0 %v1909_v50 }
 0x505   :  { %4906 = vmatprep.subr.mxu0 %v1908_v47 }
 0x506   :  { %4907 = vmatpush3.msra.mxu0 %v1908_v47 }
 0x555   :  { %v1349_v46 = vpop.f32.mrf.mxu0 }
 0x557   :  { %v4864_v10 = vpop.f32.mrf.mxu0 }
 0x56d   :  { %v1424_v11 = vpop.f32.mrf.mxu1 }
 0x56f   :  { %v4869_v24 = vpop.f32.mrf.mxu1 }
 0x5a5   :  { %v1574_v6 = vpop.f32.mrf.mxu1 }
 0x5a6   :  { %1882 = vrot.lane.b32.xlu0 %v1574_v6, %s5290_s19 }
 0x5a7   :  { %v4879_v49 = vpop.f32.mrf.mxu1 }
 0x5a8   :  { %v2039_v49 = vld [vmem:[%s6690_s7 + $0x10] sm:$0xff] }
 0x5a9   :  { %v1499_v51 = vpop.f32.mrf.mxu0 }
 0x5aa   :  { %1880 = vrot.lane.b32.xlu1 %v1499_v51, %s5290_s19  ;;  %v2038_v51 = vld [vmem:[%s6690_s7 + $0x8] sm:$0xff] }
 0x5ab   :  { %v4874_v56 = vpop.f32.mrf.mxu0 }
 0x5ac   :  { %v2037_v56 = vld [vmem:[%s6690_s7] sm:$0xff] }
 0x5ad   :  { %v1724_v9 = vpop.f32.mrf.mxu1 }
 0x5ae   :  { %v1649_v57 = vpop.f32.mrf.mxu0  ;;  %1890 = vrot.lane.b32.xlu0 %v1724_v9, %s5291_s22 }
 0x5af   :  { %1888 = vrot.lane.b32.xlu1 %v1649_v57, %s5291_s22  ;;  %v4889_v16 = vpop.f32.mrf.mxu1 }
 0x5b0   :  { %v4884_v1 = vpop.f32.mrf.mxu0 }
 0x5b1   :  { %v1874_v33 = vpop.f32.mrf.mxu1 }
 0x5b2   :  { %v1799_v45 = vpop.f32.mrf.mxu0  ;;  %1898 = vrot.lane.b32.xlu0 %v1874_v33, %s5292_s27 }
 0x5b3   :  { %1896 = vrot.lane.b32.xlu1 %v1799_v45, %s5292_s27  ;;  %v4899_v17 = vpop.f32.mrf.mxu1 }
 0x5b4   :  { %v4894_v54 = vpop.f32.mrf.mxu0  ;;  %v5937_v17 = vsub.s32 2, %v5393_v25 }
 0x618   :  { %v1883_v42 = vpop.permute.xlu0 %1882 }
 0x619   :  { %v1903_v20 = vsel %vm241_vm2, %v1424_v11, %v1883_v42  ;;  %v5942_v42 = vld [vmem:[%s6687_s4] sm:$0xff] }
 0x61c   :  { %v1881_v3 = vpop.permute.xlu1 %1880 }
 0x61d   :  { %v1902_v8 = vsel %vm241_vm2, %v1349_v46, %v1881_v3  ;;  %v2028_v3 = vrot.slane %v5942_v42, %v5937_v17 }
 0x620   :  { %v1891_v13 = vpop.permute.xlu0 %1890 }
 0x621   :  { %v1889_v43 = vpop.permute.xlu1 %1888  ;;  %v1905_v21 = vsel %vm1265_vm10, %v1903_v20, %v1891_v13  ;;  %v5947_v13 = vsub.s32 3, %v5393_v25 }
 0x622   :  { %v1904_v34 = vsel %vm1265_vm10, %v1902_v8, %v1889_v43 }
 0x624   :  { %v1899_v23 = vpop.permute.xlu0 %1898 }
 0x625   :  { %v1897_v58 = vpop.permute.xlu1 %1896  ;;  %v1907_v37 = vsel %vm1267_vm11, %v1905_v21, %v1899_v23  ;;  %v2034_v23 = vrot.slane %v5942_v42, %v5947_v13 }
 0x626   :  { %v1906_v30 = vsel %vm1267_vm11, %v1904_v34, %v1897_v58 }
 0x627   :  { %4908 = vmatprep.mubr.msk.f32.mxu0 %vm44_vm0, %v1906_v30  ;;  %v2151_v30 = vld [vmem:[%s6691_s8 + $0x38] sm:$0xff] }
 0x628   :  { %4909 = vmatmul.mubr.msk.f32.vlgmr.msra.gmra.mxu0 %vm44_vm0, %v1907_v37  ;;  %4922 = vmatprep.subr.mxu0 %v2151_v30 }
 0x629   :  { %4923 = vmatpush3.msra.mxu0 %v2151_v30 }
 0x6e8   :  { %v4910_v40 = vpop.f32.mrf.mxu0 }
 0x6e9   :  { %v1994_v18 = vadd.f32 %v4910_v40, %v1915_v7  ;;  %v2149_v40 = vld [vmem:[%s6691_s8 + $0x28] sm:$0xff] }
 0x6ea   :  { %v1988_v14 = vpop.f32.mrf.mxu0 }
 0x6eb   :  { %v1989_v52 = vadd.f32 %v1988_v14, %v1915_v7  ;;  %v1998_v31 = vadd.f32 %v1994_v18, %v5410_v38  ;;  %v2150_v7 = vld [vmem:[%s6691_s8 + $0x30] sm:$0xff]  ;;  %v2148_v18 = vld [vmem:[%s6691_s8 + $0x20] sm:$0xff]  ;;  %v2147_v14 = vld [vmem:[%s6691_s8 + $0x18] sm:$0xff] }
 0x6ec   :  { %4924 = vmatprep.subr.mxu0 %v2150_v7 }
 0x6ed   :  { %v2002_v32 = vsel %vm44_vm0, %v1998_v31, 0.0  ;;  %v1997_v59 = vadd.f32 %v1989_v52, %v5406_v36  ;;  %v2040_v36 = vld [vmem:[%s6690_s7 + $0x18] sm:$0xff]  ;;  %4925 = vmatpush3.msra.mxu0 %v2150_v7  ;;  %v2146_v52 = vld [vmem:[%s6691_s8 + $0x10] sm:$0xff] }
 0x6ee   :  { %2003 = vadd.xlane.f32.xlu0 %v2002_v32  ;;  %4911 = vmatprep.subr.mxu1 %v2040_v36  ;;  %v2144_v32 = vld [vmem:[%s6691_s8] sm:$0xff] }
 0x6ef   :  { %v1999_v46 = vsel %vm44_vm0, %v1997_v59, 0.0  ;;  %4912 = vmatpush3.msra.mxu1 %v2040_v36  ;;  %4926 = vmatprep.subr.mxu0 %v2149_v40 }
 0x6f0   :  { %2000 = vadd.xlane.f32.xlu1 %v1999_v46  ;;  %4913 = vmatprep.subr.mxu1 %v2039_v49 }
 0x6f1   :  { %4914 = vmatpush3.msra.mxu1 %v2039_v49  ;;  %4927 = vmatpush3.msra.mxu0 %v2149_v40 }
 0x6f2   :  { %4915 = vmatprep.subr.mxu1 %v2038_v51  ;;  %4928 = vmatprep.subr.mxu0 %v2148_v18 }
 0x6f3   :  { %4916 = vmatpush3.msra.mxu1 %v2038_v51  ;;  %4929 = vmatpush3.msra.mxu0 %v2148_v18 }
 0x6f4   :  { %4917 = vmatprep.subr.mxu1 %v2037_v56  ;;  %4930 = vmatprep.subr.mxu0 %v2147_v14 }
 0x6f5   :  { %4918 = vmatpush3.msra.mxu1 %v2037_v56  ;;  %4931 = vmatpush3.msra.mxu0 %v2147_v14 }
 0x6f6   :  { %4932 = vmatprep.subr.mxu0 %v2146_v52 }
 0x6f7   :  { %4933 = vmatpush3.msra.mxu0 %v2146_v52 }
 0x777   :  { %v2004_v10 = vpop.xlane.xlu0 %2003 }
 0x778   :  { %v2006_v11 = vmul.f32 0.03125, %v2004_v10 }
 0x779   :  { %v2001_v24 = vpop.xlane.xlu1 %2000 }
 0x77a   :  { %v2008_v19 = vsub.f32 %v1998_v31, %v2006_v11  ;;  %v2005_v48 = vmul.f32 0.03125, %v2001_v24  ;;  %v2145_v31 = vld [vmem:[%s6691_s8 + $0x8] sm:$0xff] }
 0x77b   :  { %4934 = vmatprep.subr.mxu0 %v2145_v31 }
 0x77c   :  { %v2007_v39 = vsub.f32 %v1997_v59, %v2005_v48  ;;  %v2010_v50 = vmul.f32 %v2008_v19, %v2008_v19  ;;  %4935 = vmatpush3.msra.mxu0 %v2145_v31  ;;  %v2043_v59 = vsub.s32 4, %v5393_v25 }
 0x77d   :  { %4936 = vmatprep.subr.mxu0 %v2144_v32 }
 0x77e   :  { %v2014_v6 = vsel %vm44_vm0, %v2010_v50, 0.0  ;;  %v2009_v47 = vmul.f32 %v2007_v39, %v2007_v39  ;;  %4937 = vmatpush3.msra.mxu0 %v2144_v32  ;;  %v2044_v46 = vrot.slane %v5942_v42, %v2043_v59 }
 0x77f   :  { %2015 = vadd.xlane.f32.xlu1 %v2014_v6  ;;  %4962 = vmatprep.subr.mxu0 %v5281_v41 }
 0x780   :  { %v2011_v38 = vsel %vm44_vm0, %v2009_v47, 0.0 }
 0x781   :  { %2012 = vadd.xlane.f32.xlu0 %v2011_v38 }
 0x808   :  { %v2016_v9 = vpop.xlane.xlu1 %2015 }
 0x809   :  { %v2018_v57 = vmul.f32 0.03125, %v2016_v9 }
 0x80a   :  { %v2013_v16 = vpop.xlane.xlu0 %2012 }
 0x80b   :  { %v2020_v1 = vadd.f32 1e-12, %v2018_v57  ;;  %v2017_v33 = vmul.f32 0.03125, %v2013_v16 }
 0x80d   :  { %5156 = vrsqrt.f32 %v2020_v1  ;;  %v2019_v45 = vadd.f32 1e-12, %v2017_v33 }
 0x80f   :  { %5158 = vrsqrt.f32 %v2019_v45 }
 0x81a   :  { %v5157_v54 = vpop.eup %5156 }
 0x81b   :  { %v2024_v43 = vmul.f32 %v5157_v54, %v2008_v19 }
 0x81c   :  { %v5159_v20 = vpop.eup %5158 }
 0x81d   :  { %v2023_v8 = vmul.f32 %v5159_v20, %v2007_v39  ;;  %v2030_v21 = vmul.f32 %v2028_v3, %v2024_v43  ;;  %v2154_v43 = vsub.s32 5, %v5393_v25 }
 0x81f   :  { %v2029_v34 = vmul.f32 %v2028_v3, %v2023_v8  ;;  %v5953_v37 = vadd.f32 %v2034_v23, %v2030_v21  ;;  %v2155_v20 = vrot.slane %v5942_v42, %v2154_v43 }
 0x821   :  { %v5951_v58 = vadd.f32 %v2034_v23, %v2029_v34 }
 0x823   :  { %4919 = vmatprep.mubr.msk.f32.mxu1 %vm44_vm0, %v5951_v58 }
 0x824   :  { %4920 = vmatmul.mubr.msk.f32.vlgmr.msra.gmra.mxu1 %vm44_vm0, %v5953_v37 }
 0x8e4   :  { %v4921_v10 = vpop.f32.mrf.mxu1 }
 0x8e5   :  { %v2123_v11 = vadd.f32 %v4921_v10, %v2044_v46 }
 0x8e6   :  { %v2117_v24 = vpop.f32.mrf.mxu1 }
 0x8e7   :  { %v2129_v19 = vmul.f32 0.044715, %v2123_v11  ;;  %v2118_v48 = vadd.f32 %v2117_v24, %v2044_v46  ;;  %v2127_v45 = vmul.f32 0.5, %v2123_v11 }
 0x8e9   :  { %v2131_v39 = vmul.f32 %v2129_v19, %v2123_v11  ;;  %v2128_v50 = vmul.f32 0.044715, %v2118_v48  ;;  %v2126_v1 = vmul.f32 0.5, %v2118_v48 }
 0x8eb   :  { %v2133_v6 = vmul.f32 %v2131_v39, %v2123_v11  ;;  %v2130_v47 = vmul.f32 %v2128_v50, %v2118_v48  ;;  %v4624_v39 = vld [vmem:[%s6688_s5 + $0x28] sm:$0xff]  ;;  %v4623_v50 = vld [vmem:[%s6688_s5 + $0x20] sm:$0xff] }
 0x8ed   :  { %v2135_v38 = vadd.f32 %v2133_v6, %v2123_v11  ;;  %v2132_v36 = vmul.f32 %v2130_v47, %v2118_v48 }
 0x8ef   :  { %v2137_v49 = vmul.f32 0.7978846, %v2135_v38  ;;  %v2134_v51 = vadd.f32 %v2132_v36, %v2118_v48  ;;  %v4625_v48 = vld [vmem:[%s6688_s5 + $0x30] sm:$0xff] }
 0x8f1   :  { %5160 = vtanh.f32 %v2137_v49  ;;  %v2136_v56 = vmul.f32 0.7978846, %v2134_v51 }
 0x8f3   :  { %5162 = vtanh.f32 %v2136_v56  ;;  %v2267_v56 = vsub.s32 6, %v5393_v25 }
 0x8fe   :  { %v5161_v9 = vpop.eup %5160 }
 0x8ff   :  { %v2141_v16 = vadd.f32 1.0, %v5161_v9 }
 0x900   :  { %v5163_v57 = vpop.eup %5162 }
 0x901   :  { %v2140_v33 = vadd.f32 1.0, %v5163_v57  ;;  %v2143_v3 = vmul.f32 %v2141_v16, %v2127_v45  ;;  %v2268_v57 = vrot.slane %v5942_v42, %v2267_v56  ;;  %v2273_v16 = vsub.s32 7, %v5393_v25 }
 0x903   :  { %v2142_v54 = vmul.f32 %v2140_v33, %v2126_v1 }
 0x905   :  { %4938 = vmatprep.mubr.msk.f32.mxu0 %vm1276_vm12, %v2142_v54 }
 0x906   :  { %4939 = vmatmul.mubr.msk.f32.vlgmr.msra.gmra.mxu0 %vm1276_vm12, %v2143_v3  ;;  %v2274_v3 = vrot.slane %v5942_v42, %v2273_v16 }
 0x907   :  { %4964 = vmatprep.mubr.msk.f32.mxu0 %vm5282_vm1, %v5281_v41 }
 0x9c6   :  { %v4940_v8 = vpop.f32.mrf.mxu0 }
 0x9c7   :  { %v2234_v21 = vadd.f32 %v4940_v8, %v2155_v20 }
 0x9c8   :  { %v2228_v23 = vpop.f32.mrf.mxu0 }
 0x9c9   :  { %v2229_v34 = vadd.f32 %v2228_v23, %v2155_v20  ;;  %v2238_v30 = vadd.f32 %v2234_v21, %v5953_v37  ;;  %v6036_v23 = vld [vmem:[%s6687_s4 + $0x8] sm:$0xff] }
 0x9ca   :  { %v2287_v42 = vrot.slane %v6036_v23, %v5396_v26 }
 0x9cb   :  { %v2242_v7 = vsel %vm44_vm0, %v2238_v30, 0.0  ;;  %v2237_v40 = vadd.f32 %v2229_v34, %v5951_v58  ;;  %v4626_v58 = vld [vmem:[%s6688_s5 + $0x38] sm:$0xff] }
 0x9cc   :  { %2243 = vadd.xlane.f32.xlu1 %v2242_v7  ;;  %4941 = vmatprep.subr.mxu1 %v4626_v58 }
 0x9cd   :  { %v2239_v18 = vsel %vm44_vm0, %v2237_v40, 0.0  ;;  %4942 = vmatpush3.msra.mxu1 %v4626_v58 }
 0x9ce   :  { %2240 = vadd.xlane.f32.xlu0 %v2239_v18  ;;  %4943 = vmatprep.subr.mxu1 %v4625_v48  ;;  %v6063_v18 = vld [vmem:[%s6685_s2 + $0x8] sm:$0xff]  ;;  %s5295_s2 = smov 48  }
 0x9cf   :  { %4944 = vmatpush3.msra.mxu1 %v4625_v48 }
 0x9d0   :  { %4945 = vmatprep.subr.mxu1 %v4624_v39 }
 0x9d1   :  { %4946 = vmatpush3.msra.mxu1 %v4624_v39 }
 0x9d2   :  { %4947 = vmatprep.subr.mxu1 %v4623_v50 }
 0x9d3   :  { %4948 = vmatpush3.msra.mxu1 %v4623_v50 }
 0x9d4   :  { %4952 = vmatprep.subr.mxu1 %v5281_v41 }
 0xa55   :  { %v2244_v14 = vpop.xlane.xlu1 %2243 }
 0xa56   :  { %v2246_v52 = vmul.f32 0.03125, %v2244_v14  ;;  %v3105_v14 = vrot.slane %v6063_v18, %v5520_v63 }
 0xa57   :  { %v2241_v31 = vpop.xlane.xlu0 %2240 }
 0xa58   :  { %v2248_v32 = vsub.f32 %v2238_v30, %v2246_v52  ;;  %v2245_v46 = vmul.f32 0.03125, %v2241_v31 }
 0xa5a   :  { %v2247_v10 = vsub.f32 %v2237_v40, %v2245_v46  ;;  %v2250_v11 = vmul.f32 %v2248_v32, %v2248_v32 }
 0xa5c   :  { %v2254_v24 = vsel %vm44_vm0, %v2250_v11, 0.0  ;;  %v2249_v19 = vmul.f32 %v2247_v10, %v2247_v10 }
 0xa5d   :  { %2255 = vadd.xlane.f32.xlu1 %v2254_v24  ;;  %v6087_v24 = vrot.slane %v3105_v14, %v5520_v63 }
 0xa5e   :  { %v2251_v37 = vsel %vm44_vm0, %v2249_v19, 0.0 }
 0xa5f   :  { %2252 = vadd.xlane.f32.xlu0 %v2251_v37  ;;  %v3150_v48 = vrot.slane %v6087_v24, %v5396_v26 }
 0xae6   :  { %v2256_v6 = vpop.xlane.xlu1 %2255 }
 0xae7   :  { %v2258_v47 = vmul.f32 0.03125, %v2256_v6 }
 0xae8   :  { %v2253_v38 = vpop.xlane.xlu0 %2252 }
 0xae9   :  { %v2260_v36 = vadd.f32 1e-12, %v2258_v47  ;;  %v2257_v49 = vmul.f32 0.03125, %v2253_v38 }
 0xaeb   :  { %5164 = vrsqrt.f32 %v2260_v36  ;;  %v2259_v51 = vadd.f32 1e-12, %v2257_v49 }
 0xaed   :  { %5166 = vrsqrt.f32 %v2259_v51 }
 0xaf8   :  { %v5165_v9 = vpop.eup %5164 }
 0xaf9   :  { %v2264_v1 = vmul.f32 %v5165_v9, %v2248_v32  ;;  %v3113_v32 = vcombine.high %v3105_v14, %v3105_v14 }
 0xafa   :  { %v5167_v33 = vpop.eup %5166 }
 0xafb   :  { %v2263_v45 = vmul.f32 %v5167_v33, %v2247_v10  ;;  %v2270_v54 = vmul.f32 %v2268_v57, %v2264_v1  ;;  %v6084_v11 = vrot.slane %v3113_v32, %v5520_v63 }
 0xafd   :  { %v2269_v20 = vmul.f32 %v2268_v57, %v2263_v45  ;;  %v6025_v21 = vadd.f32 %v2274_v3, %v2270_v54  ;;  %v3154_v58 = vrot.slane %v6084_v11, %v5396_v26 }
 0xaff   :  { %v6023_v8 = vadd.f32 %v2274_v3, %v2269_v20 }
 0xb01   :  { %4949 = vmatprep.mubr.msk.f32.mxu1 %vm44_vm0, %v6023_v8 }
 0xb02   :  { %4950 = vmatmul.mubr.msk.f32.vlgmr.msra.gmra.mxu1 %vm44_vm0, %v6025_v21 }
 0xb03   :  { %4954 = vmatprep.mubr.msk.f32.mxu1 %vm5282_vm1, %v5281_v41 }
 0xbc2   :  { %v4951_v34 = vpop.f32.mrf.mxu1 }
 0xbc3   :  { %v6040_v30 = vadd.f32 %v4951_v34, %v2287_v42 }
 0xbc4   :  { %v2360_v7 = vpop.f32.mrf.mxu1 }
 0xbc5   :  { %v6042_v40 = vadd.f32 %v2360_v7, %v2287_v42  ;;  %2373 = vrot.lane.b32.xlu1 %v6040_v30, %s5283_s23  ;;  %v3143_v7 = vcombine.high %v6087_v24, %v6087_v24 }
 0xbc7   :  { %2371 = vrot.lane.b32.xlu0 %v6042_v40, %s5283_s23 }
 0xbc9   :  { %2375 = vrot.lane.b32.xlu1 %v6042_v40, %s5284_s24 }
 0xbcb   :  { %2377 = vrot.lane.b32.xlu0 %v6040_v30, %s5284_s24  ;;  %s5296_s24 = smov 56  }
 0xbcd   :  { %2379 = vrot.lane.b32.xlu1 %v6042_v40, %s5285_s25 }
 0xbcf   :  { %2381 = vrot.lane.b32.xlu0 %v6040_v30, %s5285_s25 }
 0xbd1   :  { %2383 = vrot.lane.b32.xlu1 %v6042_v40, %s5286_s26 }
 0xbd3   :  { %2459 = vrot.lane.b32.xlu0 %v6040_v30, %s5286_s26 }
 0xc37   :  { %v6067_v52 = vpop.permute.xlu1 %2373 }
 0xc38   :  { %2611 = vrot.lane.b32.xlu0 %v6067_v52, %s5286_s26 }
 0xc39   :  { %v6071_v31 = vpop.permute.xlu0 %2371 }
 0xc3a   :  { %2535 = vrot.lane.b32.xlu1 %v6071_v31, %s5286_s26 }
 0xc3b   :  { %v6075_v46 = vpop.permute.xlu1 %2375 }
 0xc3d   :  { %v6077_v10 = vpop.permute.xlu0 %2377 }
 0xc3e   :  { %2687 = vrot.lane.b32.xlu1 %v6075_v46, %s5286_s26  ;;  %2763 = vrot.lane.b32.xlu0 %v6077_v10, %s5286_s26 }
 0xc3f   :  { %v6089_v19 = vpop.permute.xlu1 %2379 }
 0xc41   :  { %v6091_v37 = vpop.permute.xlu0 %2381 }
 0xc42   :  { %2839 = vrot.lane.b32.xlu1 %v6089_v19, %s5286_s26  ;;  %2915 = vrot.lane.b32.xlu0 %v6091_v37, %s5286_s26 }
 0xc43   :  { %v2384_v39 = vpop.permute.xlu1 %2383 }
 0xc44   :  { %4953 = vmatpush3.xpose.msk.msra.mxu1 %vm241_vm2, %v2384_v39 }
 0xc45   :  { %4957 = vmatprep.subr.mxu1 %v5281_v41  ;;  %v2460_v50 = vpop.permute.xlu0 %2459 }
 0xc46   :  { %3184 = vperm.xlu1 %5116, %v3154_v58   ;;  %3180 = vperm.xlu0 %5115, %v3150_v48  }
 0xc47   :  { %4955 = vmatmul.mubr.msk.f32.vlgmr.msra.gmra.mxu1 %vm241_vm2, %v6042_v40 }
 0xc48   :  { %4958 = vmatpush3.xpose.msk.msra.mxu1 %vm241_vm2, %v2460_v50  ;;  %4959 = vmatprep.mubr.msk.f32.mxu1 %vm5282_vm1, %v5281_v41 }
 0xc49   :  { %4967 = vmatprep.subr.mxu1 %v5281_v41 }
 0xc4b   :  { %4960 = vmatmul.mubr.msk.f32.vlgmr.msra.gmra.mxu1 %vm241_vm2, %v6040_v30 }
 0xc4c   :  { %4969 = vmatprep.mubr.msk.f32.mxu1 %vm5282_vm1, %v5281_v41 }
 0xcaa   :  { %v2612_v6 = vpop.permute.xlu0 %2611 }
 0xcab   :  { %4968 = vmatpush3.xpose.msk.msra.mxu1 %vm241_vm2, %v2612_v6 }
 0xcac   :  { %v2536_v47 = vpop.permute.xlu1 %2535  ;;  %4977 = vmatprep.subr.mxu1 %v5281_v41 }
 0xcad   :  { %4963 = vmatpush3.xpose.msk.msra.mxu0 %vm241_vm2, %v2536_v47 }
 0xcae   :  { %4970 = vmatmul.mubr.msk.f32.vlgmr.msra.gmra.mxu1 %vm241_vm2, %v6067_v52  ;;  %4972 = vmatprep.subr.mxu0 %v5281_v41 }
 0xcaf   :  { %4979 = vmatprep.mubr.msk.f32.mxu1 %vm5282_vm1, %v5281_v41 }
 0xcb0   :  { %4965 = vmatmul.mubr.msk.f32.vlgmr.msra.gmra.mxu0 %vm241_vm2, %v6071_v31  ;;  %v2688_v38 = vpop.permute.xlu1 %2687  ;;  %v2764_v36 = vpop.permute.xlu0 %2763 }
 0xcb1   :  { %4973 = vmatpush3.xpose.msk.msra.mxu0 %vm241_vm2, %v2688_v38  ;;  %4978 = vmatpush3.xpose.msk.msra.mxu1 %vm241_vm2, %v2764_v36 }
 0xcb2   :  { %4974 = vmatprep.mubr.msk.f32.mxu0 %vm5282_vm1, %v5281_v41  ;;  %4982 = vmatprep.subr.mxu0 %v5281_v41 }
 0xcb3   :  { %4987 = vmatprep.subr.mxu1 %v5281_v41 }
 0xcb4   :  { %4975 = vmatmul.mubr.msk.f32.vlgmr.msra.gmra.mxu0 %vm241_vm2, %v6075_v46  ;;  %v2840_v49 = vpop.permute.xlu1 %2839  ;;  %4980 = vmatmul.mubr.msk.f32.vlgmr.msra.gmra.mxu1 %vm241_vm2, %v6077_v10  ;;  %v2916_v51 = vpop.permute.xlu0 %2915 }
 0xcb5   :  { %4983 = vmatpush3.xpose.msk.msra.mxu0 %vm241_vm2, %v2840_v49  ;;  %4988 = vmatpush3.xpose.msk.msra.mxu1 %vm241_vm2, %v2916_v51 }
 0xcb6   :  { %4984 = vmatprep.mubr.msk.f32.mxu0 %vm5282_vm1, %v5281_v41  ;;  %4989 = vmatprep.mubr.msk.f32.mxu1 %vm5282_vm1, %v5281_v41 }
 0xcb7   :  { %4992 = vmatprep.subr.mxu0 %v5281_v41  ;;  %4997 = vmatprep.subr.mxu1 %v5281_v41 }
 0xcb8   :  { %4985 = vmatmul.mubr.msk.f32.vlgmr.msra.gmra.mxu0 %vm241_vm2, %v6089_v19  ;;  %4990 = vmatmul.mubr.msk.f32.vlgmr.msra.gmra.mxu1 %vm241_vm2, %v6091_v37 }
 0xcb9   :  { %4999 = vmatprep.mubr.msk.f32.mxu1 %vm5282_vm1, %v5281_v41  ;;  %4994 = vmatprep.mubr.msk.f32.mxu0 %vm5282_vm1, %v5281_v41 }
 0xd07   :  { %v2455_v9 = vpop.f32.mrf.mxu1 }
 0xd08   :  { %v2991_v57 = vmul.f32 0.35355338, %v2455_v9 }
 0xd09   :  { %v4956_v1 = vpop.f32.mrf.mxu1 }
 0xd0a   :  { %v6150_v33 = vadd.f32 %v2991_v57, %v5528_v5  ;;  %v3158_v5 = vrot.slane %v3143_v7, %v5396_v26 }
 0xd0b   :  { %v2531_v45 = vpop.f32.mrf.mxu1 }
 0xd0c   :  { %v2992_v54 = vmul.f32 0.35355338, %v2531_v45  ;;  %v3007_v3 = vsel %vm241_vm2, %v6150_v33, -inf }
 0xd0d   :  { %3008 = vmax.xlane.f32.xlu1 %v3007_v3  ;;  %v4961_v20 = vpop.f32.mrf.mxu1 }
 0xd0e   :  { %v6155_v42 = vadd.f32 %v2992_v54, %v5537_v12 }
 0xd10   :  { %v3010_v34 = vsel %vm241_vm2, %v6155_v42, -inf }
 0xd11   :  { %3011 = vmax.xlane.f32.xlu0 %v3010_v34 }
 0xd1e   :  { %3188 = vperm.xlu1 %5116, %v3158_v5  }
 0xd6e   :  { %v2683_v14 = vpop.f32.mrf.mxu1 }
 0xd6f   :  { %v2994_v32 = vmul.f32 0.35355338, %v2683_v14 }
 0xd70   :  { %v2607_v58 = vpop.f32.mrf.mxu0  ;;  %v4971_v48 = vpop.f32.mrf.mxu1 }
 0xd71   :  { %v2993_v39 = vmul.f32 0.35355338, %v2607_v58  ;;  %v6163_v50 = vadd.f32 %v2994_v32, %v5546_v22  ;;  %v3098_v58 = vcombine.high %v6063_v18, %v6063_v18 }
 0xd72   :  { %v4966_v12 = vpop.f32.mrf.mxu0 }
 0xd73   :  { %v3016_v6 = vsel %vm241_vm2, %v6163_v50, -inf  ;;  %v6168_v47 = vadd.f32 %v2993_v39, %v5549_v29  ;;  %v3112_v48 = vrot.slane %v3098_v58, %v5520_v63 }
 0xd74   :  { %v2759_v38 = vpop.f32.mrf.mxu0  ;;  %3017 = vmax.xlane.f32.xlu1 %v3016_v6  ;;  %v2835_v24 = vpop.f32.mrf.mxu1 }
 0xd75   :  { %v2995_v36 = vmul.f32 0.35355338, %v2759_v38  ;;  %v2996_v49 = vmul.f32 0.35355338, %v2835_v24  ;;  %v3013_v51 = vsel %vm241_vm2, %v6168_v47, -inf  ;;  %v3128_v39 = vrot.slane %v3112_v48, %v5520_v63 }
 0xd76   :  { %v4976_v9 = vpop.f32.mrf.mxu0  ;;  %3014 = vmax.xlane.f32.xlu0 %v3013_v51  ;;  %v4981_v57 = vpop.f32.mrf.mxu1  ;;  %v3114_v6 = vcombine.high %v3112_v48, %v3112_v48 }
 0xd77   :  { %v6173_v22 = vadd.f32 %v2995_v36, %v5562_v44  ;;  %v6176_v1 = vadd.f32 %v2996_v49, %v5565_v55  ;;  %v3144_v38 = vcombine.high %v3128_v39, %v3128_v39  ;;  %v6214_v36 = vpop.permute.xlu0 %3180 }
 0xd78   :  { %v2911_v45 = vpop.f32.mrf.mxu0  ;;  %v2987_v29 = vpop.f32.mrf.mxu1  ;;  %v3142_v18 = vrot.slane %v3114_v6, %v5520_v63 }
 0xd79   :  { %v2997_v54 = vmul.f32 0.35355338, %v2911_v45  ;;  %v2998_v3 = vmul.f32 0.35355338, %v2987_v29  ;;  %v3019_v20 = vsel %vm241_vm2, %v6173_v22, -inf  ;;  %v3022_v34 = vsel %vm241_vm2, %v6176_v1, -inf }
 0xd7a   :  { %v4986_v7 = vpop.f32.mrf.mxu0  ;;  %3020 = vmax.xlane.f32.xlu0 %v3019_v20  ;;  %3023 = vmax.xlane.f32.xlu1 %v3022_v34  ;;  %v4991_v5 = vpop.f32.mrf.mxu1  ;;  %v3174_v24 = vrot.slane %v3144_v38, %v5396_v26 }
 0xd7b   :  { %v6183_v44 = vadd.f32 %v2997_v54, %v5573_v62  ;;  %v6186_v55 = vadd.f32 %v2998_v3, %v5579_v4  ;;  %v3145_v62 = vcombine.high %v6084_v11, %v6084_v11  ;;  %v3166_v4 = vrot.slane %v3128_v39, %v5396_v26 }
 0xd7c   :  { %v3146_v11 = vcombine.high %v3142_v18, %v3142_v18 }
 0xd7d   :  { %v3025_v14 = vsel %vm241_vm2, %v6183_v44, -inf  ;;  %v3028_v32 = vsel %vm241_vm2, %v6186_v55, -inf  ;;  %v3162_v12 = vrot.slane %v3145_v62, %v5396_v26 }
 0xd7e   :  { %3026 = vmax.xlane.f32.xlu0 %v3025_v14  ;;  %3029 = vmax.xlane.f32.xlu1 %v3028_v32  ;;  %v3178_v63 = vrot.slane %v3146_v11, %v5396_v26 }
 0xd8f   :  { %3370 = vrot.lane.b32.xlu1 %v6042_v40, %s5289_s29  ;;  %v3170_v40 = vrot.slane %v3142_v18, %v5396_v26 }
 0xd93   :  { %3196 = vperm.xlu1 %5116, %v3166_v4  }
 0xd94   :  { %3192 = vperm.xlu0 %5115, %v3162_v12  }
 0xd97   :  { %3520 = vrot.lane.b32.xlu1 %v6071_v31, %s5289_s29  ;;  %v6216_v31 = vpop.permute.xlu1 %3184 }
 0xd98   :  { %3445 = vrot.lane.b32.xlu0 %v6040_v30, %s5289_s29 }
 0xd9a   :  { %v3012_v49 = vpop.xlane.xlu0 %3011 }
 0xd9b   :  { %3204 = vperm.xlu1 %5116, %v3174_v24   ;;  %v3032_v30 = vsub.f32 %v6155_v42, %v3012_v49  ;;  %v3009_v51 = vpop.xlane.xlu1 %3008 }
 0xd9c   :  { %3200 = vperm.xlu0 %5115, %v3170_v40   ;;  %v3031_v9 = vsub.f32 %v6150_v33, %v3009_v51 }
 0xd9e   :  { %v3039_v57 = vmul.f32 1.442695, %v3031_v9 }
 0xd9f   :  { %3670 = vrot.lane.b32.xlu1 %v6075_v46, %s5289_s29  ;;  %v3041_v46 = vmul.f32 1.442695, %v3032_v30  ;;  %v6230_v42 = vpop.permute.xlu1 %3188 }
 0xda0   :  { %3595 = vrot.lane.b32.xlu0 %v6067_v52, %s5289_s29 }
 0xda1   :  { %5168 = vpow2.f32 %v3041_v46 }
 0xda2   :  { %5170 = vpow2.f32 %v3039_v57 }
 0xda4   :  { %3208 = vperm.xlu0 %5115, %v3178_v63  }
 0xda8   :  { %3745 = vrot.lane.b32.xlu0 %v6077_v10, %s5289_s29 }
 0xdae   :  { %v6222_v52 = vpop.eup %5168 }
 0xdaf   :  { %v3058_v26 = vsel %vm241_vm2, %v6222_v52, 0.0  ;;  %v6226_v45 = vpop.eup %5170 }
 0xdb0   :  { %v3055_v10 = vsel %vm241_vm2, %v6226_v45, 0.0 }
 0xdc3   :  { %3059 = vadd.xlane.f32.xlu1 %v3058_v26 }
 0xdc7   :  { %3056 = vadd.xlane.f32.xlu0 %v3055_v10 }
 0xdfd   :  { %v3018_v29 = vpop.xlane.xlu1 %3017 }
 0xdfe   :  { %v3034_v33 = vsub.f32 %v6163_v50, %v3018_v29 }
 0xdff   :  { %v3015_v54 = vpop.xlane.xlu0 %3014 }
 0xe00   :  { %v3045_v3 = vmul.f32 1.442695, %v3034_v33  ;;  %v3033_v20 = vsub.f32 %v6168_v47, %v3015_v54 }
 0xe02   :  { %5172 = vpow2.f32 %v3045_v3  ;;  %v3043_v34 = vmul.f32 1.442695, %v3033_v20 }
 0xe03   :  { %v3024_v7 = vpop.xlane.xlu1 %3023  ;;  %v3021_v5 = vpop.xlane.xlu0 %3020 }
 0xe04   :  { %5174 = vpow2.f32 %v3043_v34  ;;  %v3036_v14 = vsub.f32 %v6176_v1, %v3024_v7  ;;  %v3035_v32 = vsub.f32 %v6173_v22, %v3021_v5 }
 0xe06   :  { %v3049_v58 = vmul.f32 1.442695, %v3036_v14  ;;  %v3047_v48 = vmul.f32 1.442695, %v3035_v32 }
 0xe07   :  { %v3030_v39 = vpop.xlane.xlu1 %3029  ;;  %v3027_v62 = vpop.xlane.xlu0 %3026 }
 0xe08   :  { %5176 = vpow2.f32 %v3049_v58  ;;  %v3038_v50 = vsub.f32 %v6186_v55, %v3030_v39  ;;  %v3037_v4 = vsub.f32 %v6183_v44, %v3027_v62 }
 0xe09   :  { %5178 = vpow2.f32 %v3047_v48 }
 0xe0a   :  { %v3053_v47 = vmul.f32 1.442695, %v3038_v50  ;;  %v3051_v12 = vmul.f32 1.442695, %v3037_v4 }
 0xe0b   :  { %v3371_v6 = vpop.permute.xlu1 %3370 }
 0xe0c   :  { %5180 = vpow2.f32 %v3053_v47  ;;  %4993 = vmatpush3.msra.mxu0 %v3371_v6 }
 0xe0d   :  { %5182 = vpow2.f32 %v3051_v12  ;;  %5002 = vmatprep.subr.mxu0 %v5281_v41 }
 0xe0f   :  { %v6239_v1 = vpop.eup %5172  ;;  %v6241_v22 = vpop.permute.xlu0 %3192 }
 0xe10   :  { %v3064_v38 = vsel %vm241_vm2, %v6239_v1, 0.0  ;;  %v6270_v46 = vpop.permute.xlu1 %3196 }
 0xe11   :  { %v6245_v18 = vpop.eup %5174  ;;  %3065 = vadd.xlane.f32.xlu1 %v3064_v38 }
 0xe12   :  { %v3061_v44 = vsel %vm241_vm2, %v6245_v18, 0.0 }
 0xe13   :  { %3062 = vadd.xlane.f32.xlu0 %v3061_v44  ;;  %v3446_v55 = vpop.permute.xlu0 %3445 }
 0xe14   :  { %4998 = vmatpush3.msra.mxu1 %v3446_v55  ;;  %v3521_v26 = vpop.permute.xlu1 %3520 }
 0xe15   :  { %v6249_v24 = vpop.eup %5176  ;;  %5007 = vmatprep.subr.mxu1 %v5281_v41 }
 0xe16   :  { %v6252_v40 = vpop.eup %5178  ;;  %v3070_v11 = vsel %vm241_vm2, %v6249_v24, 0.0 }
 0xe17   :  { %3071 = vadd.xlane.f32.xlu1 %v3070_v11  ;;  %v3067_v63 = vsel %vm241_vm2, %v6252_v40, 0.0  ;;  %v6272_v57 = vpop.permute.xlu0 %3200 }
 0xe18   :  { %3068 = vadd.xlane.f32.xlu0 %v3067_v63  ;;  %v6274_v29 = vpop.permute.xlu1 %3204 }
 0xe19   :  { %v6258_v49 = vpop.eup %5180 }
 0xe1a   :  { %v6260_v30 = vpop.eup %5182  ;;  %v3076_v51 = vsel %vm241_vm2, %v6258_v49, 0.0 }
 0xe1b   :  { %3077 = vadd.xlane.f32.xlu1 %v3076_v51  ;;  %v3073_v9 = vsel %vm241_vm2, %v6260_v30, 0.0  ;;  %v3596_v10 = vpop.permute.xlu0 %3595 }
 0xe1c   :  { %3074 = vadd.xlane.f32.xlu0 %v3073_v9  ;;  %v6278_v54 = vpop.permute.xlu1 %3670 }
 0xe1f   :  { %v6276_v33 = vpop.permute.xlu0 %3208 }
 0xe23   :  { %v6280_v3 = vpop.permute.xlu0 %3745 }
 0xe2c   :  { %3820 = vrot.lane.b32.xlu1 %v6089_v19, %s5289_s29 }
 0xe32   :  { %3895 = vrot.lane.b32.xlu0 %v6091_v37, %s5289_s29 }
 0xe4c   :  { %v3060_v20 = vpop.xlane.xlu1 %3059 }
 0xe4d   :  { %5184 = vrcp.f32 %v3060_v20 }
 0xe50   :  { %v3057_v19 = vpop.xlane.xlu0 %3056 }
 0xe51   :  { %5186 = vrcp.f32 %v3057_v19 }
 0xe5a   :  { %v5185_v34 = vpop.eup %5184 }
 0xe5b   :  { %v3088_v37 = vmul.f32 %v5185_v34, %v6222_v52 }
 0xe5d   :  { %v3212_v7 = vmul.f32 %v6216_v31, %v3088_v37 }
 0xe5e   :  { %v5187_v5 = vpop.eup %5186 }
 0xe5f   :  { %v3087_v14 = vmul.f32 %v5187_v5, %v6226_v45  ;;  %5000 = vmatmul.mubr.msk.f32.vlgmr.msra.gmra.mxu1 %vm241_vm2, %v3212_v7  ;;  %v3260_v58 = vrot.slane %v3212_v7, 1  ;;  %v3277_v48 = vrot.slane %v3212_v7, 2  ;;  %v3294_v39 = vrot.slane %v3212_v7, 3 }
 0xe60   :  { %5008 = vmatpush3.msra.mxu1 %v3596_v10  ;;  %5009 = vmatprep.mubr.msk.f32.mxu1 %vm5282_vm1, %v5281_v41  ;;  %v3311_v62 = vrot.slane %v3212_v7, 4  ;;  %v3328_v52 = vrot.slane %v3212_v7, 5  ;;  %v3345_v50 = vrot.slane %v3212_v7, 6  ;;  %v3227_v31 = vrot.slane %v3212_v7, 7 }
 0xe61   :  { %v3211_v32 = vmul.f32 %v6214_v36, %v3087_v14  ;;  %5017 = vmatprep.subr.mxu1 %v5281_v41 }
 0xe63   :  { %4995 = vmatmul.mubr.msk.f32.vlgmr.msra.gmra.mxu0 %vm241_vm2, %v3211_v32  ;;  %v3242_v45 = vrot.slane %v3211_v32, 1  ;;  %v3259_v4 = vrot.slane %v3211_v32, 2  ;;  %v3276_v47 = vrot.slane %v3211_v32, 3  ;;  %v3293_v12 = vrot.slane %v3211_v32, 4 }
 0xe64   :  { %5003 = vmatpush3.msra.mxu0 %v3521_v26  ;;  %5004 = vmatprep.mubr.msk.f32.mxu0 %vm5282_vm1, %v5281_v41  ;;  %v3310_v36 = vrot.slane %v3211_v32, 5  ;;  %v3327_v6 = vrot.slane %v3211_v32, 6  ;;  %v3344_v38 = vrot.slane %v3211_v32, 7  ;;  %v6294_v44 = vsel %vm1124_vm3, %v3227_v31, %v3211_v32 }
 0xe65   :  { %5012 = vmatprep.subr.mxu0 %v5281_v41  ;;  %v3243_v55 = vsel %vm1124_vm3, %v3212_v7, %v3242_v45  ;;  %v3261_v11 = vsel %vm1124_vm3, %v3260_v58, %v3259_v4  ;;  %v3278_v63 = vsel %vm1124_vm3, %v3277_v48, %v3276_v47  ;;  %v3295_v51 = vsel %vm1124_vm3, %v3294_v39, %v3293_v12 }
 0xe66   :  { %v6302_v9 = vsel %vm1124_vm3, %v3311_v62, %v3310_v36  ;;  %v6305_v26 = vsel %vm1124_vm3, %v3328_v52, %v3327_v6  ;;  %v6308_v10 = vsel %vm1124_vm3, %v3345_v50, %v3344_v38 }
 0xe9a   :  { %v3066_v20 = vpop.xlane.xlu1 %3065 }
 0xe9b   :  { %5188 = vrcp.f32 %v3066_v20 }
 0xe9c   :  { %v3063_v19 = vpop.xlane.xlu0 %3062 }
 0xe9d   :  { %5190 = vrcp.f32 %v3063_v19 }
 0xea0   :  { %v3072_v34 = vpop.xlane.xlu1 %3071 }
 0xea1   :  { %5192 = vrcp.f32 %v3072_v34  ;;  %v3069_v37 = vpop.xlane.xlu0 %3068 }
 0xea2   :  { %5194 = vrcp.f32 %v3069_v37 }
 0xea4   :  { %v3078_v7 = vpop.xlane.xlu1 %3077 }
 0xea5   :  { %5196 = vrcp.f32 %v3078_v7  ;;  %v3075_v5 = vpop.xlane.xlu0 %3074 }
 0xea6   :  { %5198 = vrcp.f32 %v3075_v5 }
 0xea8   :  { %v5189_v14 = vpop.eup %5188 }
 0xea9   :  { %v3090_v32 = vmul.f32 %v5189_v14, %v6239_v1 }
 0xeaa   :  { %v5191_v58 = vpop.eup %5190 }
 0xeab   :  { %v6312_v48 = vmul.f32 %v6241_v22, %v3090_v32  ;;  %v3089_v39 = vmul.f32 %v5191_v58, %v6245_v18  ;;  %v3896_v58 = vpop.permute.xlu0 %3895 }
 0xead   :  { %v6316_v62 = vmul.f32 %v6230_v42, %v3089_v39  ;;  %5010 = vmatmul.mubr.msk.f32.vlgmr.msra.gmra.mxu1 %vm241_vm2, %v6312_v48  ;;  %v3246_v52 = vrot.slane %v6312_v48, 6  ;;  %v3263_v50 = vrot.slane %v6312_v48, 7  ;;  %v3298_v31 = vrot.slane %v6312_v48, 1 }
 0xeae   :  { %v5193_v45 = vpop.eup %5192  ;;  %5018 = vmatpush3.msra.mxu1 %v6280_v3  ;;  %5019 = vmatprep.mubr.msk.f32.mxu1 %vm5282_vm1, %v5281_v41  ;;  %v3315_v1 = vrot.slane %v6312_v48, 2  ;;  %v3332_v42 = vrot.slane %v6312_v48, 3  ;;  %v3349_v22 = vrot.slane %v6312_v48, 4  ;;  %v3231_v18 = vrot.slane %v6312_v48, 5 }
 0xeaf   :  { %v5195_v4 = vpop.eup %5194  ;;  %v3092_v47 = vmul.f32 %v5193_v45, %v6249_v24  ;;  %5005 = vmatmul.mubr.msk.f32.vlgmr.msra.gmra.mxu0 %vm241_vm2, %v6316_v62  ;;  %5027 = vmatprep.subr.mxu1 %v5281_v41  ;;  %v3244_v3 = vrot.slane %v6316_v62, 7  ;;  %v3262_v12 = vsel %vm1127_vm4, %v6316_v62, %v3261_v11  ;;  %v3279_v36 = vrot.slane %v6316_v62, 1 }
 0xeb0   :  { %v3091_v6 = vmul.f32 %v5195_v4, %v6252_v40  ;;  %5013 = vmatpush3.msra.mxu0 %v6278_v54  ;;  %5014 = vmatprep.mubr.msk.f32.mxu0 %vm5282_vm1, %v5281_v41  ;;  %v3264_v24 = vsel %vm1130_vm5, %v3263_v50, %v3262_v12  ;;  %v3296_v38 = vrot.slane %v6316_v62, 2  ;;  %v3313_v20 = vrot.slane %v6316_v62, 3 }
 0xeb1   :  { %v6346_v19 = vmul.f32 %v6272_v57, %v3092_v47  ;;  %5022 = vmatprep.subr.mxu0 %v5281_v41  ;;  %v3245_v11 = vsel %vm1127_vm4, %v3244_v3, %v3243_v55  ;;  %v3280_v40 = vsel %vm1127_vm4, %v3279_v36, %v3278_v63  ;;  %v3330_v54 = vrot.slane %v6316_v62, 4 }
 0xeb2   :  { %v5197_v34 = vpop.eup %5196  ;;  %v6353_v37 = vmul.f32 %v6270_v46, %v3091_v6  ;;  %v3247_v7 = vsel %vm1130_vm5, %v3246_v52, %v3245_v11  ;;  %v3281_v5 = vsel %vm1130_vm5, %v6312_v48, %v3280_v40  ;;  %v3297_v57 = vsel %vm1127_vm4, %v3296_v38, %v3295_v51  ;;  %v3821_v52 = vpop.permute.xlu1 %3820 }
 0xeb3   :  { %v5199_v14 = vpop.eup %5198  ;;  %v3094_v32 = vmul.f32 %v5197_v34, %v6258_v49  ;;  %5020 = vmatmul.mubr.msk.f32.vlgmr.msra.gmra.mxu1 %vm241_vm2, %v6346_v19  ;;  %v3250_v55 = vrot.slane %v6346_v19, 4  ;;  %v3267_v63 = vrot.slane %v6346_v19, 5  ;;  %v3284_v46 = vrot.slane %v6346_v19, 6 }
 0xeb4   :  { %v3093_v39 = vmul.f32 %v5199_v14, %v6260_v30  ;;  %5015 = vmatmul.mubr.msk.f32.vlgmr.msra.gmra.mxu0 %vm241_vm2, %v6353_v37  ;;  %5028 = vmatpush3.msra.mxu1 %v3896_v58  ;;  %v3248_v51 = vrot.slane %v6353_v37, 5  ;;  %v3265_v49 = vrot.slane %v6353_v37, 6  ;;  %v3282_v50 = vrot.slane %v6353_v37, 7 }
 0xeb5   :  { %v6372_v45 = vmul.f32 %v6276_v33, %v3094_v32  ;;  %5023 = vmatpush3.msra.mxu0 %v3821_v52  ;;  %5024 = vmatprep.mubr.msk.f32.mxu0 %vm5282_vm1, %v5281_v41  ;;  %v3299_v30 = vsel %vm1130_vm5, %v3298_v31, %v3297_v57  ;;  %v3301_v4 = vrot.slane %v6346_v19, 7  ;;  %v3314_v47 = vsel %vm1127_vm4, %v3313_v20, %v6302_v9 }
 0xeb6   :  { %v6381_v3 = vmul.f32 %v6274_v29, %v3093_v39  ;;  %5029 = vmatprep.mubr.msk.f32.mxu1 %vm5282_vm1, %v5281_v41  ;;  %v3249_v33 = vsel %vm1133_vm7, %v3248_v51, %v3247_v7  ;;  %v3266_v12 = vsel %vm1133_vm7, %v3265_v49, %v3264_v24  ;;  %v3283_v36 = vsel %vm1133_vm7, %v3282_v50, %v3281_v5 }
 0xeb7   :  { %5030 = vmatmul.mubr.msk.f32.vlgmr.msra.gmra.mxu1 %vm241_vm2, %v6372_v45  ;;  %v3251_v31 = vsel %vm1136_vm6, %v3250_v55, %v3249_v33  ;;  %v3254_v6 = vrot.slane %v6372_v45, 2  ;;  %v3268_v9 = vsel %vm1136_vm6, %v3267_v63, %v3266_v12  ;;  %v3271_v29 = vrot.slane %v6372_v45, 3 }
 0xeb8   :  { %5025 = vmatmul.mubr.msk.f32.vlgmr.msra.gmra.mxu0 %vm241_vm2, %v6381_v3  ;;  %v3252_v38 = vrot.slane %v6381_v3, 3  ;;  %v3269_v24 = vrot.slane %v6381_v3, 4  ;;  %v3285_v20 = vsel %vm1136_vm6, %v3284_v46, %v3283_v36  ;;  %v3286_v11 = vrot.slane %v6381_v3, 5 }
 0xeb9   :  { %v3288_v40 = vrot.slane %v6372_v45, 4  ;;  %v3300_v34 = vsel %vm1133_vm7, %v6353_v37, %v3299_v30  ;;  %v3303_v7 = vrot.slane %v6381_v3, 6  ;;  %v3305_v5 = vrot.slane %v6372_v45, 5 }
 0xeba   :  { %v3253_v57 = vsel %vm1139_vm9, %v3252_v38, %v3251_v31  ;;  %v3270_v14 = vsel %vm1139_vm9, %v3269_v24, %v3268_v9  ;;  %v3287_v32 = vsel %vm1139_vm9, %v3286_v11, %v3285_v20  ;;  %v3302_v58 = vsel %vm1136_vm6, %v3301_v4, %v3300_v34 }
 0xebb   :  { %v6410_v55 = vsel %vm1142_vm8, %v3254_v6, %v3253_v57  ;;  %v6413_v63 = vsel %vm1142_vm8, %v3271_v29, %v3270_v14  ;;  %v6416_v46 = vsel %vm1142_vm8, %v3288_v40, %v3287_v32  ;;  %v3304_v39 = vsel %vm1139_vm9, %v3303_v7, %v3302_v58 }
 0xebc   :  { %v6420_v52 = vsel %vm1142_vm8, %v3305_v5, %v3304_v39  ;;  %v3316_v51 = vsel %vm1130_vm5, %v3315_v1, %v3314_v47  ;;  %v3317_v49 = vrot.slane %v6353_v37, 1  ;;  %v3320_v50 = vrot.slane %v6381_v3, 7 }
 0xebd   :  { %v3322_v30 = vrot.slane %v6372_v45, 6  ;;  %v3331_v4 = vsel %vm1127_vm4, %v3330_v54, %v6305_v26  ;;  %v3334_v33 = vrot.slane %v6353_v37, 2  ;;  %v3336_v12 = vrot.slane %v6346_v19, 1 }
 0xebe   :  { %v3318_v36 = vsel %vm1133_vm7, %v3317_v49, %v3316_v51  ;;  %v3333_v31 = vsel %vm1130_vm5, %v3332_v42, %v3331_v4  ;;  %v3339_v1 = vrot.slane %v6372_v45, 7  ;;  %v3347_v47 = vrot.slane %v6316_v62, 5  ;;  %v4656_v4 = vld [vmem:[%s6689_s6 + $0x28] sm:$0xff] }
 0xebf   :  { %v3319_v6 = vsel %vm1136_vm6, %v6346_v19, %v3318_v36  ;;  %v3335_v9 = vsel %vm1133_vm7, %v3334_v33, %v3333_v31  ;;  %v3351_v26 = vrot.slane %v6353_v37, 3  ;;  %v3353_v54 = vrot.slane %v6346_v19, 2  ;;  %v4655_v33 = vld [vmem:[%s6689_s6 + $0x20] sm:$0xff] }
 0xec0   :  { %v3321_v29 = vsel %vm1139_vm9, %v3320_v50, %v3319_v6  ;;  %v3337_v38 = vsel %vm1136_vm6, %v3336_v12, %v3335_v9  ;;  %v3348_v42 = vsel %vm1127_vm4, %v3347_v47, %v6308_v10  ;;  %v3355_v24 = vrot.slane %v6381_v3, 1 }
 0xec1   :  { %v6449_v20 = vsel %vm1142_vm8, %v3322_v30, %v3321_v29  ;;  %v3338_v11 = vsel %vm1139_vm9, %v6381_v3, %v3337_v38  ;;  %v3350_v40 = vsel %vm1130_vm5, %v3349_v22, %v3348_v42  ;;  %v3229_v34 = vrot.slane %v6316_v62, 6 }
 0xec2   :  { %v6458_v7 = vsel %vm1142_vm8, %v3339_v1, %v3338_v11  ;;  %v3352_v5 = vsel %vm1133_vm7, %v3351_v26, %v3350_v40  ;;  %v3233_v10 = vrot.slane %v6353_v37, 4  ;;  %v3235_v57 = vrot.slane %v6346_v19, 3 }
 0xec3   :  { %v3354_v14 = vsel %vm1136_vm6, %v3353_v54, %v3352_v5  ;;  %v3230_v32 = vsel %vm1127_vm4, %v3229_v34, %v6294_v44  ;;  %v3237_v58 = vrot.slane %v6381_v3, 2  ;;  %v3239_v39 = vrot.slane %v6372_v45, 1 }
 0xec4   :  { %v3356_v22 = vsel %vm1139_vm9, %v3355_v24, %v3354_v14  ;;  %v3232_v62 = vsel %vm1130_vm5, %v3231_v18, %v3230_v32  ;;  %v4658_v18 = vld [vmem:[%s6689_s6 + $0x38] sm:$0xff] }
 0xec5   :  { %v6474_v37 = vsel %vm1142_vm8, %v6372_v45, %v3356_v22  ;;  %v3234_v19 = vsel %vm1133_vm7, %v3233_v10, %v3232_v62  ;;  %5032 = vmatprep.subr.mxu0 %v4658_v18  ;;  %v4657_v45 = vld [vmem:[%s6689_s6 + $0x30] sm:$0xff] }
 0xec6   :  { %v3236_v51 = vsel %vm1136_vm6, %v3235_v57, %v3234_v19  ;;  %5033 = vmatpush3.msra.mxu0 %v4658_v18 }
 0xec7   :  { %v3238_v44 = vsel %vm1139_vm9, %v3237_v58, %v3236_v51  ;;  %5034 = vmatprep.subr.mxu0 %v4657_v45 }
 0xec8   :  { %v6480_v3 = vsel %vm1142_vm8, %v3239_v39, %v3238_v44  ;;  %5035 = vmatpush3.msra.mxu0 %v4657_v45  ;;  %v4008_v39 = vrot.slane %v6036_v23, %v5402_v28 }
 0xec9   :  { %5036 = vmatprep.subr.mxu0 %v4656_v4 }
 0xeca   :  { %5037 = vmatpush3.msra.mxu0 %v4656_v4 }
 0xecb   :  { %5038 = vmatprep.subr.mxu0 %v4655_v33 }
 0xecc   :  { %5039 = vmatpush3.msra.mxu0 %v4655_v33 }
 0xf1f   :  { %v3516_v49 = vpop.f32.mrf.mxu1 }
 0xf21   :  { %v5001_v50 = vpop.f32.mrf.mxu1 }
 0xf23   :  { %v3441_v48 = vpop.f32.mrf.mxu0 }
 0xf25   :  { %v4996_v30 = vpop.f32.mrf.mxu0 }
 0xf6d   :  { %v3666_v12 = vpop.f32.mrf.mxu1 }
 0xf6e   :  { %3974 = vrot.lane.b32.xlu0 %v3666_v12, %s5290_s19 }
 0xf6f   :  { %v3591_v36 = vpop.f32.mrf.mxu0  ;;  %v5011_v31 = vpop.f32.mrf.mxu1 }
 0xf70   :  { %3972 = vrot.lane.b32.xlu1 %v3591_v36, %s5290_s19 }
 0xf71   :  { %v5006_v1 = vpop.f32.mrf.mxu0 }
 0xf73   :  { %v3816_v47 = vpop.f32.mrf.mxu1 }
 0xf74   :  { %v3741_v6 = vpop.f32.mrf.mxu0  ;;  %3982 = vrot.lane.b32.xlu0 %v3816_v47, %s5291_s22 }
 0xf75   :  { %3980 = vrot.lane.b32.xlu1 %v3741_v6, %s5291_s22  ;;  %v5021_v9 = vpop.f32.mrf.mxu1  ;;  %v4663_v6 = vld [vmem:[%s6690_s7 + $0x30] sm:$0xff] }
 0xf76   :  { %v5016_v26 = vpop.f32.mrf.mxu0  ;;  %v4662_v9 = vld [vmem:[%s6690_s7 + $0x28] sm:$0xff] }
 0xf77   :  { %v3966_v54 = vpop.f32.mrf.mxu1  ;;  %v4661_v26 = vld [vmem:[%s6690_s7 + $0x20] sm:$0xff] }
 0xf78   :  { %v3891_v29 = vpop.f32.mrf.mxu0  ;;  %3990 = vrot.lane.b32.xlu0 %v3966_v54, %s5292_s27 }
 0xf79   :  { %3988 = vrot.lane.b32.xlu1 %v3891_v29, %s5292_s27  ;;  %v5031_v38 = vpop.f32.mrf.mxu1 }
 0xf7a   :  { %v5026_v42 = vpop.f32.mrf.mxu0 }
 0xfe0   :  { %v3975_v24 = vpop.permute.xlu0 %3974 }
 0xfe1   :  { %v3995_v5 = vsel %vm241_vm2, %v3516_v49, %v3975_v24 }
 0xfe2   :  { %v3973_v11 = vpop.permute.xlu1 %3972 }
 0xfe3   :  { %v3994_v10 = vsel %vm241_vm2, %v3441_v48, %v3973_v11 }
 0xfe6   :  { %v3983_v40 = vpop.permute.xlu0 %3982 }
 0xfe7   :  { %v3981_v34 = vpop.permute.xlu1 %3980  ;;  %v3997_v57 = vsel %vm1265_vm10, %v3995_v5, %v3983_v40 }
 0xfe8   :  { %v3996_v32 = vsel %vm1265_vm10, %v3994_v10, %v3981_v34  ;;  %v4121_v34 = vrot.slane %v6036_v23, %v5937_v17 }
 0xfea   :  { %v3991_v14 = vpop.permute.xlu0 %3990 }
 0xfeb   :  { %v3989_v58 = vpop.permute.xlu1 %3988  ;;  %v3999_v22 = vsel %vm1267_vm11, %v3997_v57, %v3991_v14 }
 0xfec   :  { %v3998_v62 = vsel %vm1267_vm11, %v3996_v32, %v3989_v58  ;;  %v4127_v32 = vrot.slane %v6036_v23, %v5947_v13  ;;  %v4673_v23 = vld [vmem:[%s6691_s8 + $0x70] sm:$0xff] }
 0xfed   :  { %5040 = vmatprep.mubr.msk.f32.mxu0 %vm44_vm0, %v3998_v62 }
 0xfee   :  { %5041 = vmatmul.mubr.msk.f32.vlgmr.msra.gmra.mxu0 %vm44_vm0, %v3999_v22 }
0x10ae   :  { %v5042_v19 = vpop.f32.mrf.mxu0 }
0x10af   :  { %v4087_v51 = vadd.f32 %v5042_v19, %v4008_v39  ;;  %v4672_v19 = vld [vmem:[%s6691_s8 + $0x68] sm:$0xff] }
0x10b0   :  { %v4081_v44 = vpop.f32.mrf.mxu0 }
0x10b1   :  { %v4091_v49 = vadd.f32 %v4087_v51, %v6025_v21  ;;  %v4082_v50 = vadd.f32 %v4081_v44, %v4008_v39  ;;  %v4674_v39 = vld [vmem:[%s6691_s8 + $0x78] sm:$0xff]  ;;  %v4671_v51 = vld [vmem:[%s6691_s8 + $0x60] sm:$0xff] }
0x10b2   :  { %5054 = vmatprep.subr.mxu0 %v4674_v39  ;;  %v4670_v44 = vld [vmem:[%s6691_s8 + $0x58] sm:$0xff] }
0x10b3   :  { %v4090_v48 = vadd.f32 %v4082_v50, %v6023_v8  ;;  %v4095_v30 = vsel %vm44_vm0, %v4091_v49, 0.0  ;;  %v4664_v8 = vld [vmem:[%s6690_s7 + $0x38] sm:$0xff]  ;;  %5055 = vmatpush3.msra.mxu0 %v4674_v39  ;;  %v4668_v50 = vld [vmem:[%s6691_s8 + $0x48] sm:$0xff] }
0x10b4   :  { %4096 = vadd.xlane.f32.xlu0 %v4095_v30  ;;  %5043 = vmatprep.subr.mxu1 %v4664_v8  ;;  %v6567_v30 = vld [vmem:[%s6687_s4 + $0x8] sm:$0xff] }
0x10b5   :  { %v4092_v18 = vsel %vm44_vm0, %v4090_v48, 0.0  ;;  %5044 = vmatpush3.msra.mxu1 %v4664_v8  ;;  %5056 = vmatprep.subr.mxu0 %v4673_v23 }
0x10b6   :  { %4093 = vadd.xlane.f32.xlu1 %v4092_v18  ;;  %5045 = vmatprep.subr.mxu1 %v4663_v6  ;;  %v4138_v18 = vrot.slane %v6567_v30, %v2043_v59 }
0x10b7   :  { %5046 = vmatpush3.msra.mxu1 %v4663_v6  ;;  %5057 = vmatpush3.msra.mxu0 %v4673_v23 }
0x10b8   :  { %5047 = vmatprep.subr.mxu1 %v4662_v9  ;;  %5058 = vmatprep.subr.mxu0 %v4672_v19 }
0x10b9   :  { %5048 = vmatpush3.msra.mxu1 %v4662_v9  ;;  %5059 = vmatpush3.msra.mxu0 %v4672_v19 }
0x10ba   :  { %5049 = vmatprep.subr.mxu1 %v4661_v26  ;;  %5060 = vmatprep.subr.mxu0 %v4671_v51 }
0x10bb   :  { %5050 = vmatpush3.msra.mxu1 %v4661_v26  ;;  %5061 = vmatpush3.msra.mxu0 %v4671_v51 }
0x10bc   :  { %5073 = vmatprep.subr.mxu1 %v5281_v41  ;;  %5062 = vmatprep.subr.mxu0 %v4670_v44 }
0x10bd   :  { %5063 = vmatpush3.msra.mxu0 %v4670_v44 }
0x113d   :  { %v4097_v45 = vpop.xlane.xlu0 %4096 }
0x113e   :  { %v4099_v4 = vmul.f32 0.03125, %v4097_v45 }
0x113f   :  { %v4094_v33 = vpop.xlane.xlu1 %4093 }
0x1140   :  { %v4101_v12 = vsub.f32 %v4091_v49, %v4099_v4  ;;  %v4098_v36 = vmul.f32 0.03125, %v4094_v33  ;;  %v4669_v49 = vld [vmem:[%s6691_s8 + $0x50] sm:$0xff] }
0x1141   :  { %5064 = vmatprep.subr.mxu0 %v4669_v49 }
0x1142   :  { %v4100_v28 = vsub.f32 %v4090_v48, %v4098_v36  ;;  %v4103_v31 = vmul.f32 %v4101_v12, %v4101_v12  ;;  %5065 = vmatpush3.msra.mxu0 %v4669_v49  ;;  %v4667_v48 = vld [vmem:[%s6691_s8 + $0x40] sm:$0xff] }
0x1143   :  { %5066 = vmatprep.subr.mxu0 %v4668_v50 }
0x1144   :  { %v4107_v1 = vsel %vm44_vm0, %v4103_v31, 0.0  ;;  %v4102_v47 = vmul.f32 %v4100_v28, %v4100_v28  ;;  %5067 = vmatpush3.msra.mxu0 %v4668_v50 }
0x1145   :  { %4108 = vadd.xlane.f32.xlu1 %v4107_v1  ;;  %5068 = vmatprep.subr.mxu0 %v4667_v48 }
0x1146   :  { %v4104_v21 = vsel %vm44_vm0, %v4102_v47, 0.0  ;;  %5069 = vmatpush3.msra.mxu0 %v4667_v48 }
0x1147   :  { %4105 = vadd.xlane.f32.xlu0 %v4104_v21 }
0x11ce   :  { %v4109_v54 = vpop.xlane.xlu1 %4108 }
0x11cf   :  { %v4111_v29 = vmul.f32 0.03125, %v4109_v54 }
0x11d0   :  { %v4106_v38 = vpop.xlane.xlu0 %4105 }
0x11d1   :  { %v4113_v42 = vadd.f32 1e-12, %v4111_v29  ;;  %v4110_v24 = vmul.f32 0.03125, %v4106_v38 }
0x11d3   :  { %5200 = vrsqrt.f32 %v4113_v42  ;;  %v4112_v11 = vadd.f32 1e-12, %v4110_v24 }
0x11d5   :  { %5202 = vrsqrt.f32 %v4112_v11 }
0x11e0   :  { %v5201_v40 = vpop.eup %5200 }
0x11e1   :  { %v4117_v5 = vmul.f32 %v5201_v40, %v4101_v12 }
0x11e2   :  { %v5203_v10 = vpop.eup %5202 }
0x11e3   :  { %v4116_v57 = vmul.f32 %v5203_v10, %v4100_v28  ;;  %v4123_v14 = vmul.f32 %v4121_v34, %v4117_v5 }
0x11e5   :  { %v4122_v58 = vmul.f32 %v4121_v34, %v4116_v57  ;;  %v4129_v62 = vadd.f32 %v4127_v32, %v4123_v14  ;;  %v4250_v34 = vrot.slane %v6567_v30, %v2154_v43 }
0x11e7   :  { %v6533_v22 = vadd.f32 %v4127_v32, %v4122_v58 }
0x11e9   :  { %5051 = vmatprep.mubr.msk.f32.mxu1 %vm44_vm0, %v6533_v22 }
0x11ea   :  { %5052 = vmatmul.mubr.msk.f32.vlgmr.msra.gmra.mxu1 %vm44_vm0, %v4129_v62 }
0x11eb   :  { %5081 = vmatprep.mubr.msk.f32.mxu1 %vm5282_vm1, %v5281_v41 }
0x12aa   :  { %v5053_v45 = vpop.f32.mrf.mxu1 }
0x12ab   :  { %v4217_v4 = vadd.f32 %v5053_v45, %v4138_v18 }
0x12ac   :  { %v4211_v33 = vpop.f32.mrf.mxu1 }
0x12ad   :  { %v4223_v12 = vmul.f32 0.044715, %v4217_v4  ;;  %v4212_v36 = vadd.f32 %v4211_v33, %v4138_v18  ;;  %v4221_v24 = vmul.f32 0.5, %v4217_v4 }
0x12af   :  { %v4225_v28 = vmul.f32 %v4223_v12, %v4217_v4  ;;  %v4222_v31 = vmul.f32 0.044715, %v4212_v36  ;;  %v4220_v59 = vmul.f32 0.5, %v4212_v36 }
0x12b1   :  { %v4227_v1 = vmul.f32 %v4225_v28, %v4217_v4  ;;  %v4224_v47 = vmul.f32 %v4222_v31, %v4212_v36 }
0x12b3   :  { %v4229_v21 = vadd.f32 %v4227_v1, %v4217_v4  ;;  %v4226_v8 = vmul.f32 %v4224_v47, %v4212_v36  ;;  %v4369_v1 = vrot.slane %v6567_v30, %v2273_v16 }
0x12b5   :  { %v4231_v6 = vmul.f32 0.7978846, %v4229_v21  ;;  %v4228_v9 = vadd.f32 %v4226_v8, %v4212_v36 }
0x12b7   :  { %5204 = vtanh.f32 %v4231_v6  ;;  %v4230_v26 = vmul.f32 0.7978846, %v4228_v9 }
0x12b9   :  { %5206 = vtanh.f32 %v4230_v26 }
0x12c4   :  { %v5205_v54 = vpop.eup %5204 }
0x12c5   :  { %v4235_v38 = vadd.f32 1.0, %v5205_v54 }
0x12c6   :  { %v5207_v29 = vpop.eup %5206 }
0x12c7   :  { %v4234_v42 = vadd.f32 1.0, %v5207_v29  ;;  %v4237_v40 = vmul.f32 %v4235_v38, %v4221_v24 }
0x12c9   :  { %v4236_v11 = vmul.f32 %v4234_v42, %v4220_v59 }
0x12cb   :  { %5070 = vmatprep.mubr.msk.f32.mxu0 %vm1276_vm12, %v4236_v11 }
0x12cc   :  { %5071 = vmatmul.mubr.msk.f32.vlgmr.msra.gmra.mxu0 %vm1276_vm12, %v4237_v40 }
0x138c   :  { %v5072_v5 = vpop.f32.mrf.mxu0 }
0x138d   :  { %v4329_v10 = vadd.f32 %v5072_v5, %v4250_v34 }
0x138e   :  { %v4323_v57 = vpop.f32.mrf.mxu0 }
0x138f   :  { %v4333_v14 = vadd.f32 %v4329_v10, %v4129_v62  ;;  %v4324_v32 = vadd.f32 %v4323_v57, %v4250_v34 }
0x1391   :  { %v4332_v58 = vadd.f32 %v4324_v32, %v6533_v22  ;;  %v4337_v39 = vsel %vm44_vm0, %v4333_v14, 0.0  ;;  %v4377_v22 = vld [vmem:[%s6692_s9 + $0x18] sm:$0xff] }
0x1392   :  { %4338 = vadd.xlane.f32.xlu0 %v4337_v39  ;;  %5074 = vmatpush3.msra.mxu1 %v4377_v22 }
0x1393   :  { %v4334_v23 = vsel %vm44_vm0, %v4332_v58, 0.0  ;;  %5075 = vmatprep.subr.mxu1 %v5281_v41 }
0x1394   :  { %4335 = vadd.xlane.f32.xlu1 %v4334_v23  ;;  %v4381_v23 = vld [vmem:[%s6692_s9 + $0x38] sm:$0xff] }
0x141b   :  { %v4339_v19 = vpop.xlane.xlu0 %4338 }
0x141c   :  { %v4341_v51 = vmul.f32 0.03125, %v4339_v19  ;;  %v4380_v19 = vld [vmem:[%s6692_s9 + $0x30] sm:$0xff] }
0x141d   :  { %v4336_v44 = vpop.xlane.xlu1 %4335 }
0x141e   :  { %v4343_v49 = vsub.f32 %v4333_v14, %v4341_v51  ;;  %v4340_v50 = vmul.f32 0.03125, %v4336_v44  ;;  %v4379_v51 = vld [vmem:[%s6692_s9 + $0x28] sm:$0xff]  ;;  %v4378_v44 = vld [vmem:[%s6692_s9 + $0x20] sm:$0xff] }
0x1420   :  { %v4342_v48 = vsub.f32 %v4332_v58, %v4340_v50  ;;  %v4345_v43 = vmul.f32 %v4343_v49, %v4343_v49 }
0x1422   :  { %v4349_v18 = vsel %vm44_vm0, %v4345_v43, 0.0  ;;  %v4344_v45 = vmul.f32 %v4342_v48, %v4342_v48 }
0x1423   :  { %4350 = vadd.xlane.f32.xlu0 %v4349_v18 }
0x1424   :  { %v4346_v62 = vsel %vm44_vm0, %v4344_v45, 0.0 }
0x1425   :  { %4347 = vadd.xlane.f32.xlu1 %v4346_v62 }
0x1436   :  { %3256 = vrot.lane.b32.xlu1 %v6410_v55, %s5290_s19 }
0x1439   :  { %1159 = vrot.lane.b32.xlu0 %v5818_v60, %s5290_s19  ;;  %v4376_v60 = vld [vmem:[%s6692_s9 + $0x10] sm:$0xff] }
0x143a   :  { %1176 = vrot.lane.b32.xlu1 %v5821_v0, %s5291_s22  ;;  %5076 = vmatpush3.msra.mxu1 %v4376_v60  ;;  %v4375_v0 = vld [vmem:[%s6692_s9 + $0x8] sm:$0xff] }
0x143b   :  { %5077 = vmatprep.subr.mxu1 %v5281_v41 }
0x143c   :  { %5078 = vmatpush3.msra.mxu1 %v4375_v0 }
0x143d   :  { %3273 = vrot.lane.b32.xlu0 %v6413_v63, %s5291_s22  ;;  %5079 = vmatprep.subr.mxu1 %v5281_v41 }
0x143e   :  { %1193 = vrot.lane.b32.xlu1 %v5824_v2, %s5292_s27  ;;  %v4374_v2 = vld [vmem:[%s6692_s9] sm:$0xff]  ;;  %s5297_s9 = smov [#allocation4]  }
0x143f   :  { %5080 = vmatpush3.msra.mxu1 %v4374_v2  ;;  %s4563_s8 = sshll.u32 %s5297_s9, 4  ;;  %s4564_s8 = int_to_ptr.vmem [resolvable:$true] %s4563_s8 }
0x1440   :  { %5084 = vmatprep.subr.mxu1 %v5281_v41  ;;  %s5217_s7 = scalar_lea.vmem %s4564_s8, 32  ;;  %p5222_p1 = scmp.lt.s32.totalorder %s4564_s8, %s4564_s8 }
0x1441   :  { %3290 = vrot.lane.b32.xlu0 %v6416_v46, %s5292_s27  ;;  %p5218_p0 = scmp.ne.s32.totalorder %s4564_s8, %s5217_s7  ;;  %p5223_p2 = scmp.lt.s32.totalorder %s5217_s7, %s5217_s7 }
0x1442   :  { %1210 = vrot.lane.b32.xlu1 %v5828_v15, %s5293_s28 }
0x1443   :  { %p5224_p3 = por %p5223_p2, %p5222_p1 }
0x1445   :  { %3307 = vrot.lane.b32.xlu0 %v6420_v52, %s5293_s28  ;;  %s5298_s28 = smov [#allocation2]   ;;  %p5225_p4 = pnand %p5224_p3, %p5218_p0 }
0x1446   :  { %1227 = vrot.lane.b32.xlu1 %v5857_v53, %s5294_s1  ;;  %s4548_s5 = sshll.u32 %s5298_s28, 4  ;;  %s4549_s5 = int_to_ptr.vmem [resolvable:$true] %s4548_s5 }
0x1449   :  { %3324 = vrot.lane.b32.xlu0 %v6449_v20, %s5294_s1 }
0x144a   :  { %1244 = vrot.lane.b32.xlu1 %v5866_v27, %s5295_s2 }
0x144d   :  { %3341 = vrot.lane.b32.xlu0 %v6458_v7, %s5295_s2 }
0x144e   :  { %1261 = vrot.lane.b32.xlu1 %v5882_v61, %s5296_s24  ;;  %v4363_v61 = vrot.slane %v6567_v30, %v2267_v56 }
0x1451   :  { %3358 = vrot.lane.b32.xlu0 %v6474_v37, %s5296_s24 }
0x14ac   :  { %v4351_v15 = vpop.xlane.xlu0 %4350 }
0x14ad   :  { %v4353_v53 = vmul.f32 0.03125, %v4351_v15 }
0x14ae   :  { %v4348_v55 = vpop.xlane.xlu1 %4347 }
0x14af   :  { %v4355_v63 = vadd.f32 1e-12, %v4353_v53  ;;  %v4352_v46 = vmul.f32 0.03125, %v4348_v55 }
0x14b0   :  { %v1160_v52 = vpop.permute.xlu0 %1159 }
0x14b1   :  { %5208 = vrsqrt.f32 %v4355_v63  ;;  %v4354_v20 = vadd.f32 1e-12, %v4352_v46  ;;  %v1264_v25 = vsel %vm241_vm2, %v5888_v35, %v1160_v52 }
0x14b2   :  { %v3257_v4 = vpop.permute.xlu1 %3256 }
0x14b3   :  { %5210 = vrsqrt.f32 %v4354_v20  ;;  %v3361_v8 = vsel %vm241_vm2, %v6480_v3, %v3257_v4 }
0x14b4   :  { %v3274_v33 = vpop.permute.xlu0 %3273 }
0x14b5   :  { %v3362_v38 = vsel %vm1265_vm10, %v3361_v8, %v3274_v33 }
0x14b6   :  { %v1177_v12 = vpop.permute.xlu1 %1176 }
0x14b7   :  { %v1266_v3 = vsel %vm1265_vm10, %v1264_v25, %v1177_v12 }
0x14b8   :  { %v3291_v27 = vpop.permute.xlu0 %3290 }
0x14b9   :  { %v3363_v16 = vsel %vm1267_vm11, %v3362_v38, %v3291_v27 }
0x14ba   :  { %v1194_v36 = vpop.permute.xlu1 %1193 }
0x14bb   :  { %v1268_v11 = vsel %vm1267_vm11, %v1266_v3, %v1194_v36 }
0x14bc   :  { %v3308_v7 = vpop.permute.xlu0 %3307 }
0x14bd   :  { %v3364_v42 = vsel %vm44_vm0, %v3363_v16, %v3308_v7 }
0x14be   :  { %v5209_v37 = vpop.eup %5208  ;;  %v1211_v28 = vpop.permute.xlu1 %1210 }
0x14bf   :  { %v4359_v31 = vmul.f32 %v5209_v37, %v4343_v49  ;;  %v1269_v35 = vsel %vm44_vm0, %v1268_v11, %v1211_v28  ;;  %v5216_v49 = vld [vmem:[%s6686_s3] sm:$0xf] }
0x14c0   :  { %v5211_v47 = vpop.eup %5210  ;;  %v3325_v21 = vpop.permute.xlu0 %3324  ;;  %v4385_v50 = vrot.slane %v5216_v49, %v5937_v17 }
0x14c1   :  { %v4358_v6 = vmul.f32 %v5211_v47, %v4342_v48  ;;  %v4365_v9 = vmul.f32 %v4363_v61, %v4359_v31  ;;  %v3365_v40 = vsel %vm1270_vm13, %v3364_v42, %v3325_v21 }
0x14c2   :  { %v1228_v26 = vpop.permute.xlu1 %1227 }
0x14c3   :  { %v4364_v54 = vmul.f32 %v4363_v61, %v4358_v6  ;;  %v4371_v29 = vadd.f32 %v4369_v1, %v4365_v9  ;;  %v1271_v57 = vsel %vm1270_vm13, %v1269_v35, %v1228_v26 }
0x14c4   :  { %v3342_v56 = vpop.permute.xlu0 %3341 }
0x14c5   :  { %v4370_v30 = vadd.f32 %v4369_v1, %v4364_v54  ;;  %v4388_v59 = vrot.slane %v4371_v29, 7  ;;  %4373 = vst.msk [vmem:[#allocation2 + $0x8] sm:$0xff] %vm44_vm0, %v4371_v29  ;;  %v3366_v5 = vsel %vm1272_vm14, %v3365_v40, %v3342_v56 }
0x14c6   :  { %v1245_v24 = vpop.permute.xlu1 %1244 }
0x14c7   :  { %v4389_v34 = vsel %vm1124_vm3, %v4388_v59, %v4370_v30  ;;  %4372 = vst.msk [vmem:[#allocation2] sm:$0xff] %vm44_vm0, %v4370_v30  ;;  %v1273_v32 = vsel %vm1272_vm14, %v1271_v57, %v1245_v24 }
0x14c8   :  { %v3359_v10 = vpop.permute.xlu0 %3358  ;;  %5082 = vmatmul.mubr.msk.f32.vlgmr.msra.gmra.mxu1 %vm44_vm0, %v4389_v34 }
0x14c9   :  { %v3367_v14 = vsel %vm1274_vm15, %v3366_v5, %v3359_v10  ;;  %5092 = vmatprep.mubr.msk.f32.mxu1 %vm5282_vm1, %v5281_v41  ;;  %5085 = vmatpush3.msra.mxu1 %v4381_v23  ;;  %vm4463_vm1 = vcmask 254976  }
0x14ca   :  { %4646 = vst.msk [vmem:[%s6694_s11 + $0x8] sm:$0xff] %vm1276_vm12, %v3367_v14  ;;  %v1262_v58 = vpop.permute.xlu1 %1261  ;;  %5086 = vmatprep.subr.mxu1 %v5281_v41 }
0x14cb   :  { %v1275_v39 = vsel %vm1274_vm15, %v1273_v32, %v1262_v58  ;;  %5087 = vmatpush3.msra.mxu1 %v4380_v19 }
0x14cc   :  { %1277 = vst.msk [vmem:[%s6694_s11] sm:$0xff] %vm1276_vm12, %v1275_v39  ;;  %5088 = vmatprep.subr.mxu1 %v5281_v41 }
0x14cd   :  { %5089 = vmatpush3.msra.mxu1 %v4379_v51 }
0x14ce   :  { %5090 = vmatprep.subr.mxu1 %v5281_v41 }
0x14cf   :  { %5091 = vmatpush3.msra.mxu1 %v4378_v44 }
0x1588   :  { %v4458_v48 = vpop.f32.mrf.mxu1 }
0x1589   :  { %v4459_v43 = vadd.f32 %v4458_v48, %v4385_v50 }
0x158a   :  { %v5083_v18 = vpop.f32.mrf.mxu1 }
0x158b   :  { %5212 = vtanh.f32 %v4459_v43 }
0x1598   :  { %v5213_v45 = vpop.eup %5212 }
0x1599   :  { %5093 = vmatmul.mubr.msk.f32.vlgmr.msra.gmra.mxu1 %vm44_vm0, %v5213_v45  ;;  %4464 = vst.msk [vmem:[#allocation4] sm:$0x3] %vm4463_vm1, %v5213_v45 }
0x159a   :  { %5228 = shalt.err (!%p5225_p4)
}
0x159b   :  { %4566 = dma.vmem_to_hbm [thread:$0]  %s4564_s8, 32, %s6695_s12, [#allocation5]  }
0x159c   :  { %s5237_s27 = scalar_lea.vmem %s4549_s5, 256  ;;  %p5242_p6 = scmp.lt.s32.totalorder %s4549_s5, %s4549_s5 }
0x159d   :  { %p5238_p5 = scmp.ne.s32.totalorder %s4549_s5, %s5237_s27  ;;  %p5243_p7 = scmp.lt.s32.totalorder %s5237_s27, %s5237_s27 }
0x159f   :  { %p5244_p8 = por %p5243_p7, %p5242_p6 }
0x15a1   :  { %p5245_p9 = pnand %p5244_p8, %p5238_p5 }
0x15a3   :  { %5248 = shalt.err (!%p5245_p9)
}
0x15a4   :  { %s5299_s1 = smov 128   ;;  %v4468_v41 = vrot.slane %v5216_v49, %v5947_v13  ;;  %s5300_s2 = smov [#allocation6]  }
0x15a5   :  { %4554 = dma.vmem_to_hbm [thread:$0]  %s4549_s5, 256, %s6693_s10, [#allocation3], %s5299_s1, %s5299_s1, %s5290_s19  }
0x15a6   :  { %s4573_s24 = sshll.u32 %s5300_s2, 4  ;;  %s4574_s24 = int_to_ptr.vmem [resolvable:$true] %s4573_s24 }
0x15a7   :  { %s5257_s12 = scalar_lea.vmem %s4574_s24, 32  ;;  %p5262_p11 = scmp.lt.s32.totalorder %s4574_s24, %s4574_s24 }
0x15a8   :  { %p5258_p10 = scmp.ne.s32.totalorder %s4574_s24, %s5257_s12  ;;  %p5263_p12 = scmp.lt.s32.totalorder %s5257_s12, %s5257_s12 }
0x15aa   :  { %p5264_p13 = por %p5263_p12, %p5262_p11 }
0x15ac   :  { %p5265_p0 = pnand %p5264_p13, %p5258_p10 }
0x1659   :  { %v4538_v17 = vpop.f32.mrf.mxu1 }
0x165a   :  { %v4539_v62 = vadd.f32 %v4538_v17, %v4468_v41 }
0x165b   :  { %v5094_v22 = vpop.f32.mrf.mxu1 }
0x165c   :  { %4542 = vst [vmem:[#allocation6] sm:$0x3] %v4539_v62 }
0x165d   :  { %5268 = shalt.err (!%p5265_p0)
}
0x165e   :  { %4576 = dma.vmem_to_hbm [thread:$0]  %s4574_s24, 32, %s6696_s13, [#allocation5]  }
0x165f   :  { %5277 = dma.done.wait [#allocation3], 256  }
0x1660   :  { %5278 = vsyncadd [#allocation3], 4294967040 }
0x1661   :  { %5279 = dma.done.wait [#allocation5], 64  }
0x1662   :  { %5280 = vsyncadd [#allocation5], 4294967232 }
0x1663   :  { %4588 = vsyncpa [#allocation3], 1 }
0x1664   :  { %4589 = vsyncpa [#allocation5], 1 }

</bundles_post_ra>
